<compile_context>
chip_gen: v7x
topology: tpu7x:2x2x1
jax: 0.10.0
libtpu: 0.0.40
codegen_flags: <defaults>
</compile_context>

<pallas_src>
import jax
import jax.numpy as jnp
from jax.experimental import pallas as pl
from jax.experimental.pallas import tpu as pltpu


_VMEM_LIMIT = 32 * 1024 * 1024  # fits v5e (128 MiB phys), v6e (128 MiB), v7x (64 MiB)


def _pick_tile(n, target, mult=8):
    """Largest tile t <= target with n % t == 0 and t % mult == 0; falls back to n."""
    if n <= target:
        return n
    t = (target // mult) * mult
    while t >= mult:
        if n % t == 0:
            return t
        t -= mult
    return n


# -----------------------------------------------------------------------------
# Kernel 1: conv1 as pool-fused im2col matmul.
# patches block: (4, tm, K*K*Cin) -- 4 pool offsets stacked on a leading axis.
# Single MXU matmul over the merged (4*tm) rows, max over the 4 offsets,
# bias + ReLU, bf16 output.  (conv1 is DMA/overhead bound; keep M as large as fits.)
# -----------------------------------------------------------------------------
def conv_pool_relu_kernel(p_ref, w_ref, b_ref, o_ref):
    npool, tm, kkc = p_ref.shape
    cout = w_ref.shape[1]
    pp = p_ref[...].reshape(npool * tm, kkc)          # tm % 8 == 0 -> tile-aligned, free
    y = jnp.dot(pp, w_ref[...], preferred_element_type=jnp.float32)
    y = y.reshape(npool, tm, cout)
    y = jnp.max(y, axis=0)                            # max-pool over the 4 offsets
    o_ref[...] = jnp.maximum(y + b_ref[...], 0.0).astype(o_ref.dtype)


def conv_pool_relu(patches, w_mat, b_row, *, tile_m=512):
    npool, M, kkc = patches.shape
    cout = w_mat.shape[1]
    tm = _pick_tile(M, tile_m)
    return pl.pallas_call(
        conv_pool_relu_kernel,
        out_shape=jax.ShapeDtypeStruct((M, cout), jnp.bfloat16),
        grid=(M // tm,),
        in_specs=[
            pl.BlockSpec((npool, tm, kkc), lambda i: (0, i, 0)),
            pl.BlockSpec((kkc, cout), lambda i: (0, 0)),
            pl.BlockSpec((1, cout), lambda i: (0, 0)),
        ],
        out_specs=pl.BlockSpec((tm, cout), lambda i: (i, 0)),
        compiler_params=pltpu.CompilerParams(
            dimension_semantics=("parallel",),
            vmem_limit_bytes=_VMEM_LIMIT),
    )(patches, w_mat, b_row)


# -----------------------------------------------------------------------------
# Kernel 2: conv2 fully fused: in-kernel im2col (25 shifted matmuls over the VMEM-resident
# 12x12x32 feature block), 2x2 max-pool, bias + ReLU, lane-dense (bt, 1024) output in
# (h, w, c) flatten order (matches the offline-permuted fc1 weights).
# -----------------------------------------------------------------------------
def conv2_fused_kernel(f_ref, w_ref, b_ref, o_ref):
    bt, H, _, cin = f_ref.shape        # (bt, 12, 12, 32)
    K = 5
    HO = H - K + 1                     # 8
    cout = w_ref.shape[2]              # 64

    f = f_ref[...]                     # whole block resident in VMEM (bf16)
    acc = jnp.zeros((bt * HO * HO, cout), jnp.float32)
    for kh in range(K):
        for kw in range(K):
            patch = f[:, kh:kh + HO, kw:kw + HO, :]         # (bt, 8, 8, 32)
            patch = patch.reshape(bt * HO * HO, cin)        # second-minor 8 -> free merge
            acc = acc + jnp.dot(patch, w_ref[kh * K + kw],
                                preferred_element_type=jnp.float32)

    y = acc.reshape(bt, HO, HO, cout)                       # tile-aligned split
    # 2x2 max pool; build the output rows already flattened in (h, w, c) order.
    cols = []
    for i in range(HO // 2):
        yh = jnp.maximum(y[:, 2 * i], y[:, 2 * i + 1])      # (bt, 8, cout)  pool over h
        for j in range(HO // 2):
            cols.append(jnp.maximum(yh[:, 2 * j], yh[:, 2 * j + 1]))  # (bt, cout) pool over w
    out = jnp.concatenate(cols, axis=-1)                    # (bt, 16*cout) lane-dense
    o_ref[...] = jnp.maximum(out + b_ref[...], 0.0).astype(o_ref.dtype)


def conv2_pool_relu(f1, w_mat, b_tiled, *, tile_b=128):
    B, H, W, cin = f1.shape
    n_feat = b_tiled.shape[1]
    bt = _pick_tile(B, tile_b)
    return pl.pallas_call(
        conv2_fused_kernel,
        out_shape=jax.ShapeDtypeStruct((B, n_feat), jnp.bfloat16),
        grid=(B // bt,),
        in_specs=[
            pl.BlockSpec((bt, H, W, cin), lambda i: (i, 0, 0, 0)),
            pl.BlockSpec(w_mat.shape, lambda i: (0, 0, 0)),
            pl.BlockSpec((1, n_feat), lambda i: (0, 0)),
        ],
        out_specs=pl.BlockSpec((bt, n_feat), lambda i: (i, 0)),
        compiler_params=pltpu.CompilerParams(
            dimension_semantics=("parallel",),
            vmem_limit_bytes=_VMEM_LIMIT),
    )(f1, w_mat, b_tiled)


# -----------------------------------------------------------------------------
# Kernel 3: fc1 + ReLU + fc2 + log_softmax, batch-tiled; weights stay VMEM-resident.
# -----------------------------------------------------------------------------
def mlp_logsoftmax_kernel(x_ref, w1_ref, b1_ref, w2_ref, b2_ref, o_ref):
    h = jnp.dot(x_ref[...], w1_ref[...], preferred_element_type=jnp.float32) + b1_ref[...]
    h = jnp.maximum(h, 0.0).astype(jnp.bfloat16)
    logits = jnp.dot(h, w2_ref[...], preferred_element_type=jnp.float32) + b2_ref[...]
    m = jnp.max(logits, axis=-1, keepdims=True)             # fp32 softmax math
    s = logits - m
    lse = jnp.log(jnp.sum(jnp.exp(s), axis=-1, keepdims=True))
    o_ref[...] = s - lse


def mlp_logsoftmax(x_flat, w1, b1_row, w2, b2_row, *, tile_b=256):
    B, d_in = x_flat.shape
    d_hid = w1.shape[1]
    n_cls = w2.shape[1]
    bt = _pick_tile(B, tile_b)
    return pl.pallas_call(
        mlp_logsoftmax_kernel,
        out_shape=jax.ShapeDtypeStruct((B, n_cls), jnp.float32),
        grid=(B // bt,),
        in_specs=[
            pl.BlockSpec((bt, d_in), lambda i: (i, 0)),
            pl.BlockSpec((d_in, d_hid), lambda i: (0, 0)),
            pl.BlockSpec((1, d_hid), lambda i: (0, 0)),
            pl.BlockSpec((d_hid, n_cls), lambda i: (0, 0)),
            pl.BlockSpec((1, n_cls), lambda i: (0, 0)),
        ],
        out_specs=pl.BlockSpec((bt, n_cls), lambda i: (i, 0)),
        compiler_params=pltpu.CompilerParams(
            dimension_semantics=("parallel",),
            vmem_limit_bytes=_VMEM_LIMIT),
    )(x_flat, w1, b1_row, w2, b2_row)


# -----------------------------------------------------------------------------
# Wrapper glue
# -----------------------------------------------------------------------------
def pooled_im2col(x, K, pool=2):
    """x: (B, H, W, C) NHWC -> patches (pool*pool, B*HP*WP, K*K*C) and (HP, WP)."""
    B, H, W, C = x.shape
    HO, WO = H - K + 1, W - K + 1
    HP, WP = HO // pool, WO // pool
    groups = []
    for ph in range(pool):
        for pw in range(pool):
            feats = []
            for kh in range(K):
                for kw in range(K):
                    sub = x[:, ph + kh::pool, pw + kw::pool, :][:, :HP, :WP, :]
                    feats.append(sub)                       # (B, HP, WP, C)
            pat = jnp.stack(feats, axis=3)                  # (B, HP, WP, K*K, C)
            groups.append(pat.reshape(B * HP * WP, K * K * C))
    return jnp.stack(groups, axis=0), (HP, WP)


def prepare_params(params):
    """One-time (outside jit) weight re-layout + bf16 casts."""
    # conv weights: torch (Cout, Cin, K, K) -> (kh, kw, cin, cout)
    c1w = jnp.transpose(params["conv1_w"], (2, 3, 1, 0)).reshape(25 * 1, 32)
    c2w = jnp.transpose(params["conv2_w"], (2, 3, 1, 0)).reshape(25, 32, 64)
    # fc1: rows permuted from torch flatten order (c, h, w) to NHWC flatten order (h, w, c)
    w1 = params["fc1_w"].T.reshape(64, 4, 4, 512)           # (c, h, w, out)
    w1 = jnp.transpose(w1, (1, 2, 0, 3)).reshape(1024, 512)  # (h, w, c, out)
    return dict(
        conv1_w=c1w.astype(jnp.bfloat16),
        conv1_b=params["conv1_b"].reshape(1, 32).astype(jnp.float32),
        conv2_w=c2w.astype(jnp.bfloat16),
        conv2_b=jnp.tile(params["conv2_b"].reshape(1, 64), (1, 16)).astype(jnp.float32),
        fc1_w=w1.astype(jnp.bfloat16),
        fc1_b=params["fc1_b"].reshape(1, 512).astype(jnp.float32),
        fc2_w=params["fc2_w"].T.astype(jnp.bfloat16),
        fc2_b=params["fc2_b"].reshape(1, 10).astype(jnp.float32),
    )


@jax.jit
def cnn_mnist_forward(x_nchw, prep):
    x = jnp.transpose(x_nchw, (0, 2, 3, 1)).astype(jnp.bfloat16)   # NCHW -> NHWC, bf16
    B = x.shape[0]

    # conv1 (1 -> 32, k=5) + maxpool2 + relu : pool-fused im2col, single matmul per M-tile
    p1, (HP1, WP1) = pooled_im2col(x, 5)
    o1 = conv_pool_relu(p1, prep["conv1_w"], prep["conv1_b"])      # (B*12*12, 32) bf16
    f1 = o1.reshape(B, HP1, WP1, 32)                               # contiguous -> free

    # conv2 (32 -> 64, k=5) + maxpool2 + relu : fully fused, lane-dense (B, 1024) output
    x_flat = conv2_pool_relu(f1, prep["conv2_w"], prep["conv2_b"])  # (B, 1024) bf16, (h,w,c)

    # fc1 -> relu -> fc2 -> log_softmax (fused, batch-tiled)
    return mlp_logsoftmax(x_flat, prep["fc1_w"], prep["fc1_b"],
                          prep["fc2_w"], prep["fc2_b"])


# -----------------------------------------------------------------------------
# Deterministic parameter init (PyTorch-default-style uniform(-1/sqrt(fan_in), +))
# -----------------------------------------------------------------------------
def init_params(key):
    ks = jax.random.split(key, 8)

    def u(k, shape, fan_in):
        bound = 1.0 / float(fan_in) ** 0.5
        return jax.random.uniform(k, shape, jnp.float32, -bound, bound)

    return dict(
        conv1_w=u(ks[0], (32, 1, 5, 5), 1 * 5 * 5),
        conv1_b=u(ks[1], (32,), 1 * 5 * 5),
        conv2_w=u(ks[2], (64, 32, 5, 5), 32 * 5 * 5),
        conv2_b=u(ks[3], (64,), 32 * 5 * 5),
        fc1_w=u(ks[4], (512, 1024), 1024),
        fc1_b=u(ks[5], (512,), 1024),
        fc2_w=u(ks[6], (10, 512), 512),
        fc2_b=u(ks[7], (10,), 512),
    )


if __name__ == "__main__":
    key = jax.random.PRNGKey(0)
    kx, kp = jax.random.split(key)
    # MNIST-shaped input: fc1 expects 1024 = 64*4*4, which implies 1x28x28 inputs.
    x = jax.random.normal(kx, (2, 1, 28, 28), jnp.float32)
    params = init_params(kp)
    prep = prepare_params(params)   # one-time weight re-layout, outside the jitted forward

    out = cnn_mnist_forward(x, prep)
    out = jax.block_until_ready(out)

    assert out.shape == (2, 10), out.shape
    # log_softmax rows must exponentiate to 1
    assert bool(jnp.allclose(jnp.sum(jnp.exp(out), axis=1), 1.0, atol=1e-4))
    print("KERNEL_OK")
</pallas_src>

<mosaic_0001>
module attributes {stable_mosaic.version = 11 : i64} {
  func.func @conv_pool_relu_kernel(%arg0: i32, %arg1: memref<4x288x25xbf16, #tpu.memory_space<vmem>>, %arg2: memref<25x32xbf16, #tpu.memory_space<vmem>>, %arg3: memref<1x32xf32, #tpu.memory_space<vmem>>, %arg4: memref<288x32xbf16, #tpu.memory_space<vmem>>) attributes {dimension_semantics = [#tpu.dimension_semantics<parallel>], iteration_bounds = array<i64: 1>, scalar_prefetch = 0 : i64, scratch_operands = 0 : i64, tpu.core_type = #tpu.core_type<tc>, window_params = [{transform_indices = @transform_0, window_bounds = array<i64: 4, 288, 25>}, {pipeline_mode = #tpu.pipeline_mode<synchronous>, transform_indices = @transform_1, window_bounds = array<i64: 25, 32>}, {pipeline_mode = #tpu.pipeline_mode<synchronous>, transform_indices = @transform_2, window_bounds = array<i64: 1, 32>}, {transform_indices = @transform_3, window_bounds = array<i64: 288, 32>}]} {
    %c0 = arith.constant 0 : index
    %c0_0 = arith.constant 0 : index
    %c0_1 = arith.constant 0 : index
    %0 = vector.load %arg1[%c0, %c0_0, %c0_1] : memref<4x288x25xbf16, #tpu.memory_space<vmem>>, vector<4x288x25xbf16>
    %1 = vector.shape_cast %0 : vector<4x288x25xbf16> to vector<1152x25xbf16>
    %c0_2 = arith.constant 0 : index
    %c0_3 = arith.constant 0 : index
    %2 = vector.load %arg2[%c0_2, %c0_3] : memref<25x32xbf16, #tpu.memory_space<vmem>>, vector<25x32xbf16>
    %cst = arith.constant dense<0.000000e+00> : vector<1152x32xf32>
    %3 = tpu.matmul %1, %2, %cst {dimension_numbers = #tpu.dot_dimension_numbers<[1], [0], [0], [1], [0, 0, 1, 1], [], []>} : vector<1152x25xbf16>, vector<25x32xbf16>, vector<1152x32xf32> -> vector<1152x32xf32>
    %4 = vector.shape_cast %3 : vector<1152x32xf32> to vector<4x288x32xf32>
    %cst_4 = arith.constant dense<0xFF800000> : vector<288x32xf32>
    %5 = vector.multi_reduction <maximumf>, %4, %cst_4 [0] : vector<4x288x32xf32> to vector<288x32xf32>
    %c0_5 = arith.constant 0 : index
    %c0_6 = arith.constant 0 : index
    %6 = vector.load %arg3[%c0_5, %c0_6] : memref<1x32xf32, #tpu.memory_space<vmem>>, vector<1x32xf32>
    %7 = vector.broadcast %6 : vector<1x32xf32> to vector<288x32xf32>
    %8 = arith.addf %5, %7 : vector<288x32xf32>
    %cst_7 = arith.constant 0.000000e+00 : f32
    %9 = vector.broadcast %cst_7 : f32 to vector<288x32xf32>
    %10 = arith.maximumf %8, %9 : vector<288x32xf32>
    %11 = arith.truncf %10 : vector<288x32xf32> to vector<288x32xbf16>
    %c0_8 = arith.constant 0 : index
    %c0_9 = arith.constant 0 : index
    %12 = vector.load %arg4[%c0_8, %c0_9] : memref<288x32xbf16, #tpu.memory_space<vmem>>, vector<288x32xbf16>
    tpu.vector_store %arg4[%c0_8, %c0_9], %11 {strides = array<i32>} : memref<288x32xbf16, #tpu.memory_space<vmem>>, vector<288x32xbf16>,
    return
  }
  func.func @transform_0(%arg0: i32) -> (i32, i32, i32) {
    %c0_i32 = arith.constant 0 : i32
    %c0_i32_0 = arith.constant 0 : i32
    %c0_i32_1 = arith.constant 0 : i32
    return %c0_i32, %arg0, %c0_i32_0 : i32, i32, i32
  }
  func.func @transform_1(%arg0: i32) -> (i32, i32) {
    %c0_i32 = arith.constant 0 : i32
    %c0_i32_0 = arith.constant 0 : i32
    %c0_i32_1 = arith.constant 0 : i32
    return %c0_i32, %c0_i32_0 : i32, i32
  }
  func.func @transform_2(%arg0: i32) -> (i32, i32) {
    %c0_i32 = arith.constant 0 : i32
    %c0_i32_0 = arith.constant 0 : i32
    %c0_i32_1 = arith.constant 0 : i32
    return %c0_i32, %c0_i32_0 : i32, i32
  }
  func.func @transform_3(%arg0: i32) -> (i32, i32) {
    %c0_i32 = arith.constant 0 : i32
    %c0_i32_0 = arith.constant 0 : i32
    return %arg0, %c0_i32 : i32, i32
  }
}

module attributes {stable_mosaic.version = 11 : i64} {
  func.func @conv2_fused_kernel(%arg0: i32, %arg1: memref<2x12x12x32xbf16, #tpu.memory_space<vmem>>, %arg2: memref<25x32x64xbf16, #tpu.memory_space<vmem>>, %arg3: memref<1x1024xf32, #tpu.memory_space<vmem>>, %arg4: memref<2x1024xbf16, #tpu.memory_space<vmem>>) attributes {dimension_semantics = [#tpu.dimension_semantics<parallel>], iteration_bounds = array<i64: 1>, scalar_prefetch = 0 : i64, scratch_operands = 0 : i64, tpu.core_type = #tpu.core_type<tc>, window_params = [{transform_indices = @transform_0, window_bounds = array<i64: 2, 12, 12, 32>}, {pipeline_mode = #tpu.pipeline_mode<synchronous>, transform_indices = @transform_1, window_bounds = array<i64: 25, 32, 64>}, {pipeline_mode = #tpu.pipeline_mode<synchronous>, transform_indices = @transform_2, window_bounds = array<i64: 1, 1024>}, {transform_indices = @transform_3, window_bounds = array<i64: 2, 1024>}]} {
    %c0 = arith.constant 0 : index
    %c0_0 = arith.constant 0 : index
    %c0_1 = arith.constant 0 : index
    %c0_2 = arith.constant 0 : index
    %0 = vector.load %arg1[%c0, %c0_0, %c0_1, %c0_2] : memref<2x12x12x32xbf16, #tpu.memory_space<vmem>>, vector<2x12x12x32xbf16>
    %cst = arith.constant 0.000000e+00 : f32
    %1 = vector.broadcast %cst : f32 to vector<128x64xf32>
    %2 = vector.extract_strided_slice %0 {offsets = [0, 0, 0, 0], sizes = [2, 8, 8, 32], strides = [1, 1, 1, 1]} : vector<2x12x12x32xbf16> to vector<2x8x8x32xbf16>
    %3 = vector.shape_cast %2 : vector<2x8x8x32xbf16> to vector<128x32xbf16>
    %c0_3 = arith.constant 0 : index
    %c0_4 = arith.constant 0 : index
    %c0_5 = arith.constant 0 : index
    %4 = vector.load %arg2[%c0_3, %c0_4, %c0_5] : memref<25x32x64xbf16, #tpu.memory_space<vmem>>, vector<1x32x64xbf16>
    %5 = vector.shape_cast %4 : vector<1x32x64xbf16> to vector<32x64xbf16>
    %cst_6 = arith.constant dense<0.000000e+00> : vector<128x64xf32>
    %6 = tpu.matmul %3, %5, %cst_6 {dimension_numbers = #tpu.dot_dimension_numbers<[1], [0], [0], [1], [0, 0, 1, 1], [], []>} : vector<128x32xbf16>, vector<32x64xbf16>, vector<128x64xf32> -> vector<128x64xf32>
    %7 = arith.addf %1, %6 : vector<128x64xf32>
    %8 = vector.extract_strided_slice %0 {offsets = [0, 0, 1, 0], sizes = [2, 8, 8, 32], strides = [1, 1, 1, 1]} : vector<2x12x12x32xbf16> to vector<2x8x8x32xbf16>
    %9 = vector.shape_cast %8 : vector<2x8x8x32xbf16> to vector<128x32xbf16>
    %c1 = arith.constant 1 : index
    %c0_7 = arith.constant 0 : index
    %c0_8 = arith.constant 0 : index
    %10 = vector.load %arg2[%c1, %c0_7, %c0_8] : memref<25x32x64xbf16, #tpu.memory_space<vmem>>, vector<1x32x64xbf16>
    %11 = vector.shape_cast %10 : vector<1x32x64xbf16> to vector<32x64xbf16>
    %cst_9 = arith.constant dense<0.000000e+00> : vector<128x64xf32>
    %12 = tpu.matmul %9, %11, %cst_9 {dimension_numbers = #tpu.dot_dimension_numbers<[1], [0], [0], [1], [0, 0, 1, 1], [], []>} : vector<128x32xbf16>, vector<32x64xbf16>, vector<128x64xf32> -> vector<128x64xf32>
    %13 = arith.addf %7, %12 : vector<128x64xf32>
    %14 = vector.extract_strided_slice %0 {offsets = [0, 0, 2, 0], sizes = [2, 8, 8, 32], strides = [1, 1, 1, 1]} : vector<2x12x12x32xbf16> to vector<2x8x8x32xbf16>
    %15 = vector.shape_cast %14 : vector<2x8x8x32xbf16> to vector<128x32xbf16>
    %c2 = arith.constant 2 : index
    %c0_10 = arith.constant 0 : index
    %c0_11 = arith.constant 0 : index
    %16 = vector.load %arg2[%c2, %c0_10, %c0_11] : memref<25x32x64xbf16, #tpu.memory_space<vmem>>, vector<1x32x64xbf16>
    %17 = vector.shape_cast %16 : vector<1x32x64xbf16> to vector<32x64xbf16>
    %cst_12 = arith.constant dense<0.000000e+00> : vector<128x64xf32>
    %18 = tpu.matmul %15, %17, %cst_12 {dimension_numbers = #tpu.dot_dimension_numbers<[1], [0], [0], [1], [0, 0, 1, 1], [], []>} : vector<128x32xbf16>, vector<32x64xbf16>, vector<128x64xf32> -> vector<128x64xf32>
    %19 = arith.addf %13, %18 : vector<128x64xf32>
    %20 = vector.extract_strided_slice %0 {offsets = [0, 0, 3, 0], sizes = [2, 8, 8, 32], strides = [1, 1, 1, 1]} : vector<2x12x12x32xbf16> to vector<2x8x8x32xbf16>
    %21 = vector.shape_cast %20 : vector<2x8x8x32xbf16> to vector<128x32xbf16>
    %c3 = arith.constant 3 : index
    %c0_13 = arith.constant 0 : index
    %c0_14 = arith.constant 0 : index
    %22 = vector.load %arg2[%c3, %c0_13, %c0_14] : memref<25x32x64xbf16, #tpu.memory_space<vmem>>, vector<1x32x64xbf16>
    %23 = vector.shape_cast %22 : vector<1x32x64xbf16> to vector<32x64xbf16>
    %cst_15 = arith.constant dense<0.000000e+00> : vector<128x64xf32>
    %24 = tpu.matmul %21, %23, %cst_15 {dimension_numbers = #tpu.dot_dimension_numbers<[1], [0], [0], [1], [0, 0, 1, 1], [], []>} : vector<128x32xbf16>, vector<32x64xbf16>, vector<128x64xf32> -> vector<128x64xf32>
    %25 = arith.addf %19, %24 : vector<128x64xf32>
    %26 = vector.extract_strided_slice %0 {offsets = [0, 0, 4, 0], sizes = [2, 8, 8, 32], strides = [1, 1, 1, 1]} : vector<2x12x12x32xbf16> to vector<2x8x8x32xbf16>
    %27 = vector.shape_cast %26 : vector<2x8x8x32xbf16> to vector<128x32xbf16>
    %c4 = arith.constant 4 : index
    %c0_16 = arith.constant 0 : index
    %c0_17 = arith.constant 0 : index
    %28 = vector.load %arg2[%c4, %c0_16, %c0_17] : memref<25x32x64xbf16, #tpu.memory_space<vmem>>, vector<1x32x64xbf16>
    %29 = vector.shape_cast %28 : vector<1x32x64xbf16> to vector<32x64xbf16>
    %cst_18 = arith.constant dense<0.000000e+00> : vector<128x64xf32>
    %30 = tpu.matmul %27, %29, %cst_18 {dimension_numbers = #tpu.dot_dimension_numbers<[1], [0], [0], [1], [0, 0, 1, 1], [], []>} : vector<128x32xbf16>, vector<32x64xbf16>, vector<128x64xf32> -> vector<128x64xf32>
    %31 = arith.addf %25, %30 : vector<128x64xf32>
    %32 = vector.extract_strided_slice %0 {offsets = [0, 1, 0, 0], sizes = [2, 8, 8, 32], strides = [1, 1, 1, 1]} : vector<2x12x12x32xbf16> to vector<2x8x8x32xbf16>
    %33 = vector.shape_cast %32 : vector<2x8x8x32xbf16> to vector<128x32xbf16>
    %c5 = arith.constant 5 : index
    %c0_19 = arith.constant 0 : index
    %c0_20 = arith.constant 0 : index
    %34 = vector.load %arg2[%c5, %c0_19, %c0_20] : memref<25x32x64xbf16, #tpu.memory_space<vmem>>, vector<1x32x64xbf16>
    %35 = vector.shape_cast %34 : vector<1x32x64xbf16> to vector<32x64xbf16>
    %cst_21 = arith.constant dense<0.000000e+00> : vector<128x64xf32>
    %36 = tpu.matmul %33, %35, %cst_21 {dimension_numbers = #tpu.dot_dimension_numbers<[1], [0], [0], [1], [0, 0, 1, 1], [], []>} : vector<128x32xbf16>, vector<32x64xbf16>, vector<128x64xf32> -> vector<128x64xf32>
    %37 = arith.addf %31, %36 : vector<128x64xf32>
    %38 = vector.extract_strided_slice %0 {offsets = [0, 1, 1, 0], sizes = [2, 8, 8, 32], strides = [1, 1, 1, 1]} : vector<2x12x12x32xbf16> to vector<2x8x8x32xbf16>
    %39 = vector.shape_cast %38 : vector<2x8x8x32xbf16> to vector<128x32xbf16>
    %c6 = arith.constant 6 : index
    %c0_22 = arith.constant 0 : index
    %c0_23 = arith.constant 0 : index
    %40 = vector.load %arg2[%c6, %c0_22, %c0_23] : memref<25x32x64xbf16, #tpu.memory_space<vmem>>, vector<1x32x64xbf16>
    %41 = vector.shape_cast %40 : vector<1x32x64xbf16> to vector<32x64xbf16>
    %cst_24 = arith.constant dense<0.000000e+00> : vector<128x64xf32>
    %42 = tpu.matmul %39, %41, %cst_24 {dimension_numbers = #tpu.dot_dimension_numbers<[1], [0], [0], [1], [0, 0, 1, 1], [], []>} : vector<128x32xbf16>, vector<32x64xbf16>, vector<128x64xf32> -> vector<128x64xf32>
    %43 = arith.addf %37, %42 : vector<128x64xf32>
    %44 = vector.extract_strided_slice %0 {offsets = [0, 1, 2, 0], sizes = [2, 8, 8, 32], strides = [1, 1, 1, 1]} : vector<2x12x12x32xbf16> to vector<2x8x8x32xbf16>
    %45 = vector.shape_cast %44 : vector<2x8x8x32xbf16> to vector<128x32xbf16>
    %c7 = arith.constant 7 : index
    %c0_25 = arith.constant 0 : index
    %c0_26 = arith.constant 0 : index
    %46 = vector.load %arg2[%c7, %c0_25, %c0_26] : memref<25x32x64xbf16, #tpu.memory_space<vmem>>, vector<1x32x64xbf16>
    %47 = vector.shape_cast %46 : vector<1x32x64xbf16> to vector<32x64xbf16>
    %cst_27 = arith.constant dense<0.000000e+00> : vector<128x64xf32>
    %48 = tpu.matmul %45, %47, %cst_27 {dimension_numbers = #tpu.dot_dimension_numbers<[1], [0], [0], [1], [0, 0, 1, 1], [], []>} : vector<128x32xbf16>, vector<32x64xbf16>, vector<128x64xf32> -> vector<128x64xf32>
    %49 = arith.addf %43, %48 : vector<128x64xf32>
    %50 = vector.extract_strided_slice %0 {offsets = [0, 1, 3, 0], sizes = [2, 8, 8, 32], strides = [1, 1, 1, 1]} : vector<2x12x12x32xbf16> to vector<2x8x8x32xbf16>
    %51 = vector.shape_cast %50 : vector<2x8x8x32xbf16> to vector<128x32xbf16>
    %c8 = arith.constant 8 : index
    %c0_28 = arith.constant 0 : index
    %c0_29 = arith.constant 0 : index
    %52 = vector.load %arg2[%c8, %c0_28, %c0_29] : memref<25x32x64xbf16, #tpu.memory_space<vmem>>, vector<1x32x64xbf16>
    %53 = vector.shape_cast %52 : vector<1x32x64xbf16> to vector<32x64xbf16>
    %cst_30 = arith.constant dense<0.000000e+00> : vector<128x64xf32>
    %54 = tpu.matmul %51, %53, %cst_30 {dimension_numbers = #tpu.dot_dimension_numbers<[1], [0], [0], [1], [0, 0, 1, 1], [], []>} : vector<128x32xbf16>, vector<32x64xbf16>, vector<128x64xf32> -> vector<128x64xf32>
    %55 = arith.addf %49, %54 : vector<128x64xf32>
    %56 = vector.extract_strided_slice %0 {offsets = [0, 1, 4, 0], sizes = [2, 8, 8, 32], strides = [1, 1, 1, 1]} : vector<2x12x12x32xbf16> to vector<2x8x8x32xbf16>
    %57 = vector.shape_cast %56 : vector<2x8x8x32xbf16> to vector<128x32xbf16>
    %c9 = arith.constant 9 : index
    %c0_31 = arith.constant 0 : index
    %c0_32 = arith.constant 0 : index
    %58 = vector.load %arg2[%c9, %c0_31, %c0_32] : memref<25x32x64xbf16, #tpu.memory_space<vmem>>, vector<1x32x64xbf16>
    %59 = vector.shape_cast %58 : vector<1x32x64xbf16> to vector<32x64xbf16>
    %cst_33 = arith.constant dense<0.000000e+00> : vector<128x64xf32>
    %60 = tpu.matmul %57, %59, %cst_33 {dimension_numbers = #tpu.dot_dimension_numbers<[1], [0], [0], [1], [0, 0, 1, 1], [], []>} : vector<128x32xbf16>, vector<32x64xbf16>, vector<128x64xf32> -> vector<128x64xf32>
    %61 = arith.addf %55, %60 : vector<128x64xf32>
    %62 = vector.extract_strided_slice %0 {offsets = [0, 2, 0, 0], sizes = [2, 8, 8, 32], strides = [1, 1, 1, 1]} : vector<2x12x12x32xbf16> to vector<2x8x8x32xbf16>
    %63 = vector.shape_cast %62 : vector<2x8x8x32xbf16> to vector<128x32xbf16>
    %c10 = arith.constant 10 : index
    %c0_34 = arith.constant 0 : index
    %c0_35 = arith.constant 0 : index
    %64 = vector.load %arg2[%c10, %c0_34, %c0_35] : memref<25x32x64xbf16, #tpu.memory_space<vmem>>, vector<1x32x64xbf16>
    %65 = vector.shape_cast %64 : vector<1x32x64xbf16> to vector<32x64xbf16>
    %cst_36 = arith.constant dense<0.000000e+00> : vector<128x64xf32>
    %66 = tpu.matmul %63, %65, %cst_36 {dimension_numbers = #tpu.dot_dimension_numbers<[1], [0], [0], [1], [0, 0, 1, 1], [], []>} : vector<128x32xbf16>, vector<32x64xbf16>, vector<128x64xf32> -> vector<128x64xf32>
    %67 = arith.addf %61, %66 : vector<128x64xf32>
    %68 = vector.extract_strided_slice %0 {offsets = [0, 2, 1, 0], sizes = [2, 8, 8, 32], strides = [1, 1, 1, 1]} : vector<2x12x12x32xbf16> to vector<2x8x8x32xbf16>
    %69 = vector.shape_cast %68 : vector<2x8x8x32xbf16> to vector<128x32xbf16>
    %c11 = arith.constant 11 : index
    %c0_37 = arith.constant 0 : index
    %c0_38 = arith.constant 0 : index
    %70 = vector.load %arg2[%c11, %c0_37, %c0_38] : memref<25x32x64xbf16, #tpu.memory_space<vmem>>, vector<1x32x64xbf16>
    %71 = vector.shape_cast %70 : vector<1x32x64xbf16> to vector<32x64xbf16>
    %cst_39 = arith.constant dense<0.000000e+00> : vector<128x64xf32>
    %72 = tpu.matmul %69, %71, %cst_39 {dimension_numbers = #tpu.dot_dimension_numbers<[1], [0], [0], [1], [0, 0, 1, 1], [], []>} : vector<128x32xbf16>, vector<32x64xbf16>, vector<128x64xf32> -> vector<128x64xf32>
    %73 = arith.addf %67, %72 : vector<128x64xf32>
    %74 = vector.extract_strided_slice %0 {offsets = [0, 2, 2, 0], sizes = [2, 8, 8, 32], strides = [1, 1, 1, 1]} : vector<2x12x12x32xbf16> to vector<2x8x8x32xbf16>
    %75 = vector.shape_cast %74 : vector<2x8x8x32xbf16> to vector<128x32xbf16>
    %c12 = arith.constant 12 : index
    %c0_40 = arith.constant 0 : index
    %c0_41 = arith.constant 0 : index
    %76 = vector.load %arg2[%c12, %c0_40, %c0_41] : memref<25x32x64xbf16, #tpu.memory_space<vmem>>, vector<1x32x64xbf16>
    %77 = vector.shape_cast %76 : vector<1x32x64xbf16> to vector<32x64xbf16>
    %cst_42 = arith.constant dense<0.000000e+00> : vector<128x64xf32>
    %78 = tpu.matmul %75, %77, %cst_42 {dimension_numbers = #tpu.dot_dimension_numbers<[1], [0], [0], [1], [0, 0, 1, 1], [], []>} : vector<128x32xbf16>, vector<32x64xbf16>, vector<128x64xf32> -> vector<128x64xf32>
    %79 = arith.addf %73, %78 : vector<128x64xf32>
    %80 = vector.extract_strided_slice %0 {offsets = [0, 2, 3, 0], sizes = [2, 8, 8, 32], strides = [1, 1, 1, 1]} : vector<2x12x12x32xbf16> to vector<2x8x8x32xbf16>
    %81 = vector.shape_cast %80 : vector<2x8x8x32xbf16> to vector<128x32xbf16>
    %c13 = arith.constant 13 : index
    %c0_43 = arith.constant 0 : index
    %c0_44 = arith.constant 0 : index
    %82 = vector.load %arg2[%c13, %c0_43, %c0_44] : memref<25x32x64xbf16, #tpu.memory_space<vmem>>, vector<1x32x64xbf16>
    %83 = vector.shape_cast %82 : vector<1x32x64xbf16> to vector<32x64xbf16>
    %cst_45 = arith.constant dense<0.000000e+00> : vector<128x64xf32>
    %84 = tpu.matmul %81, %83, %cst_45 {dimension_numbers = #tpu.dot_dimension_numbers<[1], [0], [0], [1], [0, 0, 1, 1], [], []>} : vector<128x32xbf16>, vector<32x64xbf16>, vector<128x64xf32> -> vector<128x64xf32>
    %85 = arith.addf %79, %84 : vector<128x64xf32>
    %86 = vector.extract_strided_slice %0 {offsets = [0, 2, 4, 0], sizes = [2, 8, 8, 32], strides = [1, 1, 1, 1]} : vector<2x12x12x32xbf16> to vector<2x8x8x32xbf16>
    %87 = vector.shape_cast %86 : vector<2x8x8x32xbf16> to vector<128x32xbf16>
    %c14 = arith.constant 14 : index
    %c0_46 = arith.constant 0 : index
    %c0_47 = arith.constant 0 : index
    %88 = vector.load %arg2[%c14, %c0_46, %c0_47] : memref<25x32x64xbf16, #tpu.memory_space<vmem>>, vector<1x32x64xbf16>
    %89 = vector.shape_cast %88 : vector<1x32x64xbf16> to vector<32x64xbf16>
    %cst_48 = arith.constant dense<0.000000e+00> : vector<128x64xf32>
    %90 = tpu.matmul %87, %89, %cst_48 {dimension_numbers = #tpu.dot_dimension_numbers<[1], [0], [0], [1], [0, 0, 1, 1], [], []>} : vector<128x32xbf16>, vector<32x64xbf16>, vector<128x64xf32> -> vector<128x64xf32>
    %91 = arith.addf %85, %90 : vector<128x64xf32>
    %92 = vector.extract_strided_slice %0 {offsets = [0, 3, 0, 0], sizes = [2, 8, 8, 32], strides = [1, 1, 1, 1]} : vector<2x12x12x32xbf16> to vector<2x8x8x32xbf16>
    %93 = vector.shape_cast %92 : vector<2x8x8x32xbf16> to vector<128x32xbf16>
    %c15 = arith.constant 15 : index
    %c0_49 = arith.constant 0 : index
    %c0_50 = arith.constant 0 : index
    %94 = vector.load %arg2[%c15, %c0_49, %c0_50] : memref<25x32x64xbf16, #tpu.memory_space<vmem>>, vector<1x32x64xbf16>
    %95 = vector.shape_cast %94 : vector<1x32x64xbf16> to vector<32x64xbf16>
    %cst_51 = arith.constant dense<0.000000e+00> : vector<128x64xf32>
    %96 = tpu.matmul %93, %95, %cst_51 {dimension_numbers = #tpu.dot_dimension_numbers<[1], [0], [0], [1], [0, 0, 1, 1], [], []>} : vector<128x32xbf16>, vector<32x64xbf16>, vector<128x64xf32> -> vector<128x64xf32>
    %97 = arith.addf %91, %96 : vector<128x64xf32>
    %98 = vector.extract_strided_slice %0 {offsets = [0, 3, 1, 0], sizes = [2, 8, 8, 32], strides = [1, 1, 1, 1]} : vector<2x12x12x32xbf16> to vector<2x8x8x32xbf16>
    %99 = vector.shape_cast %98 : vector<2x8x8x32xbf16> to vector<128x32xbf16>
    %c16 = arith.constant 16 : index
    %c0_52 = arith.constant 0 : index
    %c0_53 = arith.constant 0 : index
    %100 = vector.load %arg2[%c16, %c0_52, %c0_53] : memref<25x32x64xbf16, #tpu.memory_space<vmem>>, vector<1x32x64xbf16>
    %101 = vector.shape_cast %100 : vector<1x32x64xbf16> to vector<32x64xbf16>
    %cst_54 = arith.constant dense<0.000000e+00> : vector<128x64xf32>
    %102 = tpu.matmul %99, %101, %cst_54 {dimension_numbers = #tpu.dot_dimension_numbers<[1], [0], [0], [1], [0, 0, 1, 1], [], []>} : vector<128x32xbf16>, vector<32x64xbf16>, vector<128x64xf32> -> vector<128x64xf32>
    %103 = arith.addf %97, %102 : vector<128x64xf32>
    %104 = vector.extract_strided_slice %0 {offsets = [0, 3, 2, 0], sizes = [2, 8, 8, 32], strides = [1, 1, 1, 1]} : vector<2x12x12x32xbf16> to vector<2x8x8x32xbf16>
    %105 = vector.shape_cast %104 : vector<2x8x8x32xbf16> to vector<128x32xbf16>
    %c17 = arith.constant 17 : index
    %c0_55 = arith.constant 0 : index
    %c0_56 = arith.constant 0 : index
    %106 = vector.load %arg2[%c17, %c0_55, %c0_56] : memref<25x32x64xbf16, #tpu.memory_space<vmem>>, vector<1x32x64xbf16>
    %107 = vector.shape_cast %106 : vector<1x32x64xbf16> to vector<32x64xbf16>
    %cst_57 = arith.constant dense<0.000000e+00> : vector<128x64xf32>
    %108 = tpu.matmul %105, %107, %cst_57 {dimension_numbers = #tpu.dot_dimension_numbers<[1], [0], [0], [1], [0, 0, 1, 1], [], []>} : vector<128x32xbf16>, vector<32x64xbf16>, vector<128x64xf32> -> vector<128x64xf32>
    %109 = arith.addf %103, %108 : vector<128x64xf32>
    %110 = vector.extract_strided_slice %0 {offsets = [0, 3, 3, 0], sizes = [2, 8, 8, 32], strides = [1, 1, 1, 1]} : vector<2x12x12x32xbf16> to vector<2x8x8x32xbf16>
    %111 = vector.shape_cast %110 : vector<2x8x8x32xbf16> to vector<128x32xbf16>
    %c18 = arith.constant 18 : index
    %c0_58 = arith.constant 0 : index
    %c0_59 = arith.constant 0 : index
    %112 = vector.load %arg2[%c18, %c0_58, %c0_59] : memref<25x32x64xbf16, #tpu.memory_space<vmem>>, vector<1x32x64xbf16>
    %113 = vector.shape_cast %112 : vector<1x32x64xbf16> to vector<32x64xbf16>
    %cst_60 = arith.constant dense<0.000000e+00> : vector<128x64xf32>
    %114 = tpu.matmul %111, %113, %cst_60 {dimension_numbers = #tpu.dot_dimension_numbers<[1], [0], [0], [1], [0, 0, 1, 1], [], []>} : vector<128x32xbf16>, vector<32x64xbf16>, vector<128x64xf32> -> vector<128x64xf32>
    %115 = arith.addf %109, %114 : vector<128x64xf32>
    %116 = vector.extract_strided_slice %0 {offsets = [0, 3, 4, 0], sizes = [2, 8, 8, 32], strides = [1, 1, 1, 1]} : vector<2x12x12x32xbf16> to vector<2x8x8x32xbf16>
    %117 = vector.shape_cast %116 : vector<2x8x8x32xbf16> to vector<128x32xbf16>
    %c19 = arith.constant 19 : index
    %c0_61 = arith.constant 0 : index
    %c0_62 = arith.constant 0 : index
    %118 = vector.load %arg2[%c19, %c0_61, %c0_62] : memref<25x32x64xbf16, #tpu.memory_space<vmem>>, vector<1x32x64xbf16>
    %119 = vector.shape_cast %118 : vector<1x32x64xbf16> to vector<32x64xbf16>
    %cst_63 = arith.constant dense<0.000000e+00> : vector<128x64xf32>
    %120 = tpu.matmul %117, %119, %cst_63 {dimension_numbers = #tpu.dot_dimension_numbers<[1], [0], [0], [1], [0, 0, 1, 1], [], []>} : vector<128x32xbf16>, vector<32x64xbf16>, vector<128x64xf32> -> vector<128x64xf32>
    %121 = arith.addf %115, %120 : vector<128x64xf32>
    %122 = vector.extract_strided_slice %0 {offsets = [0, 4, 0, 0], sizes = [2, 8, 8, 32], strides = [1, 1, 1, 1]} : vector<2x12x12x32xbf16> to vector<2x8x8x32xbf16>
    %123 = vector.shape_cast %122 : vector<2x8x8x32xbf16> to vector<128x32xbf16>
    %c20 = arith.constant 20 : index
    %c0_64 = arith.constant 0 : index
    %c0_65 = arith.constant 0 : index
    %124 = vector.load %arg2[%c20, %c0_64, %c0_65] : memref<25x32x64xbf16, #tpu.memory_space<vmem>>, vector<1x32x64xbf16>
    %125 = vector.shape_cast %124 : vector<1x32x64xbf16> to vector<32x64xbf16>
    %cst_66 = arith.constant dense<0.000000e+00> : vector<128x64xf32>
    %126 = tpu.matmul %123, %125, %cst_66 {dimension_numbers = #tpu.dot_dimension_numbers<[1], [0], [0], [1], [0, 0, 1, 1], [], []>} : vector<128x32xbf16>, vector<32x64xbf16>, vector<128x64xf32> -> vector<128x64xf32>
    %127 = arith.addf %121, %126 : vector<128x64xf32>
    %128 = vector.extract_strided_slice %0 {offsets = [0, 4, 1, 0], sizes = [2, 8, 8, 32], strides = [1, 1, 1, 1]} : vector<2x12x12x32xbf16> to vector<2x8x8x32xbf16>
    %129 = vector.shape_cast %128 : vector<2x8x8x32xbf16> to vector<128x32xbf16>
    %c21 = arith.constant 21 : index
    %c0_67 = arith.constant 0 : index
    %c0_68 = arith.constant 0 : index
    %130 = vector.load %arg2[%c21, %c0_67, %c0_68] : memref<25x32x64xbf16, #tpu.memory_space<vmem>>, vector<1x32x64xbf16>
    %131 = vector.shape_cast %130 : vector<1x32x64xbf16> to vector<32x64xbf16>
    %cst_69 = arith.constant dense<0.000000e+00> : vector<128x64xf32>
    %132 = tpu.matmul %129, %131, %cst_69 {dimension_numbers = #tpu.dot_dimension_numbers<[1], [0], [0], [1], [0, 0, 1, 1], [], []>} : vector<128x32xbf16>, vector<32x64xbf16>, vector<128x64xf32> -> vector<128x64xf32>
    %133 = arith.addf %127, %132 : vector<128x64xf32>
    %134 = vector.extract_strided_slice %0 {offsets = [0, 4, 2, 0], sizes = [2, 8, 8, 32], strides = [1, 1, 1, 1]} : vector<2x12x12x32xbf16> to vector<2x8x8x32xbf16>
    %135 = vector.shape_cast %134 : vector<2x8x8x32xbf16> to vector<128x32xbf16>
    %c22 = arith.constant 22 : index
    %c0_70 = arith.constant 0 : index
    %c0_71 = arith.constant 0 : index
    %136 = vector.load %arg2[%c22, %c0_70, %c0_71] : memref<25x32x64xbf16, #tpu.memory_space<vmem>>, vector<1x32x64xbf16>
    %137 = vector.shape_cast %136 : vector<1x32x64xbf16> to vector<32x64xbf16>
    %cst_72 = arith.constant dense<0.000000e+00> : vector<128x64xf32>
    %138 = tpu.matmul %135, %137, %cst_72 {dimension_numbers = #tpu.dot_dimension_numbers<[1], [0], [0], [1], [0, 0, 1, 1], [], []>} : vector<128x32xbf16>, vector<32x64xbf16>, vector<128x64xf32> -> vector<128x64xf32>
    %139 = arith.addf %133, %138 : vector<128x64xf32>
    %140 = vector.extract_strided_slice %0 {offsets = [0, 4, 3, 0], sizes = [2, 8, 8, 32], strides = [1, 1, 1, 1]} : vector<2x12x12x32xbf16> to vector<2x8x8x32xbf16>
    %141 = vector.shape_cast %140 : vector<2x8x8x32xbf16> to vector<128x32xbf16>
    %c23 = arith.constant 23 : index
    %c0_73 = arith.constant 0 : index
    %c0_74 = arith.constant 0 : index
    %142 = vector.load %arg2[%c23, %c0_73, %c0_74] : memref<25x32x64xbf16, #tpu.memory_space<vmem>>, vector<1x32x64xbf16>
    %143 = vector.shape_cast %142 : vector<1x32x64xbf16> to vector<32x64xbf16>
    %cst_75 = arith.constant dense<0.000000e+00> : vector<128x64xf32>
    %144 = tpu.matmul %141, %143, %cst_75 {dimension_numbers = #tpu.dot_dimension_numbers<[1], [0], [0], [1], [0, 0, 1, 1], [], []>} : vector<128x32xbf16>, vector<32x64xbf16>, vector<128x64xf32> -> vector<128x64xf32>
    %145 = arith.addf %139, %144 : vector<128x64xf32>
    %146 = vector.extract_strided_slice %0 {offsets = [0, 4, 4, 0], sizes = [2, 8, 8, 32], strides = [1, 1, 1, 1]} : vector<2x12x12x32xbf16> to vector<2x8x8x32xbf16>
    %147 = vector.shape_cast %146 : vector<2x8x8x32xbf16> to vector<128x32xbf16>
    %c24 = arith.constant 24 : index
    %c0_76 = arith.constant 0 : index
    %c0_77 = arith.constant 0 : index
    %148 = vector.load %arg2[%c24, %c0_76, %c0_77] : memref<25x32x64xbf16, #tpu.memory_space<vmem>>, vector<1x32x64xbf16>
    %149 = vector.shape_cast %148 : vector<1x32x64xbf16> to vector<32x64xbf16>
    %cst_78 = arith.constant dense<0.000000e+00> : vector<128x64xf32>
    %150 = tpu.matmul %147, %149, %cst_78 {dimension_numbers = #tpu.dot_dimension_numbers<[1], [0], [0], [1], [0, 0, 1, 1], [], []>} : vector<128x32xbf16>, vector<32x64xbf16>, vector<128x64xf32> -> vector<128x64xf32>
    %151 = arith.addf %145, %150 : vector<128x64xf32>
    %152 = vector.shape_cast %151 : vector<128x64xf32> to vector<2x8x8x64xf32>
    %153 = vector.extract_strided_slice %152 {offsets = [0, 0, 0, 0], sizes = [2, 1, 8, 64], strides = [1, 1, 1, 1]} : vector<2x8x8x64xf32> to vector<2x1x8x64xf32>
    %154 = vector.shape_cast %153 : vector<2x1x8x64xf32> to vector<2x8x64xf32>
    %155 = vector.extract_strided_slice %152 {offsets = [0, 1, 0, 0], sizes = [2, 1, 8, 64], strides = [1, 1, 1, 1]} : vector<2x8x8x64xf32> to vector<2x1x8x64xf32>
    %156 = vector.shape_cast %155 : vector<2x1x8x64xf32> to vector<2x8x64xf32>
    %157 = arith.maximumf %154, %156 : vector<2x8x64xf32>
    %158 = vector.extract_strided_slice %157 {offsets = [0, 0, 0], sizes = [2, 1, 64], strides = [1, 1, 1]} : vector<2x8x64xf32> to vector<2x1x64xf32>
    %159 = vector.shape_cast %158 : vector<2x1x64xf32> to vector<2x64xf32>
    %160 = vector.extract_strided_slice %157 {offsets = [0, 1, 0], sizes = [2, 1, 64], strides = [1, 1, 1]} : vector<2x8x64xf32> to vector<2x1x64xf32>
    %161 = vector.shape_cast %160 : vector<2x1x64xf32> to vector<2x64xf32>
    %162 = arith.maximumf %159, %161 : vector<2x64xf32>
    %163 = vector.extract_strided_slice %157 {offsets = [0, 2, 0], sizes = [2, 1, 64], strides = [1, 1, 1]} : vector<2x8x64xf32> to vector<2x1x64xf32>
    %164 = vector.shape_cast %163 : vector<2x1x64xf32> to vector<2x64xf32>
    %165 = vector.extract_strided_slice %157 {offsets = [0, 3, 0], sizes = [2, 1, 64], strides = [1, 1, 1]} : vector<2x8x64xf32> to vector<2x1x64xf32>
    %166 = vector.shape_cast %165 : vector<2x1x64xf32> to vector<2x64xf32>
    %167 = arith.maximumf %164, %166 : vector<2x64xf32>
    %168 = vector.extract_strided_slice %157 {offsets = [0, 4, 0], sizes = [2, 1, 64], strides = [1, 1, 1]} : vector<2x8x64xf32> to vector<2x1x64xf32>
    %169 = vector.shape_cast %168 : vector<2x1x64xf32> to vector<2x64xf32>
    %170 = vector.extract_strided_slice %157 {offsets = [0, 5, 0], sizes = [2, 1, 64], strides = [1, 1, 1]} : vector<2x8x64xf32> to vector<2x1x64xf32>
    %171 = vector.shape_cast %170 : vector<2x1x64xf32> to vector<2x64xf32>
    %172 = arith.maximumf %169, %171 : vector<2x64xf32>
    %173 = vector.extract_strided_slice %157 {offsets = [0, 6, 0], sizes = [2, 1, 64], strides = [1, 1, 1]} : vector<2x8x64xf32> to vector<2x1x64xf32>
    %174 = vector.shape_cast %173 : vector<2x1x64xf32> to vector<2x64xf32>
    %175 = vector.extract_strided_slice %157 {offsets = [0, 7, 0], sizes = [2, 1, 64], strides = [1, 1, 1]} : vector<2x8x64xf32> to vector<2x1x64xf32>
    %176 = vector.shape_cast %175 : vector<2x1x64xf32> to vector<2x64xf32>
    %177 = arith.maximumf %174, %176 : vector<2x64xf32>
    %178 = vector.extract_strided_slice %152 {offsets = [0, 2, 0, 0], sizes = [2, 1, 8, 64], strides = [1, 1, 1, 1]} : vector<2x8x8x64xf32> to vector<2x1x8x64xf32>
    %179 = vector.shape_cast %178 : vector<2x1x8x64xf32> to vector<2x8x64xf32>
    %180 = vector.extract_strided_slice %152 {offsets = [0, 3, 0, 0], sizes = [2, 1, 8, 64], strides = [1, 1, 1, 1]} : vector<2x8x8x64xf32> to vector<2x1x8x64xf32>
    %181 = vector.shape_cast %180 : vector<2x1x8x64xf32> to vector<2x8x64xf32>
    %182 = arith.maximumf %179, %181 : vector<2x8x64xf32>
    %183 = vector.extract_strided_slice %182 {offsets = [0, 0, 0], sizes = [2, 1, 64], strides = [1, 1, 1]} : vector<2x8x64xf32> to vector<2x1x64xf32>
    %184 = vector.shape_cast %183 : vector<2x1x64xf32> to vector<2x64xf32>
    %185 = vector.extract_strided_slice %182 {offsets = [0, 1, 0], sizes = [2, 1, 64], strides = [1, 1, 1]} : vector<2x8x64xf32> to vector<2x1x64xf32>
    %186 = vector.shape_cast %185 : vector<2x1x64xf32> to vector<2x64xf32>
    %187 = arith.maximumf %184, %186 : vector<2x64xf32>
    %188 = vector.extract_strided_slice %182 {offsets = [0, 2, 0], sizes = [2, 1, 64], strides = [1, 1, 1]} : vector<2x8x64xf32> to vector<2x1x64xf32>
    %189 = vector.shape_cast %188 : vector<2x1x64xf32> to vector<2x64xf32>
    %190 = vector.extract_strided_slice %182 {offsets = [0, 3, 0], sizes = [2, 1, 64], strides = [1, 1, 1]} : vector<2x8x64xf32> to vector<2x1x64xf32>
    %191 = vector.shape_cast %190 : vector<2x1x64xf32> to vector<2x64xf32>
    %192 = arith.maximumf %189, %191 : vector<2x64xf32>
    %193 = vector.extract_strided_slice %182 {offsets = [0, 4, 0], sizes = [2, 1, 64], strides = [1, 1, 1]} : vector<2x8x64xf32> to vector<2x1x64xf32>
    %194 = vector.shape_cast %193 : vector<2x1x64xf32> to vector<2x64xf32>
    %195 = vector.extract_strided_slice %182 {offsets = [0, 5, 0], sizes = [2, 1, 64], strides = [1, 1, 1]} : vector<2x8x64xf32> to vector<2x1x64xf32>
    %196 = vector.shape_cast %195 : vector<2x1x64xf32> to vector<2x64xf32>
    %197 = arith.maximumf %194, %196 : vector<2x64xf32>
    %198 = vector.extract_strided_slice %182 {offsets = [0, 6, 0], sizes = [2, 1, 64], strides = [1, 1, 1]} : vector<2x8x64xf32> to vector<2x1x64xf32>
    %199 = vector.shape_cast %198 : vector<2x1x64xf32> to vector<2x64xf32>
    %200 = vector.extract_strided_slice %182 {offsets = [0, 7, 0], sizes = [2, 1, 64], strides = [1, 1, 1]} : vector<2x8x64xf32> to vector<2x1x64xf32>
    %201 = vector.shape_cast %200 : vector<2x1x64xf32> to vector<2x64xf32>
    %202 = arith.maximumf %199, %201 : vector<2x64xf32>
    %203 = vector.extract_strided_slice %152 {offsets = [0, 4, 0, 0], sizes = [2, 1, 8, 64], strides = [1, 1, 1, 1]} : vector<2x8x8x64xf32> to vector<2x1x8x64xf32>
    %204 = vector.shape_cast %203 : vector<2x1x8x64xf32> to vector<2x8x64xf32>
    %205 = vector.extract_strided_slice %152 {offsets = [0, 5, 0, 0], sizes = [2, 1, 8, 64], strides = [1, 1, 1, 1]} : vector<2x8x8x64xf32> to vector<2x1x8x64xf32>
    %206 = vector.shape_cast %205 : vector<2x1x8x64xf32> to vector<2x8x64xf32>
    %207 = arith.maximumf %204, %206 : vector<2x8x64xf32>
    %208 = vector.extract_strided_slice %207 {offsets = [0, 0, 0], sizes = [2, 1, 64], strides = [1, 1, 1]} : vector<2x8x64xf32> to vector<2x1x64xf32>
    %209 = vector.shape_cast %208 : vector<2x1x64xf32> to vector<2x64xf32>
    %210 = vector.extract_strided_slice %207 {offsets = [0, 1, 0], sizes = [2, 1, 64], strides = [1, 1, 1]} : vector<2x8x64xf32> to vector<2x1x64xf32>
    %211 = vector.shape_cast %210 : vector<2x1x64xf32> to vector<2x64xf32>
    %212 = arith.maximumf %209, %211 : vector<2x64xf32>
    %213 = vector.extract_strided_slice %207 {offsets = [0, 2, 0], sizes = [2, 1, 64], strides = [1, 1, 1]} : vector<2x8x64xf32> to vector<2x1x64xf32>
    %214 = vector.shape_cast %213 : vector<2x1x64xf32> to vector<2x64xf32>
    %215 = vector.extract_strided_slice %207 {offsets = [0, 3, 0], sizes = [2, 1, 64], strides = [1, 1, 1]} : vector<2x8x64xf32> to vector<2x1x64xf32>
    %216 = vector.shape_cast %215 : vector<2x1x64xf32> to vector<2x64xf32>
    %217 = arith.maximumf %214, %216 : vector<2x64xf32>
    %218 = vector.extract_strided_slice %207 {offsets = [0, 4, 0], sizes = [2, 1, 64], strides = [1, 1, 1]} : vector<2x8x64xf32> to vector<2x1x64xf32>
    %219 = vector.shape_cast %218 : vector<2x1x64xf32> to vector<2x64xf32>
    %220 = vector.extract_strided_slice %207 {offsets = [0, 5, 0], sizes = [2, 1, 64], strides = [1, 1, 1]} : vector<2x8x64xf32> to vector<2x1x64xf32>
    %221 = vector.shape_cast %220 : vector<2x1x64xf32> to vector<2x64xf32>
    %222 = arith.maximumf %219, %221 : vector<2x64xf32>
    %223 = vector.extract_strided_slice %207 {offsets = [0, 6, 0], sizes = [2, 1, 64], strides = [1, 1, 1]} : vector<2x8x64xf32> to vector<2x1x64xf32>
    %224 = vector.shape_cast %223 : vector<2x1x64xf32> to vector<2x64xf32>
    %225 = vector.extract_strided_slice %207 {offsets = [0, 7, 0], sizes = [2, 1, 64], strides = [1, 1, 1]} : vector<2x8x64xf32> to vector<2x1x64xf32>
    %226 = vector.shape_cast %225 : vector<2x1x64xf32> to vector<2x64xf32>
    %227 = arith.maximumf %224, %226 : vector<2x64xf32>
    %228 = vector.extract_strided_slice %152 {offsets = [0, 6, 0, 0], sizes = [2, 1, 8, 64], strides = [1, 1, 1, 1]} : vector<2x8x8x64xf32> to vector<2x1x8x64xf32>
    %229 = vector.shape_cast %228 : vector<2x1x8x64xf32> to vector<2x8x64xf32>
    %230 = vector.extract_strided_slice %152 {offsets = [0, 7, 0, 0], sizes = [2, 1, 8, 64], strides = [1, 1, 1, 1]} : vector<2x8x8x64xf32> to vector<2x1x8x64xf32>
    %231 = vector.shape_cast %230 : vector<2x1x8x64xf32> to vector<2x8x64xf32>
    %232 = arith.maximumf %229, %231 : vector<2x8x64xf32>
    %233 = vector.extract_strided_slice %232 {offsets = [0, 0, 0], sizes = [2, 1, 64], strides = [1, 1, 1]} : vector<2x8x64xf32> to vector<2x1x64xf32>
    %234 = vector.shape_cast %233 : vector<2x1x64xf32> to vector<2x64xf32>
    %235 = vector.extract_strided_slice %232 {offsets = [0, 1, 0], sizes = [2, 1, 64], strides = [1, 1, 1]} : vector<2x8x64xf32> to vector<2x1x64xf32>
    %236 = vector.shape_cast %235 : vector<2x1x64xf32> to vector<2x64xf32>
    %237 = arith.maximumf %234, %236 : vector<2x64xf32>
    %238 = vector.extract_strided_slice %232 {offsets = [0, 2, 0], sizes = [2, 1, 64], strides = [1, 1, 1]} : vector<2x8x64xf32> to vector<2x1x64xf32>
    %239 = vector.shape_cast %238 : vector<2x1x64xf32> to vector<2x64xf32>
    %240 = vector.extract_strided_slice %232 {offsets = [0, 3, 0], sizes = [2, 1, 64], strides = [1, 1, 1]} : vector<2x8x64xf32> to vector<2x1x64xf32>
    %241 = vector.shape_cast %240 : vector<2x1x64xf32> to vector<2x64xf32>
    %242 = arith.maximumf %239, %241 : vector<2x64xf32>
    %243 = vector.extract_strided_slice %232 {offsets = [0, 4, 0], sizes = [2, 1, 64], strides = [1, 1, 1]} : vector<2x8x64xf32> to vector<2x1x64xf32>
    %244 = vector.shape_cast %243 : vector<2x1x64xf32> to vector<2x64xf32>
    %245 = vector.extract_strided_slice %232 {offsets = [0, 5, 0], sizes = [2, 1, 64], strides = [1, 1, 1]} : vector<2x8x64xf32> to vector<2x1x64xf32>
    %246 = vector.shape_cast %245 : vector<2x1x64xf32> to vector<2x64xf32>
    %247 = arith.maximumf %244, %246 : vector<2x64xf32>
    %248 = vector.extract_strided_slice %232 {offsets = [0, 6, 0], sizes = [2, 1, 64], strides = [1, 1, 1]} : vector<2x8x64xf32> to vector<2x1x64xf32>
    %249 = vector.shape_cast %248 : vector<2x1x64xf32> to vector<2x64xf32>
    %250 = vector.extract_strided_slice %232 {offsets = [0, 7, 0], sizes = [2, 1, 64], strides = [1, 1, 1]} : vector<2x8x64xf32> to vector<2x1x64xf32>
    %251 = vector.shape_cast %250 : vector<2x1x64xf32> to vector<2x64xf32>
    %252 = arith.maximumf %249, %251 : vector<2x64xf32>
    %253 = tpu.concatenate %162, %167, %172, %177, %187, %192, %197, %202, %212, %217, %222, %227, %237, %242, %247, %252 in 1 : vector<2x64xf32>, vector<2x64xf32>, vector<2x64xf32>, vector<2x64xf32>, vector<2x64xf32>, vector<2x64xf32>, vector<2x64xf32>, vector<2x64xf32>, vector<2x64xf32>, vector<2x64xf32>, vector<2x64xf32>, vector<2x64xf32>, vector<2x64xf32>, vector<2x64xf32>, vector<2x64xf32>, vector<2x64xf32> -> vector<2x1024xf32>
    %c0_79 = arith.constant 0 : index
    %c0_80 = arith.constant 0 : index
    %254 = vector.load %arg3[%c0_79, %c0_80] : memref<1x1024xf32, #tpu.memory_space<vmem>>, vector<1x1024xf32>
    %255 = vector.broadcast %254 : vector<1x1024xf32> to vector<2x1024xf32>
    %256 = arith.addf %253, %255 : vector<2x1024xf32>
    %cst_81 = arith.constant 0.000000e+00 : f32
    %257 = vector.broadcast %cst_81 : f32 to vector<2x1024xf32>
    %258 = arith.maximumf %256, %257 : vector<2x1024xf32>
    %259 = arith.truncf %258 : vector<2x1024xf32> to vector<2x1024xbf16>
    %c0_82 = arith.constant 0 : index
    %c0_83 = arith.constant 0 : index
    %260 = vector.load %arg4[%c0_82, %c0_83] : memref<2x1024xbf16, #tpu.memory_space<vmem>>, vector<2x1024xbf16>
    tpu.vector_store %arg4[%c0_82, %c0_83], %259 {strides = array<i32>} : memref<2x1024xbf16, #tpu.memory_space<vmem>>, vector<2x1024xbf16>,
    return
  }
  func.func @transform_0(%arg0: i32) -> (i32, i32, i32, i32) {
    %c0_i32 = arith.constant 0 : i32
    %c0_i32_0 = arith.constant 0 : i32
    %c0_i32_1 = arith.constant 0 : i32
    %c0_i32_2 = arith.constant 0 : i32
    return %arg0, %c0_i32, %c0_i32_0, %c0_i32_1 : i32, i32, i32, i32
  }
  func.func @transform_1(%arg0: i32) -> (i32, i32, i32) {
    %c0_i32 = arith.constant 0 : i32
    %c0_i32_0 = arith.constant 0 : i32
    %c0_i32_1 = arith.constant 0 : i32
    %c0_i32_2 = arith.constant 0 : i32
    return %c0_i32, %c0_i32_0, %c0_i32_1 : i32, i32, i32
  }
  func.func @transform_2(%arg0: i32) -> (i32, i32) {
    %c0_i32 = arith.constant 0 : i32
    %c0_i32_0 = arith.constant 0 : i32
    %c0_i32_1 = arith.constant 0 : i32
    return %c0_i32, %c0_i32_0 : i32, i32
  }
  func.func @transform_3(%arg0: i32) -> (i32, i32) {
    %c0_i32 = arith.constant 0 : i32
    %c0_i32_0 = arith.constant 0 : i32
    return %arg0, %c0_i32 : i32, i32
  }
}

module attributes {stable_mosaic.version = 11 : i64} {
  func.func @mlp_logsoftmax_kernel(%arg0: i32, %arg1: memref<2x1024xbf16, #tpu.memory_space<vmem>>, %arg2: memref<1024x512xbf16, #tpu.memory_space<vmem>>, %arg3: memref<1x512xf32, #tpu.memory_space<vmem>>, %arg4: memref<512x10xbf16, #tpu.memory_space<vmem>>, %arg5: memref<1x10xf32, #tpu.memory_space<vmem>>, %arg6: memref<2x10xf32, #tpu.memory_space<vmem>>) attributes {dimension_semantics = [#tpu.dimension_semantics<parallel>], iteration_bounds = array<i64: 1>, scalar_prefetch = 0 : i64, scratch_operands = 0 : i64, tpu.core_type = #tpu.core_type<tc>, window_params = [{transform_indices = @transform_0, window_bounds = array<i64: 2, 1024>}, {pipeline_mode = #tpu.pipeline_mode<synchronous>, transform_indices = @transform_1, window_bounds = array<i64: 1024, 512>}, {pipeline_mode = #tpu.pipeline_mode<synchronous>, transform_indices = @transform_2, window_bounds = array<i64: 1, 512>}, {pipeline_mode = #tpu.pipeline_mode<synchronous>, transform_indices = @transform_3, window_bounds = array<i64: 512, 10>}, {pipeline_mode = #tpu.pipeline_mode<synchronous>, transform_indices = @transform_4, window_bounds = array<i64: 1, 10>}, {transform_indices = @transform_5, window_bounds = array<i64: 2, 10>}]} {
    %c0 = arith.constant 0 : index
    %c0_0 = arith.constant 0 : index
    %0 = vector.load %arg1[%c0, %c0_0] : memref<2x1024xbf16, #tpu.memory_space<vmem>>, vector<2x1024xbf16>
    %c0_1 = arith.constant 0 : index
    %c0_2 = arith.constant 0 : index
    %1 = vector.load %arg2[%c0_1, %c0_2] : memref<1024x512xbf16, #tpu.memory_space<vmem>>, vector<1024x512xbf16>
    %cst = arith.constant dense<0.000000e+00> : vector<2x512xf32>
    %2 = tpu.matmul %0, %1, %cst {dimension_numbers = #tpu.dot_dimension_numbers<[1], [0], [0], [1], [0, 0, 1, 1], [], []>} : vector<2x1024xbf16>, vector<1024x512xbf16>, vector<2x512xf32> -> vector<2x512xf32>
    %c0_3 = arith.constant 0 : index
    %c0_4 = arith.constant 0 : index
    %3 = vector.load %arg3[%c0_3, %c0_4] : memref<1x512xf32, #tpu.memory_space<vmem>>, vector<1x512xf32>
    %4 = vector.broadcast %3 : vector<1x512xf32> to vector<2x512xf32>
    %5 = arith.addf %2, %4 : vector<2x512xf32>
    %cst_5 = arith.constant 0.000000e+00 : f32
    %6 = vector.broadcast %cst_5 : f32 to vector<2x512xf32>
    %7 = arith.maximumf %5, %6 : vector<2x512xf32>
    %8 = arith.truncf %7 : vector<2x512xf32> to vector<2x512xbf16>
    %c0_6 = arith.constant 0 : index
    %c0_7 = arith.constant 0 : index
    %9 = vector.load %arg4[%c0_6, %c0_7] : memref<512x10xbf16, #tpu.memory_space<vmem>>, vector<512x10xbf16>
    %cst_8 = arith.constant dense<0.000000e+00> : vector<2x10xf32>
    %10 = tpu.matmul %8, %9, %cst_8 {dimension_numbers = #tpu.dot_dimension_numbers<[1], [0], [0], [1], [0, 0, 1, 1], [], []>} : vector<2x512xbf16>, vector<512x10xbf16>, vector<2x10xf32> -> vector<2x10xf32>
    %c0_9 = arith.constant 0 : index
    %c0_10 = arith.constant 0 : index
    %11 = vector.load %arg5[%c0_9, %c0_10] : memref<1x10xf32, #tpu.memory_space<vmem>>, vector<1x10xf32>
    %12 = vector.broadcast %11 : vector<1x10xf32> to vector<2x10xf32>
    %13 = arith.addf %10, %12 : vector<2x10xf32>
    %cst_11 = arith.constant dense<0xFF800000> : vector<2xf32>
    %14 = vector.multi_reduction <maximumf>, %13, %cst_11 [1] : vector<2x10xf32> to vector<2xf32>
    %15 = vector.shape_cast %14 : vector<2xf32> to vector<2x1xf32>
    %16 = vector.broadcast %15 : vector<2x1xf32> to vector<2x10xf32>
    %17 = arith.subf %13, %16 : vector<2x10xf32>
    %18 = math.exp %17 : vector<2x10xf32>
    %cst_12 = arith.constant dense<0.000000e+00> : vector<2xf32>
    %19 = vector.multi_reduction <add>, %18, %cst_12 [1] : vector<2x10xf32> to vector<2xf32>
    %20 = vector.shape_cast %19 : vector<2xf32> to vector<2x1xf32>
    %21 = math.log %20 : vector<2x1xf32>
    %22 = vector.broadcast %21 : vector<2x1xf32> to vector<2x10xf32>
    %23 = arith.subf %17, %22 : vector<2x10xf32>
    %c0_13 = arith.constant 0 : index
    %c0_14 = arith.constant 0 : index
    %24 = vector.load %arg6[%c0_13, %c0_14] : memref<2x10xf32, #tpu.memory_space<vmem>>, vector<2x10xf32>
    tpu.vector_store %arg6[%c0_13, %c0_14], %23 {strides = array<i32>} : memref<2x10xf32, #tpu.memory_space<vmem>>, vector<2x10xf32>,
    return
  }
  func.func @transform_0(%arg0: i32) -> (i32, i32) {
    %c0_i32 = arith.constant 0 : i32
    %c0_i32_0 = arith.constant 0 : i32
    return %arg0, %c0_i32 : i32, i32
  }
  func.func @transform_1(%arg0: i32) -> (i32, i32) {
    %c0_i32 = arith.constant 0 : i32
    %c0_i32_0 = arith.constant 0 : i32
    %c0_i32_1 = arith.constant 0 : i32
    return %c0_i32, %c0_i32_0 : i32, i32
  }
  func.func @transform_2(%arg0: i32) -> (i32, i32) {
    %c0_i32 = arith.constant 0 : i32
    %c0_i32_0 = arith.constant 0 : i32
    %c0_i32_1 = arith.constant 0 : i32
    return %c0_i32, %c0_i32_0 : i32, i32
  }
  func.func @transform_3(%arg0: i32) -> (i32, i32) {
    %c0_i32 = arith.constant 0 : i32
    %c0_i32_0 = arith.constant 0 : i32
    %c0_i32_1 = arith.constant 0 : i32
    return %c0_i32, %c0_i32_0 : i32, i32
  }
  func.func @transform_4(%arg0: i32) -> (i32, i32) {
    %c0_i32 = arith.constant 0 : i32
    %c0_i32_0 = arith.constant 0 : i32
    %c0_i32_1 = arith.constant 0 : i32
    return %c0_i32, %c0_i32_0 : i32, i32
  }
  func.func @transform_5(%arg0: i32) -> (i32, i32) {
    %c0_i32 = arith.constant 0 : i32
    %c0_i32_0 = arith.constant 0 : i32
    return %arg0, %c0_i32 : i32, i32
  }
}

</mosaic_0001>

<bundles_post_ra>
// kernel: cnn_mnist_forward.5
= control target key start
LH: loop header
LB: loop body
LE: loop exit
PB: predicated region body
PF: predicated region fallthrough
CT: control target
= control target key end

     0   :  { %v281_v36 = vlaneseq  ;;  %v3154_v37 = vmov 1966171168   ;;  %s4107_s0 = inlined_call_operand.vmem [shape: bf16[2,1024], index: 0, kind: input, shape index: {}]   ;;  %s4108_s1 = inlined_call_operand.vmem [shape: bf16[1024,512], index: 1, kind: input, shape index: {}]   ;;  %s4109_s2 = inlined_call_operand.vmem [shape: f32[1,512], index: 2, kind: input, shape index: {}]   ;;  %s4110_s3 = inlined_call_operand.vmem [shape: bf16[512,10], index: 3, kind: input, shape index: {}]   ;;  %s4111_s4 = inlined_call_operand.vmem [shape: f32[1,10], index: 4, kind: input, shape index: {}]   ;;  %s4112_s5 = inlined_call_operand.hbm [shape: f32[2,10], index: 5, kind: output, shape index: {}]  }
   0x1   :  { %v2709_v0 = vld [vmem:[%s4108_s1 + $0x4] ss:$16 sps:$4 sm:$0xff]   ;;  %v2711_v1 = vld [vmem:[%s4108_s1 + $0xc] ss:$16 sps:$4 sm:$0xff]   ;;  %v2713_v2 = vld [vmem:[%s4108_s1] ss:$16 sps:$4 sm:$0xff]   ;;  %v304_v38 = vunpack.c.l.s4 %v3154_v37 }
   0x2   :  { %1639 = vmatprep.subr.bf16.mxu0 %v2709_v0  ;;  %v2714_v3 = vld [vmem:[%s4108_s1 + $0x8] ss:$16 sps:$4 sm:$0xff]   ;;  %1803 = vmatprep.subr.bf16.mxu1 %v2711_v1  ;;  %v2715_v4 = vld [vmem:[%s4108_s1 + $0x24] ss:$16 sps:$4 sm:$0xff]   ;;  %v2717_v5 = vld [vmem:[%s4108_s1 + $0x2c] ss:$16 sps:$4 sm:$0xff]  }
   0x3   :  { %1640 = vmatpush1.bf16.msra.mxu0 %v2713_v2  ;;  %1804 = vmatpush1.bf16.msra.mxu1 %v2714_v3  ;;  %v2719_v6 = vld [vmem:[%s4108_s1 + $0x20] ss:$16 sps:$4 sm:$0xff]   ;;  %v2720_v7 = vld [vmem:[%s4108_s1 + $0x28] ss:$16 sps:$4 sm:$0xff]   ;;  %v2721_v8 = vld [vmem:[%s4108_s1 + $0x44] ss:$16 sps:$4 sm:$0xff]   ;;  %v305_v43 = vunpack.c.0.s8 %v304_v38 }
   0x4   :  { %1641 = vmatprep.subr.bf16.mxu0 %v2715_v4  ;;  %1805 = vmatprep.subr.bf16.mxu1 %v2717_v5  ;;  %v2723_v9 = vld [vmem:[%s4108_s1 + $0x4c] ss:$16 sps:$4 sm:$0xff]   ;;  %v2725_v10 = vld [vmem:[%s4108_s1 + $0x40] ss:$16 sps:$4 sm:$0xff]   ;;  %v2726_v11 = vld [vmem:[%s4108_s1 + $0x48] ss:$16 sps:$4 sm:$0xff]  }
   0x5   :  { %v2727_v12 = vld [vmem:[%s4108_s1 + $0x64] ss:$16 sps:$4 sm:$0xff]   ;;  %v2729_v13 = vld [vmem:[%s4108_s1 + $0x6c] ss:$16 sps:$4 sm:$0xff]   ;;  %v2731_v14 = vld [vmem:[%s4108_s1 + $0x60] ss:$16 sps:$4 sm:$0xff]  }
   0x6   :  { %v2732_v15 = vld [vmem:[%s4108_s1 + $0x68] ss:$16 sps:$4 sm:$0xff]   ;;  %v2733_v16 = vld [vmem:[%s4108_s1 + $0x84] ss:$16 sps:$4 sm:$0xff]   ;;  %v2735_v17 = vld [vmem:[%s4108_s1 + $0x8c] ss:$16 sps:$4 sm:$0xff]  }
   0x7   :  { %1642 = vmatpush1.bf16.msra.mxu0 %v2719_v6  ;;  %1806 = vmatpush1.bf16.msra.mxu1 %v2720_v7  ;;  %v2737_v18 = vld [vmem:[%s4108_s1 + $0x80] ss:$16 sps:$4 sm:$0xff]   ;;  %v2738_v19 = vld [vmem:[%s4108_s1 + $0x88] ss:$16 sps:$4 sm:$0xff]   ;;  %v2739_v20 = vld [vmem:[%s4108_s1 + $0xa4] ss:$16 sps:$4 sm:$0xff]  }
   0x8   :  { %1643 = vmatprep.subr.bf16.mxu0 %v2721_v8  ;;  %1807 = vmatprep.subr.bf16.mxu1 %v2723_v9  ;;  %v2741_v21 = vld [vmem:[%s4108_s1 + $0xac] ss:$16 sps:$4 sm:$0xff]   ;;  %v2743_v22 = vld [vmem:[%s4108_s1 + $0xa0] ss:$16 sps:$4 sm:$0xff]   ;;  %v2744_v23 = vld [vmem:[%s4108_s1 + $0xa8] ss:$16 sps:$4 sm:$0xff]  }
   0x9   :  { %v2745_v24 = vld [vmem:[%s4108_s1 + $0xc4] ss:$16 sps:$4 sm:$0xff]   ;;  %v2747_v25 = vld [vmem:[%s4108_s1 + $0xcc] ss:$16 sps:$4 sm:$0xff]   ;;  %v2749_v26 = vld [vmem:[%s4108_s1 + $0xc0] ss:$16 sps:$4 sm:$0xff]  }
   0xa   :  { %v2750_v27 = vld [vmem:[%s4108_s1 + $0xc8] ss:$16 sps:$4 sm:$0xff]   ;;  %v2751_v28 = vld [vmem:[%s4108_s1 + $0xe4] ss:$16 sps:$4 sm:$0xff]   ;;  %v2753_v29 = vld [vmem:[%s4108_s1 + $0xec] ss:$16 sps:$4 sm:$0xff]  }
   0xb   :  { %1644 = vmatpush1.bf16.msra.mxu0 %v2725_v10  ;;  %1808 = vmatpush1.bf16.msra.mxu1 %v2726_v11  ;;  %v2755_v30 = vld [vmem:[%s4108_s1 + $0xe0] ss:$16 sps:$4 sm:$0xff]   ;;  %v2756_v31 = vld [vmem:[%s4108_s1 + $0xe8] ss:$16 sps:$4 sm:$0xff]   ;;  %v2757_v32 = vld [vmem:[%s4108_s1 + $0x104] ss:$16 sps:$4 sm:$0xff]  }
   0xc   :  { %1645 = vmatprep.subr.bf16.mxu0 %v2727_v12  ;;  %1809 = vmatprep.subr.bf16.mxu1 %v2729_v13  ;;  %v2759_v33 = vld [vmem:[%s4108_s1 + $0x10c] ss:$16 sps:$4 sm:$0xff]   ;;  %v2761_v34 = vld [vmem:[%s4108_s1 + $0x100] ss:$16 sps:$4 sm:$0xff]   ;;  %v2762_v35 = vld [vmem:[%s4108_s1 + $0x108] ss:$16 sps:$4 sm:$0xff]  }
   0xd   :  { %v2763_v39 = vld [vmem:[%s4108_s1 + $0x124] ss:$16 sps:$4 sm:$0xff]   ;;  %v2765_v40 = vld [vmem:[%s4108_s1 + $0x12c] ss:$16 sps:$4 sm:$0xff]   ;;  %v2767_v41 = vld [vmem:[%s4108_s1 + $0x120] ss:$16 sps:$4 sm:$0xff]  }
   0xe   :  { %v3303_v42 = vshrl.u32 %v281_v36, 7  ;;  %v2768_v44 = vld [vmem:[%s4108_s1 + $0x128] ss:$16 sps:$4 sm:$0xff]   ;;  %v2769_v45 = vld [vmem:[%s4108_s1 + $0x144] ss:$16 sps:$4 sm:$0xff]  }
   0xf   :  { %1646 = vmatpush1.bf16.msra.mxu0 %v2731_v14  ;;  %1810 = vmatpush1.bf16.msra.mxu1 %v2732_v15  ;;  %v2771_v46 = vld [vmem:[%s4108_s1 + $0x14c] ss:$16 sps:$4 sm:$0xff]   ;;  %v2773_v47 = vld [vmem:[%s4108_s1 + $0x140] ss:$16 sps:$4 sm:$0xff]   ;;  %v2774_v48 = vld [vmem:[%s4108_s1 + $0x148] ss:$16 sps:$4 sm:$0xff]  }
  0x10   :  { %1647 = vmatprep.subr.bf16.mxu0 %v2733_v16  ;;  %1811 = vmatprep.subr.bf16.mxu1 %v2735_v17  ;;  %v3321_v49 = vsub.s32 %v305_v43, %v3303_v42  ;;  %v2775_v50 = vld [vmem:[%s4108_s1 + $0x164] ss:$16 sps:$4 sm:$0xff]   ;;  %v2777_v51 = vld [vmem:[%s4108_s1 + $0x16c] ss:$16 sps:$4 sm:$0xff]   ;;  %v2779_v53 = vld [vmem:[%s4108_s1 + $0x160] ss:$16 sps:$4 sm:$0xff]  }
  0x11   :  { %v22_v52 = vld [vmem:[%s4107_s0] sm:$0xff]  ;;  %v2780_v55 = vld [vmem:[%s4108_s1 + $0x168] ss:$16 sps:$4 sm:$0xff]   ;;  %v2783_v57 = vld [vmem:[%s4108_s1 + $0x18c] ss:$16 sps:$4 sm:$0xff]  }
  0x12   :  { %v309_v54 = vrot.slane %v22_v52, %v3321_v49  ;;  %v2781_v56 = vld [vmem:[%s4108_s1 + $0x184] ss:$16 sps:$4 sm:$0xff]   ;;  %v2785_v59 = vld [vmem:[%s4108_s1 + $0x180] ss:$16 sps:$4 sm:$0xff]   ;;  %v2786_v61 = vld [vmem:[%s4108_s1 + $0x188] ss:$16 sps:$4 sm:$0xff]   ;;  %v302_v9 = vcombine.high %v22_v52, %v22_v52 }
  0x13   :  { %1648 = vmatpush1.bf16.msra.mxu0 %v2737_v18  ;;  %1812 = vmatpush1.bf16.msra.mxu1 %v2738_v19  ;;  %v2787_v62 = vld [vmem:[%s4108_s1 + $0x1a4] ss:$16 sps:$4 sm:$0xff]   ;;  %v2789_v63 = vld [vmem:[%s4108_s1 + $0x1ac] ss:$16 sps:$4 sm:$0xff]   ;;  %v2791_v0 = vld [vmem:[%s4108_s1 + $0x1a0] ss:$16 sps:$4 sm:$0xff]  }
  0x14   :  { %1649 = vmatprep.subr.bf16.mxu0 %v2739_v20  ;;  %1813 = vmatprep.subr.bf16.mxu1 %v2741_v21  ;;  %v317_v58 = vcombine.high %v309_v54, %v309_v54  ;;  %v2792_v1 = vld [vmem:[%s4108_s1 + $0x1a8] ss:$16 sps:$4 sm:$0xff]   ;;  %v2793_v2 = vld [vmem:[%s4108_s1 + $0x1c4] ss:$16 sps:$4 sm:$0xff]   ;;  %v2795_v3 = vld [vmem:[%s4108_s1 + $0x1cc] ss:$16 sps:$4 sm:$0xff]   ;;  %v316_v13 = vrot.slane %v302_v9, %v3321_v49  ;;  %v3399_v15 = vrot.slane %v309_v54, %v3321_v49 }
  0x15   :  { %v2797_v4 = vld [vmem:[%s4108_s1 + $0x1c0] ss:$16 sps:$4 sm:$0xff]   ;;  %v2798_v5 = vld [vmem:[%s4108_s1 + $0x1c8] ss:$16 sps:$4 sm:$0xff]   ;;  %v2799_v6 = vld [vmem:[%s4108_s1 + $0x1e4] ss:$16 sps:$4 sm:$0xff]  }
  0x16   :  { %v339_v60 = vrot.slane %v317_v58, %v3321_v49  ;;  %v2801_v7 = vld [vmem:[%s4108_s1 + $0x1ec] ss:$16 sps:$4 sm:$0xff]   ;;  %v2803_v8 = vld [vmem:[%s4108_s1 + $0x1e0] ss:$16 sps:$4 sm:$0xff]   ;;  %v2804_v10 = vld [vmem:[%s4108_s1 + $0x1e8] ss:$16 sps:$4 sm:$0xff]   ;;  %v318_v16 = vcombine.high %v316_v13, %v316_v13  ;;  %v3414_v21 = vrot.slane %v316_v13, %v3321_v49 }
  0x17   :  { %1650 = vmatpush1.bf16.msra.mxu0 %v2743_v22  ;;  %1814 = vmatpush1.bf16.msra.mxu1 %v2744_v23  ;;  %v2807_v11 = vld [vmem:[%s4108_s1 + $0x204] ss:$16 sps:$4 sm:$0xff]   ;;  %v2810_v12 = vld [vmem:[%s4108_s1 + $0x20c] ss:$16 sps:$4 sm:$0xff]   ;;  %v2805_v14 = vld [vmem:[%s4108_s1 + $0x200] ss:$16 sps:$4 sm:$0xff]  }
  0x18   :  { %1651 = vmatprep.subr.bf16.mxu0 %v2745_v24  ;;  %1815 = vmatprep.subr.bf16.mxu1 %v2747_v25  ;;  %v2808_v17 = vld [vmem:[%s4108_s1 + $0x208] ss:$16 sps:$4 sm:$0xff]   ;;  %v2813_v18 = vld [vmem:[%s4108_s1 + $0x224] ss:$16 sps:$4 sm:$0xff]   ;;  %v2816_v19 = vld [vmem:[%s4108_s1 + $0x22c] ss:$16 sps:$4 sm:$0xff]   ;;  %v3411_v20 = vrot.slane %v318_v16, %v3321_v49  ;;  %v349_v22 = vcombine.high %v339_v60, %v339_v60 }
  0x19   :  { %1671 = vmatprep.mubr.bf16.mxu0 %v339_v60  ;;  %1835 = vmatprep.mubr.bf16.mxu1 %v339_v60  ;;  %v2811_v23 = vld [vmem:[%s4108_s1 + $0x220] ss:$16 sps:$4 sm:$0xff]   ;;  %v2814_v24 = vld [vmem:[%s4108_s1 + $0x228] ss:$16 sps:$4 sm:$0xff]   ;;  %v2819_v25 = vld [vmem:[%s4108_s1 + $0x244] ss:$16 sps:$4 sm:$0xff]  }
  0x1a   :  { %v2832_v36 = vld [vmem:[%s4108_s1 + $0x288] ss:$16 sps:$4 sm:$0xff]   ;;  %v2837_v37 = vld [vmem:[%s4108_s1 + $0x2a4] ss:$16 sps:$4 sm:$0xff]   ;;  %v2840_v38 = vld [vmem:[%s4108_s1 + $0x2ac] ss:$16 sps:$4 sm:$0xff]  }
  0x1b   :  { %1652 = vmatpush1.bf16.msra.mxu0 %v2749_v26  ;;  %1816 = vmatpush1.bf16.msra.mxu1 %v2750_v27  ;;  %v2822_v26 = vld [vmem:[%s4108_s1 + $0x24c] ss:$16 sps:$4 sm:$0xff]   ;;  %v2817_v27 = vld [vmem:[%s4108_s1 + $0x240] ss:$16 sps:$4 sm:$0xff]   ;;  %v2850_v49 = vld [vmem:[%s4108_s1 + $0x2e8] ss:$16 sps:$4 sm:$0xff]  }
  0x1c   :  { %1653 = vmatprep.subr.bf16.mxu0 %v2751_v28  ;;  %1817 = vmatprep.subr.bf16.mxu1 %v2753_v29  ;;  %v2820_v28 = vld [vmem:[%s4108_s1 + $0x248] ss:$16 sps:$4 sm:$0xff]   ;;  %v2825_v29 = vld [vmem:[%s4108_s1 + $0x264] ss:$16 sps:$4 sm:$0xff]   ;;  %v2846_v43 = vld [vmem:[%s4108_s1 + $0x2cc] ss:$16 sps:$4 sm:$0xff]  }
  0x1d   :  { %v2853_v52 = vld [vmem:[%s4108_s1 + $0x300] ss:$16 sps:$4 sm:$0xff]   ;;  %v2861_v54 = vld [vmem:[%s4108_s1 + $0x324] ss:$16 sps:$4 sm:$0xff]   ;;  %v2886_v9 = vld [vmem:[%s4108_s1 + $0x3a8] ss:$16 sps:$4 sm:$0xff]  }
  0x1e   :  { %v2867_v58 = vld [vmem:[%s4108_s1 + $0x344] ss:$16 sps:$4 sm:$0xff]   ;;  %v2865_v60 = vld [vmem:[%s4108_s1 + $0x340] ss:$16 sps:$4 sm:$0xff]   ;;  %v2892_v13 = vld [vmem:[%s4108_s1 + $0x3c8] ss:$16 sps:$4 sm:$0xff]  }
  0x1f   :  { %1654 = vmatpush1.bf16.msra.mxu0 %v2755_v30  ;;  %1818 = vmatpush1.bf16.msra.mxu1 %v2756_v31  ;;  %v2828_v30 = vld [vmem:[%s4108_s1 + $0x26c] ss:$16 sps:$4 sm:$0xff]   ;;  %v2823_v31 = vld [vmem:[%s4108_s1 + $0x260] ss:$16 sps:$4 sm:$0xff]  }
  0x20   :  { %1655 = vmatprep.subr.bf16.mxu0 %v2757_v32  ;;  %1819 = vmatprep.subr.bf16.mxu1 %v2759_v33  ;;  %v2826_v32 = vld [vmem:[%s4108_s1 + $0x268] ss:$16 sps:$4 sm:$0xff]   ;;  %v2831_v33 = vld [vmem:[%s4108_s1 + $0x284] ss:$16 sps:$4 sm:$0xff]   ;;  %v2900_v16 = vld [vmem:[%s4108_s1 + $0x3ec] ss:$16 sps:$4 sm:$0xff]  }
  0x23   :  { %1656 = vmatpush1.bf16.msra.mxu0 %v2761_v34  ;;  %1820 = vmatpush1.bf16.msra.mxu1 %v2762_v35  ;;  %v2834_v34 = vld [vmem:[%s4108_s1 + $0x28c] ss:$16 sps:$4 sm:$0xff]   ;;  %v2829_v35 = vld [vmem:[%s4108_s1 + $0x280] ss:$16 sps:$4 sm:$0xff]  }
  0x24   :  { %1657 = vmatprep.subr.bf16.mxu0 %v2763_v39  ;;  %1821 = vmatprep.subr.bf16.mxu1 %v2765_v40  ;;  %v2835_v39 = vld [vmem:[%s4108_s1 + $0x2a0] ss:$16 sps:$4 sm:$0xff]   ;;  %v2838_v40 = vld [vmem:[%s4108_s1 + $0x2a8] ss:$16 sps:$4 sm:$0xff]  }
  0x27   :  { %1658 = vmatpush1.bf16.msra.mxu0 %v2767_v41  ;;  %1822 = vmatpush1.bf16.msra.mxu1 %v2768_v44  ;;  %v2843_v41 = vld [vmem:[%s4108_s1 + $0x2c4] ss:$16 sps:$4 sm:$0xff]   ;;  %v2841_v44 = vld [vmem:[%s4108_s1 + $0x2c0] ss:$16 sps:$4 sm:$0xff]  }
  0x28   :  { %1659 = vmatprep.subr.bf16.mxu0 %v2769_v45  ;;  %1823 = vmatprep.subr.bf16.mxu1 %v2771_v46  ;;  %v2844_v45 = vld [vmem:[%s4108_s1 + $0x2c8] ss:$16 sps:$4 sm:$0xff]   ;;  %v2849_v46 = vld [vmem:[%s4108_s1 + $0x2e4] ss:$16 sps:$4 sm:$0xff]  }
  0x2b   :  { %1660 = vmatpush1.bf16.msra.mxu0 %v2773_v47  ;;  %1824 = vmatpush1.bf16.msra.mxu1 %v2774_v48  ;;  %v2852_v47 = vld [vmem:[%s4108_s1 + $0x2ec] ss:$16 sps:$4 sm:$0xff]   ;;  %v2847_v48 = vld [vmem:[%s4108_s1 + $0x2e0] ss:$16 sps:$4 sm:$0xff]  }
  0x2c   :  { %1661 = vmatprep.subr.bf16.mxu0 %v2775_v50  ;;  %1825 = vmatprep.subr.bf16.mxu1 %v2777_v51  ;;  %v2855_v50 = vld [vmem:[%s4108_s1 + $0x304] ss:$16 sps:$4 sm:$0xff]   ;;  %v2858_v51 = vld [vmem:[%s4108_s1 + $0x30c] ss:$16 sps:$4 sm:$0xff]  }
  0x2f   :  { %1662 = vmatpush1.bf16.msra.mxu0 %v2779_v53  ;;  %1826 = vmatpush1.bf16.msra.mxu1 %v2780_v55  ;;  %v2856_v53 = vld [vmem:[%s4108_s1 + $0x308] ss:$16 sps:$4 sm:$0xff]   ;;  %v2864_v55 = vld [vmem:[%s4108_s1 + $0x32c] ss:$16 sps:$4 sm:$0xff]  }
  0x30   :  { %1663 = vmatprep.subr.bf16.mxu0 %v2781_v56  ;;  %1827 = vmatprep.subr.bf16.mxu1 %v2783_v57  ;;  %v2859_v56 = vld [vmem:[%s4108_s1 + $0x320] ss:$16 sps:$4 sm:$0xff]   ;;  %v2862_v57 = vld [vmem:[%s4108_s1 + $0x328] ss:$16 sps:$4 sm:$0xff]  }
  0x33   :  { %1664 = vmatpush1.bf16.msra.mxu0 %v2785_v59  ;;  %1828 = vmatpush1.bf16.msra.mxu1 %v2786_v61  ;;  %v2870_v59 = vld [vmem:[%s4108_s1 + $0x34c] ss:$16 sps:$4 sm:$0xff]   ;;  %v2868_v61 = vld [vmem:[%s4108_s1 + $0x348] ss:$16 sps:$4 sm:$0xff]  }
  0x34   :  { %1665 = vmatprep.subr.bf16.mxu0 %v2787_v62  ;;  %1829 = vmatprep.subr.bf16.mxu1 %v2789_v63  ;;  %v2873_v62 = vld [vmem:[%s4108_s1 + $0x364] ss:$16 sps:$4 sm:$0xff]   ;;  %v2876_v63 = vld [vmem:[%s4108_s1 + $0x36c] ss:$16 sps:$4 sm:$0xff]  }
  0x37   :  { %1666 = vmatpush1.bf16.msra.mxu0 %v2791_v0  ;;  %1830 = vmatpush1.bf16.msra.mxu1 %v2792_v1  ;;  %v2871_v0 = vld [vmem:[%s4108_s1 + $0x360] ss:$16 sps:$4 sm:$0xff]   ;;  %v2874_v1 = vld [vmem:[%s4108_s1 + $0x368] ss:$16 sps:$4 sm:$0xff]  }
  0x38   :  { %1667 = vmatprep.subr.bf16.mxu0 %v2793_v2  ;;  %1831 = vmatprep.subr.bf16.mxu1 %v2795_v3  ;;  %v2879_v2 = vld [vmem:[%s4108_s1 + $0x384] ss:$16 sps:$4 sm:$0xff]   ;;  %v2882_v3 = vld [vmem:[%s4108_s1 + $0x38c] ss:$16 sps:$4 sm:$0xff]  }
  0x3b   :  { %1668 = vmatpush1.bf16.msra.mxu0 %v2797_v4  ;;  %1832 = vmatpush1.bf16.msra.mxu1 %v2798_v5  ;;  %v2877_v4 = vld [vmem:[%s4108_s1 + $0x380] ss:$16 sps:$4 sm:$0xff]   ;;  %v2880_v5 = vld [vmem:[%s4108_s1 + $0x388] ss:$16 sps:$4 sm:$0xff]  }
  0x3c   :  { %1669 = vmatprep.subr.bf16.mxu0 %v2799_v6  ;;  %1833 = vmatprep.subr.bf16.mxu1 %v2801_v7  ;;  %v2885_v6 = vld [vmem:[%s4108_s1 + $0x3a4] ss:$16 sps:$4 sm:$0xff]   ;;  %v2888_v7 = vld [vmem:[%s4108_s1 + $0x3ac] ss:$16 sps:$4 sm:$0xff]  }
  0x3f   :  { %1670 = vmatpush1.bf16.msra.mxu0 %v2803_v8  ;;  %1834 = vmatpush1.bf16.msra.mxu1 %v2804_v10  ;;  %v2883_v8 = vld [vmem:[%s4108_s1 + $0x3a0] ss:$16 sps:$4 sm:$0xff]   ;;  %v2891_v10 = vld [vmem:[%s4108_s1 + $0x3c4] ss:$16 sps:$4 sm:$0xff]  }
  0x40   :  { %1680 = vmatprep.subr.bf16.mxu0 %v2807_v11  ;;  %1844 = vmatprep.subr.bf16.mxu1 %v2810_v12  ;;  %v2894_v11 = vld [vmem:[%s4108_s1 + $0x3cc] ss:$16 sps:$4 sm:$0xff]   ;;  %v2889_v12 = vld [vmem:[%s4108_s1 + $0x3c0] ss:$16 sps:$4 sm:$0xff]  }
  0x42   :  { %1672 = vmatmul.mubr.bf16.vlgmr.msra.gmra.mrb[0].mxu0 %v3399_v15  ;;  %1836 = vmatmul.mubr.bf16.vlgmr.msra.gmra.mrb[0].mxu1 %v3399_v15 }
  0x43   :  { %1681 = vmatpush1.bf16.msra.mxu0 %v2805_v14  ;;  %1845 = vmatpush1.bf16.msra.mxu1 %v2808_v17  ;;  %v2897_v14 = vld [vmem:[%s4108_s1 + $0x3e4] ss:$16 sps:$4 sm:$0xff]   ;;  %v2895_v17 = vld [vmem:[%s4108_s1 + $0x3e0] ss:$16 sps:$4 sm:$0xff]  }
  0x44   :  { %1682 = vmatprep.subr.bf16.mxu0 %v2813_v18  ;;  %1846 = vmatprep.subr.bf16.mxu1 %v2816_v19  ;;  %v2898_v18 = vld [vmem:[%s4108_s1 + $0x3e8] ss:$16 sps:$4 sm:$0xff]   ;;  %v2903_v19 = vld [vmem:[%s4108_s1 + $0x404] ss:$16 sps:$4 sm:$0xff]  }
  0x45   :  { %1712 = vmatprep.mubr.bf16.mxu0 %v349_v22  ;;  %1876 = vmatprep.mubr.bf16.mxu1 %v349_v22  ;;  %v2906_v22 = vld [vmem:[%s4108_s1 + $0x40c] ss:$16 sps:$4 sm:$0xff]  }
  0x47   :  { %1683 = vmatpush1.bf16.msra.mxu0 %v2811_v23  ;;  %1847 = vmatpush1.bf16.msra.mxu1 %v2814_v24  ;;  %v2901_v23 = vld [vmem:[%s4108_s1 + $0x400] ss:$16 sps:$4 sm:$0xff]   ;;  %v347_v24 = vcombine.high %v3399_v15, %v3399_v15 }
  0x48   :  { %1684 = vmatprep.subr.bf16.mxu0 %v2819_v25  ;;  %1848 = vmatprep.subr.bf16.mxu1 %v2822_v26  ;;  %v2904_v25 = vld [vmem:[%s4108_s1 + $0x408] ss:$16 sps:$4 sm:$0xff]   ;;  %v2909_v26 = vld [vmem:[%s4108_s1 + $0x424] ss:$16 sps:$4 sm:$0xff]   ;;  %v2907_v15 = vld [vmem:[%s4108_s1 + $0x420] ss:$16 sps:$4 sm:$0xff]  }
  0x4b   :  { %1685 = vmatpush1.bf16.msra.mxu0 %v2817_v27  ;;  %1849 = vmatpush1.bf16.msra.mxu1 %v2820_v28  ;;  %v2912_v27 = vld [vmem:[%s4108_s1 + $0x42c] ss:$16 sps:$4 sm:$0xff]   ;;  %v2910_v28 = vld [vmem:[%s4108_s1 + $0x428] ss:$16 sps:$4 sm:$0xff]  }
  0x4c   :  { %1686 = vmatprep.subr.bf16.mxu0 %v2825_v29  ;;  %1850 = vmatprep.subr.bf16.mxu1 %v2828_v30  ;;  %v2915_v29 = vld [vmem:[%s4108_s1 + $0x444] ss:$16 sps:$4 sm:$0xff]   ;;  %v2918_v30 = vld [vmem:[%s4108_s1 + $0x44c] ss:$16 sps:$4 sm:$0xff]  }
  0x4f   :  { %1687 = vmatpush1.bf16.msra.mxu0 %v2823_v31  ;;  %1851 = vmatpush1.bf16.msra.mxu1 %v2826_v32  ;;  %v2913_v31 = vld [vmem:[%s4108_s1 + $0x440] ss:$16 sps:$4 sm:$0xff]   ;;  %v2916_v32 = vld [vmem:[%s4108_s1 + $0x448] ss:$16 sps:$4 sm:$0xff]  }
  0x50   :  { %1688 = vmatprep.subr.bf16.mxu0 %v2831_v33  ;;  %1852 = vmatprep.subr.bf16.mxu1 %v2834_v34  ;;  %v2921_v33 = vld [vmem:[%s4108_s1 + $0x464] ss:$16 sps:$4 sm:$0xff]   ;;  %v2924_v34 = vld [vmem:[%s4108_s1 + $0x46c] ss:$16 sps:$4 sm:$0xff]  }
  0x53   :  { %1689 = vmatpush1.bf16.msra.mxu0 %v2829_v35  ;;  %1853 = vmatpush1.bf16.msra.mxu1 %v2832_v36  ;;  %v2919_v35 = vld [vmem:[%s4108_s1 + $0x460] ss:$16 sps:$4 sm:$0xff]   ;;  %v2922_v36 = vld [vmem:[%s4108_s1 + $0x468] ss:$16 sps:$4 sm:$0xff]  }
  0x54   :  { %1690 = vmatprep.subr.bf16.mxu0 %v2837_v37  ;;  %1854 = vmatprep.subr.bf16.mxu1 %v2840_v38  ;;  %v2927_v37 = vld [vmem:[%s4108_s1 + $0x484] ss:$16 sps:$4 sm:$0xff]   ;;  %v2930_v38 = vld [vmem:[%s4108_s1 + $0x48c] ss:$16 sps:$4 sm:$0xff]  }
  0x57   :  { %1691 = vmatpush1.bf16.msra.mxu0 %v2835_v39  ;;  %1855 = vmatpush1.bf16.msra.mxu1 %v2838_v40  ;;  %v2925_v39 = vld [vmem:[%s4108_s1 + $0x480] ss:$16 sps:$4 sm:$0xff]   ;;  %v2928_v40 = vld [vmem:[%s4108_s1 + $0x488] ss:$16 sps:$4 sm:$0xff]  }
  0x58   :  { %1692 = vmatprep.subr.bf16.mxu0 %v2843_v41  ;;  %1856 = vmatprep.subr.bf16.mxu1 %v2846_v43  ;;  %v2933_v41 = vld [vmem:[%s4108_s1 + $0x4a4] ss:$16 sps:$4 sm:$0xff]   ;;  %v2936_v43 = vld [vmem:[%s4108_s1 + $0x4ac] ss:$16 sps:$4 sm:$0xff]  }
  0x5b   :  { %1693 = vmatpush1.bf16.msra.mxu0 %v2841_v44  ;;  %1857 = vmatpush1.bf16.msra.mxu1 %v2844_v45  ;;  %v2931_v44 = vld [vmem:[%s4108_s1 + $0x4a0] ss:$16 sps:$4 sm:$0xff]   ;;  %v2934_v45 = vld [vmem:[%s4108_s1 + $0x4a8] ss:$16 sps:$4 sm:$0xff]  }
  0x5c   :  { %1694 = vmatprep.subr.bf16.mxu0 %v2849_v46  ;;  %1858 = vmatprep.subr.bf16.mxu1 %v2852_v47  ;;  %v2939_v46 = vld [vmem:[%s4108_s1 + $0x4c4] ss:$16 sps:$4 sm:$0xff]   ;;  %v2942_v47 = vld [vmem:[%s4108_s1 + $0x4cc] ss:$16 sps:$4 sm:$0xff]  }
  0x5f   :  { %1695 = vmatpush1.bf16.msra.mxu0 %v2847_v48  ;;  %1859 = vmatpush1.bf16.msra.mxu1 %v2850_v49  ;;  %v2937_v48 = vld [vmem:[%s4108_s1 + $0x4c0] ss:$16 sps:$4 sm:$0xff]   ;;  %v2940_v49 = vld [vmem:[%s4108_s1 + $0x4c8] ss:$16 sps:$4 sm:$0xff]  }
  0x60   :  { %1696 = vmatprep.subr.bf16.mxu0 %v2855_v50  ;;  %1860 = vmatprep.subr.bf16.mxu1 %v2858_v51  ;;  %v2945_v50 = vld [vmem:[%s4108_s1 + $0x4e4] ss:$16 sps:$4 sm:$0xff]   ;;  %v2948_v51 = vld [vmem:[%s4108_s1 + $0x4ec] ss:$16 sps:$4 sm:$0xff]  }
  0x63   :  { %1697 = vmatpush1.bf16.msra.mxu0 %v2853_v52  ;;  %1861 = vmatpush1.bf16.msra.mxu1 %v2856_v53  ;;  %v2943_v52 = vld [vmem:[%s4108_s1 + $0x4e0] ss:$16 sps:$4 sm:$0xff]   ;;  %v2946_v53 = vld [vmem:[%s4108_s1 + $0x4e8] ss:$16 sps:$4 sm:$0xff]  }
  0x64   :  { %1698 = vmatprep.subr.bf16.mxu0 %v2861_v54  ;;  %1862 = vmatprep.subr.bf16.mxu1 %v2864_v55  ;;  %v2951_v54 = vld [vmem:[%s4108_s1 + $0x504] ss:$16 sps:$4 sm:$0xff]   ;;  %v2954_v55 = vld [vmem:[%s4108_s1 + $0x50c] ss:$16 sps:$4 sm:$0xff]  }
  0x67   :  { %1699 = vmatpush1.bf16.msra.mxu0 %v2859_v56  ;;  %1863 = vmatpush1.bf16.msra.mxu1 %v2862_v57  ;;  %v2949_v56 = vld [vmem:[%s4108_s1 + $0x500] ss:$16 sps:$4 sm:$0xff]   ;;  %v2952_v57 = vld [vmem:[%s4108_s1 + $0x508] ss:$16 sps:$4 sm:$0xff]  }
  0x68   :  { %1700 = vmatprep.subr.bf16.mxu0 %v2867_v58  ;;  %1864 = vmatprep.subr.bf16.mxu1 %v2870_v59  ;;  %v2957_v58 = vld [vmem:[%s4108_s1 + $0x524] ss:$16 sps:$4 sm:$0xff]   ;;  %v2960_v59 = vld [vmem:[%s4108_s1 + $0x52c] ss:$16 sps:$4 sm:$0xff]  }
  0x6b   :  { %1701 = vmatpush1.bf16.msra.mxu0 %v2865_v60  ;;  %1865 = vmatpush1.bf16.msra.mxu1 %v2868_v61  ;;  %v2955_v60 = vld [vmem:[%s4108_s1 + $0x520] ss:$16 sps:$4 sm:$0xff]   ;;  %v2958_v61 = vld [vmem:[%s4108_s1 + $0x528] ss:$16 sps:$4 sm:$0xff]  }
  0x6c   :  { %1702 = vmatprep.subr.bf16.mxu0 %v2873_v62  ;;  %1866 = vmatprep.subr.bf16.mxu1 %v2876_v63  ;;  %v2963_v62 = vld [vmem:[%s4108_s1 + $0x544] ss:$16 sps:$4 sm:$0xff]   ;;  %v2966_v63 = vld [vmem:[%s4108_s1 + $0x54c] ss:$16 sps:$4 sm:$0xff]  }
  0x6f   :  { %1703 = vmatpush1.bf16.msra.mxu0 %v2871_v0  ;;  %1867 = vmatpush1.bf16.msra.mxu1 %v2874_v1  ;;  %v2961_v0 = vld [vmem:[%s4108_s1 + $0x540] ss:$16 sps:$4 sm:$0xff]   ;;  %v2964_v1 = vld [vmem:[%s4108_s1 + $0x548] ss:$16 sps:$4 sm:$0xff]  }
  0x70   :  { %1704 = vmatprep.subr.bf16.mxu0 %v2879_v2  ;;  %1868 = vmatprep.subr.bf16.mxu1 %v2882_v3  ;;  %v2969_v2 = vld [vmem:[%s4108_s1 + $0x564] ss:$16 sps:$4 sm:$0xff]   ;;  %v2972_v3 = vld [vmem:[%s4108_s1 + $0x56c] ss:$16 sps:$4 sm:$0xff]  }
  0x73   :  { %1705 = vmatpush1.bf16.msra.mxu0 %v2877_v4  ;;  %1869 = vmatpush1.bf16.msra.mxu1 %v2880_v5  ;;  %v2967_v4 = vld [vmem:[%s4108_s1 + $0x560] ss:$16 sps:$4 sm:$0xff]   ;;  %v2970_v5 = vld [vmem:[%s4108_s1 + $0x568] ss:$16 sps:$4 sm:$0xff]  }
  0x74   :  { %1706 = vmatprep.subr.bf16.mxu0 %v2885_v6  ;;  %1870 = vmatprep.subr.bf16.mxu1 %v2888_v7  ;;  %v2975_v6 = vld [vmem:[%s4108_s1 + $0x584] ss:$16 sps:$4 sm:$0xff]   ;;  %v2978_v7 = vld [vmem:[%s4108_s1 + $0x58c] ss:$16 sps:$4 sm:$0xff]  }
  0x77   :  { %1707 = vmatpush1.bf16.msra.mxu0 %v2883_v8  ;;  %1871 = vmatpush1.bf16.msra.mxu1 %v2886_v9  ;;  %v2973_v8 = vld [vmem:[%s4108_s1 + $0x580] ss:$16 sps:$4 sm:$0xff]   ;;  %v2976_v9 = vld [vmem:[%s4108_s1 + $0x588] ss:$16 sps:$4 sm:$0xff]  }
  0x78   :  { %1708 = vmatprep.subr.bf16.mxu0 %v2891_v10  ;;  %1872 = vmatprep.subr.bf16.mxu1 %v2894_v11  ;;  %v2981_v10 = vld [vmem:[%s4108_s1 + $0x5a4] ss:$16 sps:$4 sm:$0xff]   ;;  %v2984_v11 = vld [vmem:[%s4108_s1 + $0x5ac] ss:$16 sps:$4 sm:$0xff]  }
  0x7b   :  { %1709 = vmatpush1.bf16.msra.mxu0 %v2889_v12  ;;  %1873 = vmatpush1.bf16.msra.mxu1 %v2892_v13  ;;  %v2979_v12 = vld [vmem:[%s4108_s1 + $0x5a0] ss:$16 sps:$4 sm:$0xff]   ;;  %v2982_v13 = vld [vmem:[%s4108_s1 + $0x5a8] ss:$16 sps:$4 sm:$0xff]  }
  0x7c   :  { %1710 = vmatprep.subr.bf16.mxu0 %v2897_v14  ;;  %1874 = vmatprep.subr.bf16.mxu1 %v2900_v16  ;;  %v2987_v14 = vld [vmem:[%s4108_s1 + $0x5c4] ss:$16 sps:$4 sm:$0xff]   ;;  %v2990_v16 = vld [vmem:[%s4108_s1 + $0x5cc] ss:$16 sps:$4 sm:$0xff]  }
  0x7f   :  { %1711 = vmatpush1.bf16.msra.mxu0 %v2895_v17  ;;  %1875 = vmatpush1.bf16.msra.mxu1 %v2898_v18  ;;  %v2985_v17 = vld [vmem:[%s4108_s1 + $0x5c0] ss:$16 sps:$4 sm:$0xff]   ;;  %v2988_v18 = vld [vmem:[%s4108_s1 + $0x5c8] ss:$16 sps:$4 sm:$0xff]  }
  0x80   :  { %1721 = vmatprep.subr.bf16.mxu0 %v2903_v19  ;;  %1885 = vmatprep.subr.bf16.mxu1 %v2906_v22  ;;  %v2993_v19 = vld [vmem:[%s4108_s1 + $0x5e4] ss:$16 sps:$4 sm:$0xff]   ;;  %v2996_v22 = vld [vmem:[%s4108_s1 + $0x5ec] ss:$16 sps:$4 sm:$0xff]  }
  0x82   :  { %1713 = vmatmul.mubr.bf16.vlgmr.msra.gmra.mrb[0].mxu0 %v347_v24  ;;  %1877 = vmatmul.mubr.bf16.vlgmr.msra.gmra.mrb[0].mxu1 %v347_v24  ;;  %v2994_v24 = vld [vmem:[%s4108_s1 + $0x5e8] ss:$16 sps:$4 sm:$0xff]  }
  0x83   :  { %1722 = vmatpush1.bf16.msra.mxu0 %v2901_v23  ;;  %1886 = vmatpush1.bf16.msra.mxu1 %v2904_v25  ;;  %v2991_v23 = vld [vmem:[%s4108_s1 + $0x5e0] ss:$16 sps:$4 sm:$0xff]   ;;  %v3000_v25 = vld [vmem:[%s4108_s1 + $0x604] ss:$16 sps:$4 sm:$0xff]  }
  0x84   :  { %1723 = vmatprep.subr.bf16.mxu0 %v2909_v26  ;;  %1887 = vmatprep.subr.bf16.mxu1 %v2912_v27  ;;  %v3003_v26 = vld [vmem:[%s4108_s1 + $0x60c] ss:$16 sps:$4 sm:$0xff]   ;;  %v2998_v27 = vld [vmem:[%s4108_s1 + $0x600] ss:$16 sps:$4 sm:$0xff]  }
  0x85   :  { %1753 = vmatprep.mubr.bf16.mxu0 %v3411_v20  ;;  %1917 = vmatprep.mubr.bf16.mxu1 %v3411_v20 }
  0x87   :  { %1724 = vmatpush1.bf16.msra.mxu0 %v2907_v15  ;;  %1888 = vmatpush1.bf16.msra.mxu1 %v2910_v28  ;;  %v3001_v15 = vld [vmem:[%s4108_s1 + $0x608] ss:$16 sps:$4 sm:$0xff]   ;;  %v3006_v28 = vld [vmem:[%s4108_s1 + $0x624] ss:$16 sps:$4 sm:$0xff]  }
  0x88   :  { %1725 = vmatprep.subr.bf16.mxu0 %v2915_v29  ;;  %1889 = vmatprep.subr.bf16.mxu1 %v2918_v30  ;;  %v3009_v29 = vld [vmem:[%s4108_s1 + $0x62c] ss:$16 sps:$4 sm:$0xff]   ;;  %v3004_v30 = vld [vmem:[%s4108_s1 + $0x620] ss:$16 sps:$4 sm:$0xff]  }
  0x8b   :  { %1726 = vmatpush1.bf16.msra.mxu0 %v2913_v31  ;;  %1890 = vmatpush1.bf16.msra.mxu1 %v2916_v32  ;;  %v3007_v31 = vld [vmem:[%s4108_s1 + $0x628] ss:$16 sps:$4 sm:$0xff]   ;;  %v350_v32 = vcombine.high %v3411_v20, %v3411_v20  ;;  %v3010_v20 = vld [vmem:[%s4108_s1 + $0x640] ss:$16 sps:$4 sm:$0xff]  }
  0x8c   :  { %1727 = vmatprep.subr.bf16.mxu0 %v2921_v33  ;;  %1891 = vmatprep.subr.bf16.mxu1 %v2924_v34  ;;  %v3012_v33 = vld [vmem:[%s4108_s1 + $0x644] ss:$16 sps:$4 sm:$0xff]   ;;  %v3015_v34 = vld [vmem:[%s4108_s1 + $0x64c] ss:$16 sps:$4 sm:$0xff]  }
  0x8f   :  { %1728 = vmatpush1.bf16.msra.mxu0 %v2919_v35  ;;  %1892 = vmatpush1.bf16.msra.mxu1 %v2922_v36  ;;  %v3013_v35 = vld [vmem:[%s4108_s1 + $0x648] ss:$16 sps:$4 sm:$0xff]  }
  0x90   :  { %1729 = vmatprep.subr.bf16.mxu0 %v2927_v37  ;;  %1893 = vmatprep.subr.bf16.mxu1 %v2930_v38 }
  0x93   :  { %1730 = vmatpush1.bf16.msra.mxu0 %v2925_v39  ;;  %1894 = vmatpush1.bf16.msra.mxu1 %v2928_v40 }
  0x94   :  { %1731 = vmatprep.subr.bf16.mxu0 %v2933_v41  ;;  %1895 = vmatprep.subr.bf16.mxu1 %v2936_v43 }
  0x97   :  { %1732 = vmatpush1.bf16.msra.mxu0 %v2931_v44  ;;  %1896 = vmatpush1.bf16.msra.mxu1 %v2934_v45 }
  0x98   :  { %1733 = vmatprep.subr.bf16.mxu0 %v2939_v46  ;;  %1897 = vmatprep.subr.bf16.mxu1 %v2942_v47 }
  0x9b   :  { %1734 = vmatpush1.bf16.msra.mxu0 %v2937_v48  ;;  %1898 = vmatpush1.bf16.msra.mxu1 %v2940_v49 }
  0x9c   :  { %1735 = vmatprep.subr.bf16.mxu0 %v2945_v50  ;;  %1899 = vmatprep.subr.bf16.mxu1 %v2948_v51 }
  0x9f   :  { %1736 = vmatpush1.bf16.msra.mxu0 %v2943_v52  ;;  %1900 = vmatpush1.bf16.msra.mxu1 %v2946_v53 }
  0xa0   :  { %1737 = vmatprep.subr.bf16.mxu0 %v2951_v54  ;;  %1901 = vmatprep.subr.bf16.mxu1 %v2954_v55 }
  0xa3   :  { %1738 = vmatpush1.bf16.msra.mxu0 %v2949_v56  ;;  %1902 = vmatpush1.bf16.msra.mxu1 %v2952_v57 }
  0xa4   :  { %1739 = vmatprep.subr.bf16.mxu0 %v2957_v58  ;;  %1903 = vmatprep.subr.bf16.mxu1 %v2960_v59 }
  0xa7   :  { %1740 = vmatpush1.bf16.msra.mxu0 %v2955_v60  ;;  %1904 = vmatpush1.bf16.msra.mxu1 %v2958_v61 }
  0xa8   :  { %1741 = vmatprep.subr.bf16.mxu0 %v2963_v62  ;;  %1905 = vmatprep.subr.bf16.mxu1 %v2966_v63 }
  0xab   :  { %1742 = vmatpush1.bf16.msra.mxu0 %v2961_v0  ;;  %1906 = vmatpush1.bf16.msra.mxu1 %v2964_v1 }
  0xac   :  { %1743 = vmatprep.subr.bf16.mxu0 %v2969_v2  ;;  %1907 = vmatprep.subr.bf16.mxu1 %v2972_v3 }
  0xaf   :  { %1744 = vmatpush1.bf16.msra.mxu0 %v2967_v4  ;;  %1908 = vmatpush1.bf16.msra.mxu1 %v2970_v5 }
  0xb0   :  { %1745 = vmatprep.subr.bf16.mxu0 %v2975_v6  ;;  %1909 = vmatprep.subr.bf16.mxu1 %v2978_v7 }
  0xb3   :  { %1746 = vmatpush1.bf16.msra.mxu0 %v2973_v8  ;;  %1910 = vmatpush1.bf16.msra.mxu1 %v2976_v9 }
  0xb4   :  { %1747 = vmatprep.subr.bf16.mxu0 %v2981_v10  ;;  %1911 = vmatprep.subr.bf16.mxu1 %v2984_v11 }
  0xb7   :  { %1748 = vmatpush1.bf16.msra.mxu0 %v2979_v12  ;;  %1912 = vmatpush1.bf16.msra.mxu1 %v2982_v13 }
  0xb8   :  { %1749 = vmatprep.subr.bf16.mxu0 %v2987_v14  ;;  %1913 = vmatprep.subr.bf16.mxu1 %v2990_v16 }
  0xbb   :  { %1750 = vmatpush1.bf16.msra.mxu0 %v2985_v17  ;;  %1914 = vmatpush1.bf16.msra.mxu1 %v2988_v18 }
  0xbc   :  { %1751 = vmatprep.subr.bf16.mxu0 %v2993_v19  ;;  %1915 = vmatprep.subr.bf16.mxu1 %v2996_v22 }
  0xbf   :  { %1752 = vmatpush1.bf16.msra.mxu0 %v2991_v23  ;;  %1916 = vmatpush1.bf16.msra.mxu1 %v2994_v24 }
  0xc0   :  { %1762 = vmatprep.subr.bf16.mxu0 %v3000_v25  ;;  %1926 = vmatprep.subr.bf16.mxu1 %v3003_v26 }
  0xc2   :  { %1754 = vmatmul.mubr.bf16.vlgmr.msra.gmra.mrb[0].mxu0 %v3414_v21  ;;  %1918 = vmatmul.mubr.bf16.vlgmr.msra.gmra.mrb[0].mxu1 %v3414_v21 }
  0xc3   :  { %1763 = vmatpush1.bf16.msra.mxu0 %v2998_v27  ;;  %1927 = vmatpush1.bf16.msra.mxu1 %v3001_v15 }
  0xc4   :  { %1764 = vmatprep.subr.bf16.mxu0 %v3006_v28  ;;  %1928 = vmatprep.subr.bf16.mxu1 %v3009_v29 }
  0xc5   :  { %1794 = vmatprep.mubr.bf16.mxu0 %v350_v32  ;;  %1958 = vmatprep.mubr.bf16.mxu1 %v350_v32 }
  0xc7   :  { %1765 = vmatpush1.bf16.msra.mxu0 %v3004_v30  ;;  %1929 = vmatpush1.bf16.msra.mxu1 %v3007_v31 }
  0xc8   :  { %10 = vsyncpa [#allocation3], 0  ;;  %1766 = vmatprep.subr.bf16.mxu0 %v3012_v33  ;;  %1930 = vmatprep.subr.bf16.mxu1 %v3015_v34  ;;  %v3018_v36 = vld [vmem:[%s4108_s1 + $0x664] ss:$16 sps:$4 sm:$0xff]   ;;  %v3021_v37 = vld [vmem:[%s4108_s1 + $0x66c] ss:$16 sps:$4 sm:$0xff]   ;;  %v348_v29 = vcombine.high %v3414_v21, %v3414_v21 }
  0xc9   :  { %v3016_v38 = vld [vmem:[%s4108_s1 + $0x660] ss:$16 sps:$4 sm:$0xff]   ;;  %v3019_v39 = vld [vmem:[%s4108_s1 + $0x668] ss:$16 sps:$4 sm:$0xff]   ;;  %v3024_v40 = vld [vmem:[%s4108_s1 + $0x684] ss:$16 sps:$4 sm:$0xff]  }
  0xca   :  { %v3027_v41 = vld [vmem:[%s4108_s1 + $0x68c] ss:$16 sps:$4 sm:$0xff]   ;;  %v3022_v43 = vld [vmem:[%s4108_s1 + $0x680] ss:$16 sps:$4 sm:$0xff]   ;;  %v3025_v44 = vld [vmem:[%s4108_s1 + $0x688] ss:$16 sps:$4 sm:$0xff]  }
  0xcb   :  { %1767 = vmatpush1.bf16.msra.mxu0 %v3010_v20  ;;  %1931 = vmatpush1.bf16.msra.mxu1 %v3013_v35  ;;  %v3030_v45 = vld [vmem:[%s4108_s1 + $0x6a4] ss:$16 sps:$4 sm:$0xff]   ;;  %v3033_v46 = vld [vmem:[%s4108_s1 + $0x6ac] ss:$16 sps:$4 sm:$0xff]   ;;  %v3028_v47 = vld [vmem:[%s4108_s1 + $0x6a0] ss:$16 sps:$4 sm:$0xff]  }
  0xcc   :  { %1768 = vmatprep.subr.bf16.mxu0 %v3018_v36  ;;  %1932 = vmatprep.subr.bf16.mxu1 %v3021_v37  ;;  %v3031_v48 = vld [vmem:[%s4108_s1 + $0x6a8] ss:$16 sps:$4 sm:$0xff]   ;;  %v3036_v49 = vld [vmem:[%s4108_s1 + $0x6c4] ss:$16 sps:$4 sm:$0xff]   ;;  %v3039_v50 = vld [vmem:[%s4108_s1 + $0x6cc] ss:$16 sps:$4 sm:$0xff]  }
  0xcd   :  { %v3034_v51 = vld [vmem:[%s4108_s1 + $0x6c0] ss:$16 sps:$4 sm:$0xff]   ;;  %v3037_v52 = vld [vmem:[%s4108_s1 + $0x6c8] ss:$16 sps:$4 sm:$0xff]   ;;  %v3042_v53 = vld [vmem:[%s4108_s1 + $0x6e4] ss:$16 sps:$4 sm:$0xff]  }
  0xce   :  { %v3045_v54 = vld [vmem:[%s4108_s1 + $0x6ec] ss:$16 sps:$4 sm:$0xff]   ;;  %v3040_v55 = vld [vmem:[%s4108_s1 + $0x6e0] ss:$16 sps:$4 sm:$0xff]   ;;  %v3043_v56 = vld [vmem:[%s4108_s1 + $0x6e8] ss:$16 sps:$4 sm:$0xff]  }
  0xcf   :  { %1769 = vmatpush1.bf16.msra.mxu0 %v3016_v38  ;;  %1933 = vmatpush1.bf16.msra.mxu1 %v3019_v39  ;;  %v3048_v57 = vld [vmem:[%s4108_s1 + $0x704] ss:$16 sps:$4 sm:$0xff]   ;;  %v3051_v58 = vld [vmem:[%s4108_s1 + $0x70c] ss:$16 sps:$4 sm:$0xff]   ;;  %v3046_v59 = vld [vmem:[%s4108_s1 + $0x700] ss:$16 sps:$4 sm:$0xff]  }
  0xd0   :  { %1770 = vmatprep.subr.bf16.mxu0 %v3024_v40  ;;  %1934 = vmatprep.subr.bf16.mxu1 %v3027_v41  ;;  %v3049_v60 = vld [vmem:[%s4108_s1 + $0x708] ss:$16 sps:$4 sm:$0xff]   ;;  %v3054_v61 = vld [vmem:[%s4108_s1 + $0x724] ss:$16 sps:$4 sm:$0xff]   ;;  %v3057_v62 = vld [vmem:[%s4108_s1 + $0x72c] ss:$16 sps:$4 sm:$0xff]  }
  0xd1   :  { %v3052_v63 = vld [vmem:[%s4108_s1 + $0x720] ss:$16 sps:$4 sm:$0xff]   ;;  %v3055_v0 = vld [vmem:[%s4108_s1 + $0x728] ss:$16 sps:$4 sm:$0xff]   ;;  %v3060_v1 = vld [vmem:[%s4108_s1 + $0x744] ss:$16 sps:$4 sm:$0xff]  }
  0xd2   :  { %v3063_v2 = vld [vmem:[%s4108_s1 + $0x74c] ss:$16 sps:$4 sm:$0xff]   ;;  %v3058_v3 = vld [vmem:[%s4108_s1 + $0x740] ss:$16 sps:$4 sm:$0xff]   ;;  %v3061_v4 = vld [vmem:[%s4108_s1 + $0x748] ss:$16 sps:$4 sm:$0xff]  }
  0xd3   :  { %1771 = vmatpush1.bf16.msra.mxu0 %v3022_v43  ;;  %1935 = vmatpush1.bf16.msra.mxu1 %v3025_v44  ;;  %v3066_v5 = vld [vmem:[%s4108_s1 + $0x764] ss:$16 sps:$4 sm:$0xff]   ;;  %v3069_v6 = vld [vmem:[%s4108_s1 + $0x76c] ss:$16 sps:$4 sm:$0xff]   ;;  %v3064_v7 = vld [vmem:[%s4108_s1 + $0x760] ss:$16 sps:$4 sm:$0xff]  }
  0xd4   :  { %1772 = vmatprep.subr.bf16.mxu0 %v3030_v45  ;;  %1936 = vmatprep.subr.bf16.mxu1 %v3033_v46  ;;  %v3067_v8 = vld [vmem:[%s4108_s1 + $0x768] ss:$16 sps:$4 sm:$0xff]   ;;  %v3072_v9 = vld [vmem:[%s4108_s1 + $0x784] ss:$16 sps:$4 sm:$0xff]   ;;  %v3075_v10 = vld [vmem:[%s4108_s1 + $0x78c] ss:$16 sps:$4 sm:$0xff]  }
  0xd5   :  { %v3070_v11 = vld [vmem:[%s4108_s1 + $0x780] ss:$16 sps:$4 sm:$0xff]   ;;  %v3073_v12 = vld [vmem:[%s4108_s1 + $0x788] ss:$16 sps:$4 sm:$0xff]   ;;  %v3078_v13 = vld [vmem:[%s4108_s1 + $0x7a4] ss:$16 sps:$4 sm:$0xff]  }
  0xd6   :  { %v3081_v14 = vld [vmem:[%s4108_s1 + $0x7ac] ss:$16 sps:$4 sm:$0xff]   ;;  %v3076_v16 = vld [vmem:[%s4108_s1 + $0x7a0] ss:$16 sps:$4 sm:$0xff]   ;;  %v3079_v17 = vld [vmem:[%s4108_s1 + $0x7a8] ss:$16 sps:$4 sm:$0xff]  }
  0xd7   :  { %1773 = vmatpush1.bf16.msra.mxu0 %v3028_v47  ;;  %1937 = vmatpush1.bf16.msra.mxu1 %v3031_v48  ;;  %v3084_v18 = vld [vmem:[%s4108_s1 + $0x7c4] ss:$16 sps:$4 sm:$0xff]   ;;  %v3087_v19 = vld [vmem:[%s4108_s1 + $0x7cc] ss:$16 sps:$4 sm:$0xff]   ;;  %v3082_v22 = vld [vmem:[%s4108_s1 + $0x7c0] ss:$16 sps:$4 sm:$0xff]  }
  0xd8   :  { %1774 = vmatprep.subr.bf16.mxu0 %v3036_v49  ;;  %1938 = vmatprep.subr.bf16.mxu1 %v3039_v50  ;;  %v3085_v23 = vld [vmem:[%s4108_s1 + $0x7c8] ss:$16 sps:$4 sm:$0xff]   ;;  %v3090_v24 = vld [vmem:[%s4108_s1 + $0x7e4] ss:$16 sps:$4 sm:$0xff]   ;;  %v3093_v25 = vld [vmem:[%s4108_s1 + $0x7ec] ss:$16 sps:$4 sm:$0xff]  }
  0xd9   :  { %v3088_v26 = vld [vmem:[%s4108_s1 + $0x7e0] ss:$16 sps:$4 sm:$0xff]   ;;  %v3091_v27 = vld [vmem:[%s4108_s1 + $0x7e8] ss:$16 sps:$4 sm:$0xff]   ;;  %vm2318_vm0 = vcmask 74752  }
  0xda   :  { %v3094_v15 = vld [vmem:[%s4110_s3 + $0x40] sm:$0xff]   ;;  %v3098_v32 = vld [vmem:[%s4110_s3 + $0x48] sm:$0xff]   ;;  %v3102_v20 = vld [vmem:[%s4110_s3 + $0x50] sm:$0xff]  }
  0xdb   :  { %1775 = vmatpush1.bf16.msra.mxu0 %v3034_v51  ;;  %1939 = vmatpush1.bf16.msra.mxu1 %v3037_v52  ;;  %v3095_v28 = vld [vmem:[%s4110_s3 + $0xc0] sm:$0xff]   ;;  %v3099_v21 = vld [vmem:[%s4110_s3 + $0xc8] sm:$0xff]   ;;  %v3103_v35 = vld [vmem:[%s4110_s3 + $0xd0] sm:$0xff]  }
  0xdc   :  { %1776 = vmatprep.subr.bf16.mxu0 %v3042_v53  ;;  %1940 = vmatprep.subr.bf16.mxu1 %v3045_v54  ;;  %v3096_v30 = vld [vmem:[%s4110_s3] sm:$0xff]   ;;  %v3100_v33 = vld [vmem:[%s4110_s3 + $0x8] sm:$0xff]   ;;  %v3104_v36 = vld [vmem:[%s4110_s3 + $0x10] sm:$0xff]  }
  0xdd   :  { %v3097_v31 = vld [vmem:[%s4110_s3 + $0x80] sm:$0xff]   ;;  %v3101_v34 = vld [vmem:[%s4110_s3 + $0x88] sm:$0xff]   ;;  %v3105_v37 = vld [vmem:[%s4110_s3 + $0x90] sm:$0xff]  }
  0xde   :  { %v3106_v38 = vld [vmem:[%s4110_s3 + $0x58] sm:$0xff]   ;;  %v3110_v43 = vld [vmem:[%s4110_s3 + $0x60] sm:$0xff]   ;;  %v3114_v47 = vld [vmem:[%s4110_s3 + $0x68] sm:$0xff]  }
  0xdf   :  { %1777 = vmatpush1.bf16.msra.mxu0 %v3040_v55  ;;  %1941 = vmatpush1.bf16.msra.mxu1 %v3043_v56  ;;  %v3107_v39 = vld [vmem:[%s4110_s3 + $0xd8] sm:$0xff]   ;;  %v3111_v44 = vld [vmem:[%s4110_s3 + $0xe0] sm:$0xff]   ;;  %v3115_v48 = vld [vmem:[%s4110_s3 + $0xe8] sm:$0xff]  }
  0xe0   :  { %1778 = vmatprep.subr.bf16.mxu0 %v3048_v57  ;;  %1942 = vmatprep.subr.bf16.mxu1 %v3051_v58  ;;  %v3108_v40 = vld [vmem:[%s4110_s3 + $0x18] sm:$0xff]   ;;  %v3112_v45 = vld [vmem:[%s4110_s3 + $0x20] sm:$0xff]   ;;  %v3116_v49 = vld [vmem:[%s4110_s3 + $0x28] sm:$0xff]  }
  0xe1   :  { %v3109_v41 = vld [vmem:[%s4110_s3 + $0x98] sm:$0xff]   ;;  %v3113_v46 = vld [vmem:[%s4110_s3 + $0xa0] sm:$0xff]   ;;  %v3117_v50 = vld [vmem:[%s4110_s3 + $0xa8] sm:$0xff]  }
  0xe2   :  { %v3118_v51 = vld [vmem:[%s4110_s3 + $0x70] sm:$0xff]   ;;  %v3122_v55 = vld [vmem:[%s4110_s3 + $0x78] sm:$0xff]  }
  0xe3   :  { %1779 = vmatpush1.bf16.msra.mxu0 %v3046_v59  ;;  %1943 = vmatpush1.bf16.msra.mxu1 %v3049_v60  ;;  %v3119_v52 = vld [vmem:[%s4110_s3 + $0xf0] sm:$0xff]   ;;  %v3123_v56 = vld [vmem:[%s4110_s3 + $0xf8] sm:$0xff]   ;;  %v283_v59 = vsub.s32 0, %v3303_v42  ;;  %v291_v60 = vsub.s32 2, %v3303_v42 }
  0xe4   :  { %1780 = vmatprep.subr.bf16.mxu0 %v3054_v61  ;;  %1944 = vmatprep.subr.bf16.mxu1 %v3057_v62  ;;  %v3120_v53 = vld [vmem:[%s4110_s3 + $0x30] sm:$0xff]   ;;  %v3124_v57 = vld [vmem:[%s4110_s3 + $0x38] sm:$0xff]   ;;  %v279_v61 = vld [vmem:[%s4109_s2] sm:$0xf]  ;;  %v287_v62 = vsub.s32 1, %v3303_v42 }
  0xe5   :  { %v3121_v54 = vld [vmem:[%s4110_s3 + $0xb0] sm:$0xff]   ;;  %v3125_v58 = vld [vmem:[%s4110_s3 + $0xb8] sm:$0xff]  }
  0xe7   :  { %1781 = vmatpush1.bf16.msra.mxu0 %v3052_v63  ;;  %1945 = vmatpush1.bf16.msra.mxu1 %v3055_v0  ;;  %v295_v63 = vsub.s32 3, %v3303_v42  ;;  %v284_v0 = vrot.slane %v279_v61, %v283_v59 }
  0xe8   :  { %1782 = vmatprep.subr.bf16.mxu0 %v3060_v1  ;;  %1946 = vmatprep.subr.bf16.mxu1 %v3063_v2  ;;  %v292_v1 = vrot.slane %v279_v61, %v291_v60  ;;  %v288_v2 = vrot.slane %v279_v61, %v287_v62 }
  0xeb   :  { %1783 = vmatpush1.bf16.msra.mxu0 %v3058_v3  ;;  %1947 = vmatpush1.bf16.msra.mxu1 %v3061_v4  ;;  %v296_v3 = vrot.slane %v279_v61, %v295_v63 }
  0xec   :  { %1784 = vmatprep.subr.bf16.mxu0 %v3066_v5  ;;  %1948 = vmatprep.subr.bf16.mxu1 %v3069_v6 }
  0xef   :  { %1785 = vmatpush1.bf16.msra.mxu0 %v3064_v7  ;;  %1949 = vmatpush1.bf16.msra.mxu1 %v3067_v8 }
  0xf0   :  { %1786 = vmatprep.subr.bf16.mxu0 %v3072_v9  ;;  %1950 = vmatprep.subr.bf16.mxu1 %v3075_v10 }
  0xf3   :  { %1787 = vmatpush1.bf16.msra.mxu0 %v3070_v11  ;;  %1951 = vmatpush1.bf16.msra.mxu1 %v3073_v12 }
  0xf4   :  { %1788 = vmatprep.subr.bf16.mxu0 %v3078_v13  ;;  %1952 = vmatprep.subr.bf16.mxu1 %v3081_v14 }
  0xf7   :  { %1789 = vmatpush1.bf16.msra.mxu0 %v3076_v16  ;;  %1953 = vmatpush1.bf16.msra.mxu1 %v3079_v17 }
  0xf8   :  { %1790 = vmatprep.subr.bf16.mxu0 %v3084_v18  ;;  %1954 = vmatprep.subr.bf16.mxu1 %v3087_v19 }
  0xfb   :  { %1791 = vmatpush1.bf16.msra.mxu0 %v3082_v22  ;;  %1955 = vmatpush1.bf16.msra.mxu1 %v3085_v23 }
  0xfc   :  { %1792 = vmatprep.subr.bf16.mxu0 %v3090_v24  ;;  %1956 = vmatprep.subr.bf16.mxu1 %v3093_v25 }
  0xff   :  { %1793 = vmatpush1.bf16.msra.mxu0 %v3088_v26  ;;  %1957 = vmatpush1.bf16.msra.mxu1 %v3091_v27 }
 0x100   :  { %2635 = vmatprep.subr.bf16.mxu0 %v3094_v15  ;;  %2657 = vmatprep.subr.bf16.mxu1 %v3095_v28  ;;  %v2602_v15 = vld [vmem:[%s4111_s4] ss:$0 sm:$0xff]  ;;  %s3155_s4 = smov [#allocation2]  }
 0x101   :  { %s2338_s26 = sshll.u32 %s3155_s4, 4  ;;  %s2339_s26 = int_to_ptr.vmem [resolvable:$true] %s2338_s26 }
 0x102   :  { %1795 = vmatmul.mubr.bf16.vlgmr.msra.gmra.mrb[0].mxu0 %v348_v29  ;;  %1959 = vmatmul.mubr.bf16.vlgmr.msra.gmra.mrb[0].mxu1 %v348_v29  ;;  %s3130_s27 = scalar_lea.vmem %s2339_s26, 32  ;;  %p3135_p1 = scmp.lt.s32.totalorder %s2339_s26, %s2339_s26 }
 0x103   :  { %2636 = vmatpush3.bf16.msra.mxu0 %v3096_v30  ;;  %2658 = vmatpush3.bf16.msra.mxu1 %v3097_v31  ;;  %p3131_p0 = scmp.ne.s32.totalorder %s2339_s26, %s3130_s27  ;;  %p3136_p2 = scmp.lt.s32.totalorder %s3130_s27, %s3130_s27 }
 0x104   :  { %2637 = vmatprep.subr.bf16.mxu0 %v3098_v32  ;;  %2659 = vmatprep.subr.bf16.mxu1 %v3099_v21 }
 0x105   :  { %p3137_p3 = por %p3136_p2, %p3135_p1 }
 0x107   :  { %2638 = vmatpush3.bf16.msra.mxu0 %v3100_v33  ;;  %2660 = vmatpush3.bf16.msra.mxu1 %v3101_v34  ;;  %p3138_p4 = pnand %p3137_p3, %p3131_p0 }
 0x108   :  { %2639 = vmatprep.subr.bf16.mxu0 %v3102_v20  ;;  %2661 = vmatprep.subr.bf16.mxu1 %v3103_v35 }
 0x10b   :  { %2640 = vmatpush3.bf16.msra.mxu0 %v3104_v36  ;;  %2662 = vmatpush3.bf16.msra.mxu1 %v3105_v37 }
 0x10c   :  { %2641 = vmatprep.subr.bf16.mxu0 %v3106_v38  ;;  %2663 = vmatprep.subr.bf16.mxu1 %v3107_v39 }
 0x10f   :  { %2642 = vmatpush3.bf16.msra.mxu0 %v3108_v40  ;;  %2664 = vmatpush3.bf16.msra.mxu1 %v3109_v41 }
 0x110   :  { %2643 = vmatprep.subr.bf16.mxu0 %v3110_v43  ;;  %2665 = vmatprep.subr.bf16.mxu1 %v3111_v44 }
 0x113   :  { %2644 = vmatpush3.bf16.msra.mxu0 %v3112_v45  ;;  %2666 = vmatpush3.bf16.msra.mxu1 %v3113_v46 }
 0x114   :  { %2645 = vmatprep.subr.bf16.mxu0 %v3114_v47  ;;  %2667 = vmatprep.subr.bf16.mxu1 %v3115_v48 }
 0x117   :  { %2646 = vmatpush3.bf16.msra.mxu0 %v3116_v49  ;;  %2668 = vmatpush3.bf16.msra.mxu1 %v3117_v50 }
 0x118   :  { %2647 = vmatprep.subr.bf16.mxu0 %v3118_v51  ;;  %2669 = vmatprep.subr.bf16.mxu1 %v3119_v52 }
 0x11b   :  { %2648 = vmatpush3.bf16.msra.mxu0 %v3120_v53  ;;  %2670 = vmatpush3.bf16.msra.mxu1 %v3121_v54 }
 0x11c   :  { %2649 = vmatprep.subr.bf16.mxu0 %v3122_v55  ;;  %2671 = vmatprep.subr.bf16.mxu1 %v3123_v56 }
 0x11f   :  { %2650 = vmatpush3.bf16.msra.mxu0 %v3124_v57  ;;  %2672 = vmatpush3.bf16.msra.mxu1 %v3125_v58 }
 0x1d5   :  { %v1796_v4 = vpop.f32.mrb[0].mxu0  ;;  %v1960_v5 = vpop.f32.mrb[0].mxu1 }
 0x1d6   :  { %v2679_v6 = vadd.f32 %v1796_v4, %v284_v0  ;;  %v2681_v7 = vadd.f32 %v1960_v5, %v292_v1  ;;  %v1798_v8 = vpop.f32.mrb[1].mxu0  ;;  %v1962_v9 = vpop.f32.mrb[1].mxu1 }
 0x1d7   :  { %v2680_v10 = vadd.f32 %v1798_v8, %v288_v2  ;;  %v2682_v11 = vadd.f32 %v1962_v9, %v296_v3  ;;  %v1800_v12 = vpop.f32.mrb[2].mxu0  ;;  %v1964_v13 = vpop.f32.mrb[2].mxu1 }
 0x1d8   :  { %v1967_v14 = vmax.f32 %v2679_v6, 0.0  ;;  %v1969_v16 = vmax.f32 %v2681_v7, 0.0  ;;  %v1801_v17 = vpop.f32.mrb[3].mxu0  ;;  %v1965_v18 = vpop.f32.mrb[3].mxu1 }
 0x1d9   :  { %v1968_v19 = vmax.f32 %v2680_v10, 0.0  ;;  %v1970_v42 = vmax.f32 %v2682_v11, 0.0 }
 0x1da   :  { %v1971_v24 = vpack.c.bf16 %v1967_v14, %v1967_v14  ;;  %v1973_v25 = vpack.c.bf16 %v1969_v16, %v1969_v16 }
 0x1db   :  { %v1972_v22 = vpack.c.bf16 %v1968_v19, %v1968_v19  ;;  %v1974_v23 = vpack.c.bf16 %v1970_v42, %v1970_v42 }
 0x1dd   :  { %2270 = vmatprep.mubr.bf16.mxu0 %v1972_v22  ;;  %2310 = vmatprep.mubr.bf16.mxu1 %v1974_v23 }
 0x1de   :  { %2271 = vmatmul.mubr.bf16.vlgmr.msra.gmra.mrb[4].mxu0 %v1971_v24  ;;  %2311 = vmatmul.mubr.bf16.vlgmr.msra.gmra.mrb[4].mxu1 %v1973_v25 }
 0x2b1   :  { %v2651_v26 = vpop.f32.mrb[4].mxu0  ;;  %v2673_v27 = vpop.f32.mrb[4].mxu1 }
 0x2b2   :  { %v2652_v28 = vpop.f32.mrb[5].mxu0  ;;  %v2674_v29 = vpop.f32.mrb[5].mxu1 }
 0x2b3   :  { %v2653_v30 = vadd.f32 %v2652_v28, %v2651_v26  ;;  %v2675_v31 = vadd.f32 %v2674_v29, %v2673_v27  ;;  %v2654_v32 = vpop.f32.mrb[6].mxu0  ;;  %v2676_v21 = vpop.f32.mrb[6].mxu1 }
 0x2b4   :  { %v2655_v33 = vpop.f32.mrb[7].mxu0  ;;  %v2677_v34 = vpop.f32.mrb[7].mxu1 }
 0x2b5   :  { %v2273_v20 = vadd.f32 %v2653_v30, %v2602_v15 }
 0x2b7   :  { %v2313_v35 = vadd.f32 %v2675_v31, %v2273_v20 }
 0x2b9   :  { %v2319_v36 = vsel %vm2318_vm0, %v2313_v35, -inf }
 0x2ba   :  { %2320 = vmax.xlane.f32.xlu0 %v2319_v36 }
 0x347   :  { %v2321_v37 = vpop.xlane.xlu0 %2320 }
 0x348   :  { %v2322_v38 = vsub.f32 %v2313_v35, %v2321_v37 }
 0x34a   :  { %v2323_v39 = vmul.f32 1.442695, %v2322_v38 }
 0x34c   :  { %3126 = vpow2.f32 %v2323_v39 }
 0x356   :  { %v3127_v40 = vpop.eup %3126 }
 0x357   :  { %v2325_v41 = vsel %vm2318_vm0, %v3127_v40, 0.0 }
 0x358   :  { %2326 = vadd.xlane.f32.xlu0 %v2325_v41 }
 0x3e5   :  { %v2327_v43 = vpop.xlane.xlu0 %2326 }
 0x3e6   :  { %3128 = vlog2.f32 %v2327_v43 }
 0x3f0   :  { %v3129_v44 = vpop.eup %3128 }
 0x3f1   :  { %v2329_v45 = vmul.f32 0.6931472, %v3129_v44 }
 0x3f3   :  { %v2330_v46 = vsub.f32 %v2322_v38, %v2329_v45 }
 0x3f5   :  { %2331 = vst.msk [vmem:[#allocation2] sm:$0x3] %vm2318_vm0, %v2330_v46 }
 0x3f6   :  { %3141 = shalt.err (!%p3138_p4)
}
 0x3f7   :  { %s3142_s30 = scalar_lea.hbm %s4112_s5, 32 }
 0x3f8   :  { %p3143_p5 = scmp.ne.s32.totalorder %s4112_s5, %s3142_s30  ;;  %p3146_p6 = scmp.lt.u32.totalorder %s3142_s30, %s4112_s5 }
 0x3fa   :  { %p3148_p7 = pnand %p3146_p6, %p3143_p5 }
 0x3fc   :  { %3151 = shalt.err (!%p3148_p7)
}
 0x3fd   :  { %2341 = dma.vmem_to_hbm [thread:$0]  %s2339_s26, 32, %s4112_s5, [#allocation3]  }
 0x3fe   :  { %3152 = dma.done.wait [#allocation3], 32  }
 0x3ff   :  { %3153 = vsyncadd [#allocation3], 4294967264 }
 0x400   :  { %2345 = vsyncpa [#allocation3], 1 }

// kernel: cnn_mnist_forward.3
= control target key start
LH: loop header
LB: loop body
LE: loop exit
PB: predicated region body
PF: predicated region fallthrough
CT: control target
= control target key end

     0   :  { %vm751_vm0 = vcmask 1043456   ;;  %vm752_vm1 = vcmask 1044480   ;;  %vm534_vm2 = vcmask 203776   ;;  %v2404_v1 = vmov 65535   ;;  %s3474_s1 = inlined_call_operand.vmem [shape: bf16[25,32], index: 1, kind: input, shape index: {}]   ;;  %s3475_s0 = inlined_call_operand.vmem [shape: bf16[4,288,25], index: 0, kind: input, shape index: {}]   ;;  %s3476_s2 = inlined_call_operand.vmem [shape: f32[1,32], index: 2, kind: input, shape index: {}]   ;;  %s3477_s3 = inlined_call_operand.vmem [shape: bf16[288,32], index: 3, kind: output, shape index: {}]  }
   0x1   :  { %v2330_v0 = vld [vmem:[%s3474_s1] sm:$0xff]   ;;  %v753_v2 = vsel %vm751_vm0, 4294967295, %v2404_v1  ;;  %v2331_v3 = vld [vmem:[%s3474_s1 + $0x8] sm:$0x1f]   ;;  %v2336_v10 = vld [vmem:[%s3475_s0 + $0x10] sm:$0xff]   ;;  %vm1367_vm3 = vcmask 261120  }
   0x2   :  { %2177 = vmatprep.subr.bf16.mxu0 %v2330_v0  ;;  %2325 = vmatprep.subr.bf16.mxu1 %v2330_v0  ;;  %v754_v4 = vsel %vm752_vm1, %v753_v2, 0  ;;  %v2332_v5 = vld [vmem:[%s3475_s0] sm:$0xff]   ;;  %v2333_v8 = vld [vmem:[%s3475_s0 + $0x8] sm:$0xff]   ;;  %v2338_v11 = vld [vmem:[%s3475_s0 + $0x130] sm:$0xff]   ;;  %vm1843_vm4 = vcmask 257024  }
   0x3   :  { %2178 = vmatpush3.bf16.msra.mxu0 %v2330_v0  ;;  %2327 = vmatpush3.bf16.msra.mxu1 %v2330_v0  ;;  %v756_v6 = vand.u32 %v2331_v3, %v754_v4  ;;  %v2334_v7 = vld [vmem:[%s3475_s0 + $0x120] sm:$0xff]   ;;  %v2335_v9 = vld [vmem:[%s3475_s0 + $0x128] sm:$0xff]   ;;  %v2337_v12 = vld [vmem:[%s3475_s0 + $0x18] sm:$0xff]  }
   0x4   :  { %2181 = vmatprep.mubr.msk.bf16.mxu0 %vm534_vm2, %v2332_v5  ;;  %2253 = vmatprep.mubr.msk.bf16.mxu1 %vm534_vm2, %v2334_v7  ;;  %v2339_v13 = vld [vmem:[%s3475_s0 + $0x138] sm:$0xff]   ;;  %v2340_v14 = vld [vmem:[%s3475_s0 + $0x20] sm:$0xff]   ;;  %v2341_v16 = vld [vmem:[%s3475_s0 + $0x28] sm:$0xff]  }
   0x5   :  { %2179 = vmatprep.subr.bf16.mxu0 %v756_v6  ;;  %2326 = vmatprep.subr.bf16.mxu1 %v756_v6  ;;  %v2342_v15 = vld [vmem:[%s3475_s0 + $0x140] sm:$0xff]   ;;  %v2343_v17 = vld [vmem:[%s3475_s0 + $0x148] sm:$0xff]   ;;  %v2344_v18 = vld [vmem:[%s3475_s0 + $0x30] sm:$0xff]  }
   0x6   :  { %v2346_v19 = vld [vmem:[%s3475_s0 + $0x150] sm:$0xff]   ;;  %v2345_v20 = vld [vmem:[%s3475_s0 + $0x38] sm:$0xff]   ;;  %v2348_v22 = vld [vmem:[%s3475_s0 + $0x40] sm:$0xff]  }
   0x7   :  { %2180 = vmatpush3.bf16.msra.mxu0 %v756_v6  ;;  %2328 = vmatpush3.bf16.msra.mxu1 %v756_v6  ;;  %v2347_v21 = vld [vmem:[%s3475_s0 + $0x158] sm:$0xff]   ;;  %v2350_v23 = vld [vmem:[%s3475_s0 + $0x160] sm:$0xff]   ;;  %v2349_v24 = vld [vmem:[%s3475_s0 + $0x48] sm:$0xff]  }
   0x8   :  { %v2351_v25 = vld [vmem:[%s3475_s0 + $0x168] sm:$0xff]   ;;  %v2352_v26 = vld [vmem:[%s3475_s0 + $0x50] sm:$0xff]   ;;  %v2353_v28 = vld [vmem:[%s3475_s0 + $0x58] sm:$0xff]  }
   0x9   :  { %v2354_v27 = vld [vmem:[%s3475_s0 + $0x170] sm:$0xff]   ;;  %v2355_v29 = vld [vmem:[%s3475_s0 + $0x178] sm:$0xff]   ;;  %v2356_v30 = vld [vmem:[%s3475_s0 + $0x60] sm:$0xff]  }
   0xa   :  { %2182 = vmatmul.mubr.msk.bf16.vlgmr.msra.gmra.mrb[0].mxu0 %vm534_vm2, %v2333_v8  ;;  %2254 = vmatmul.mubr.msk.bf16.vlgmr.msra.gmra.mrb[0].mxu1 %vm534_vm2, %v2335_v9  ;;  %v2358_v31 = vld [vmem:[%s3475_s0 + $0x180] sm:$0xff]   ;;  %v2357_v32 = vld [vmem:[%s3475_s0 + $0x68] sm:$0xff]   ;;  %v2360_v34 = vld [vmem:[%s3475_s0 + $0x70] sm:$0xff]  }
   0xb   :  { %2185 = vmatprep.mubr.msk.bf16.mxu0 %vm534_vm2, %v2336_v10  ;;  %2257 = vmatprep.mubr.msk.bf16.mxu1 %vm534_vm2, %v2338_v11  ;;  %v2359_v33 = vld [vmem:[%s3475_s0 + $0x188] sm:$0xff]   ;;  %v2362_v35 = vld [vmem:[%s3475_s0 + $0x190] sm:$0xff]   ;;  %v2361_v36 = vld [vmem:[%s3475_s0 + $0x78] sm:$0xff]  }
   0xc   :  { %v2363_v37 = vld [vmem:[%s3475_s0 + $0x198] sm:$0xff]   ;;  %v2364_v38 = vld [vmem:[%s3475_s0 + $0x80] sm:$0xff]   ;;  %v2365_v40 = vld [vmem:[%s3475_s0 + $0x88] sm:$0xff]  }
   0xd   :  { %v2366_v39 = vld [vmem:[%s3475_s0 + $0x1a0] sm:$0xff]   ;;  %v2367_v41 = vld [vmem:[%s3475_s0 + $0x1a8] sm:$0xff]   ;;  %v2368_v42 = vld [vmem:[%s3475_s0 + $0x90] sm:$0xff]  }
   0xe   :  { %v2370_v43 = vld [vmem:[%s3475_s0 + $0x1b0] sm:$0xff]   ;;  %v2369_v44 = vld [vmem:[%s3475_s0 + $0x98] sm:$0xff]   ;;  %v2372_v46 = vld [vmem:[%s3475_s0 + $0xa0] sm:$0xff]  }
   0xf   :  { %v2371_v45 = vld [vmem:[%s3475_s0 + $0x1b8] sm:$0xff]   ;;  %v2374_v47 = vld [vmem:[%s3475_s0 + $0x1c0] sm:$0xff]   ;;  %v2373_v48 = vld [vmem:[%s3475_s0 + $0xa8] sm:$0xff]  }
  0x10   :  { %v2375_v49 = vld [vmem:[%s3475_s0 + $0x1c8] sm:$0xff]   ;;  %v2376_v50 = vld [vmem:[%s3475_s0 + $0xb0] sm:$0xff]   ;;  %v2377_v52 = vld [vmem:[%s3475_s0 + $0xb8] sm:$0xff]  }
  0x11   :  { %v2378_v51 = vld [vmem:[%s3475_s0 + $0x1d0] sm:$0xff]   ;;  %v2379_v53 = vld [vmem:[%s3475_s0 + $0x1d8] sm:$0xff]   ;;  %v2380_v54 = vld [vmem:[%s3475_s0 + $0xc0] sm:$0xff]  }
  0x12   :  { %2186 = vmatmul.mubr.msk.bf16.gmra.mrb[4].mxu0 %vm534_vm2, %v2337_v12  ;;  %2258 = vmatmul.mubr.msk.bf16.gmra.mrb[4].mxu1 %vm534_vm2, %v2339_v13  ;;  %v2382_v55 = vld [vmem:[%s3475_s0 + $0x1e0] sm:$0xff]   ;;  %v2381_v56 = vld [vmem:[%s3475_s0 + $0xc8] sm:$0xff]   ;;  %v2384_v58 = vld [vmem:[%s3475_s0 + $0xd0] sm:$0xff]  }
  0x13   :  { %2189 = vmatprep.mubr.msk.bf16.mxu0 %vm534_vm2, %v2340_v14  ;;  %2261 = vmatprep.mubr.msk.bf16.mxu1 %vm534_vm2, %v2342_v15  ;;  %v2383_v57 = vld [vmem:[%s3475_s0 + $0x1e8] sm:$0xff]   ;;  %v2386_v59 = vld [vmem:[%s3475_s0 + $0x1f0] sm:$0xff]   ;;  %v2385_v60 = vld [vmem:[%s3475_s0 + $0xd8] sm:$0xff]  }
  0x14   :  { %v2387_v61 = vld [vmem:[%s3475_s0 + $0x1f8] sm:$0xff]   ;;  %v2388_v62 = vld [vmem:[%s3475_s0 + $0xe0] sm:$0xff]   ;;  %v2389_v0 = vld [vmem:[%s3475_s0 + $0xe8] sm:$0xff]  }
  0x15   :  { %v2390_v63 = vld [vmem:[%s3475_s0 + $0x200] sm:$0xff]   ;;  %v2391_v1 = vld [vmem:[%s3475_s0 + $0x208] sm:$0xff]   ;;  %v2392_v2 = vld [vmem:[%s3475_s0 + $0xf0] sm:$0xff]  }
  0x16   :  { %v2394_v3 = vld [vmem:[%s3475_s0 + $0x210] sm:$0xff]   ;;  %v2393_v4 = vld [vmem:[%s3475_s0 + $0xf8] sm:$0xff]   ;;  %v2396_v6 = vld [vmem:[%s3475_s0 + $0x100] sm:$0xff]  }
  0x17   :  { %v2395_v5 = vld [vmem:[%s3475_s0 + $0x218] sm:$0xff]   ;;  %v2398_v7 = vld [vmem:[%s3475_s0 + $0x220] sm:$0xff]   ;;  %v2397_v8 = vld [vmem:[%s3475_s0 + $0x108] sm:$0xff]  }
  0x18   :  { %v2399_v9 = vld [vmem:[%s3475_s0 + $0x228] sm:$0xff]   ;;  %v2400_v10 = vld [vmem:[%s3475_s0 + $0x110] sm:$0xff]   ;;  %v2401_v12 = vld [vmem:[%s3475_s0 + $0x118] sm:$0xff]  }
  0x19   :  { %v2402_v11 = vld [vmem:[%s3475_s0 + $0x230] sm:$0xff]   ;;  %v2403_v13 = vld [vmem:[%s3475_s0 + $0x238] sm:$0xff]  }
  0x1a   :  { %2190 = vmatmul.mubr.msk.bf16.gmra.mrb[8].mxu0 %vm534_vm2, %v2341_v16  ;;  %2262 = vmatmul.mubr.msk.bf16.gmra.mrb[8].mxu1 %vm534_vm2, %v2343_v17 }
  0x1b   :  { %2193 = vmatprep.mubr.msk.bf16.mxu0 %vm534_vm2, %v2344_v18  ;;  %2265 = vmatprep.mubr.msk.bf16.mxu1 %vm534_vm2, %v2346_v19 }
  0x22   :  { %2194 = vmatmul.mubr.msk.bf16.gmra.mrb[12].mxu0 %vm534_vm2, %v2345_v20  ;;  %2266 = vmatmul.mubr.msk.bf16.gmra.mrb[12].mxu1 %vm534_vm2, %v2347_v21 }
  0x23   :  { %2197 = vmatprep.mubr.msk.bf16.mxu0 %vm534_vm2, %v2348_v22  ;;  %2269 = vmatprep.mubr.msk.bf16.mxu1 %vm534_vm2, %v2350_v23 }
  0x2a   :  { %2198 = vmatmul.mubr.msk.bf16.gmra.mrb[16].mxu0 %vm534_vm2, %v2349_v24  ;;  %2270 = vmatmul.mubr.msk.bf16.gmra.mrb[16].mxu1 %vm534_vm2, %v2351_v25 }
  0x2b   :  { %2201 = vmatprep.mubr.msk.bf16.mxu0 %vm534_vm2, %v2352_v26  ;;  %2273 = vmatprep.mubr.msk.bf16.mxu1 %vm534_vm2, %v2354_v27 }
  0x32   :  { %2202 = vmatmul.mubr.msk.bf16.gmra.mrb[20].mxu0 %vm534_vm2, %v2353_v28  ;;  %2274 = vmatmul.mubr.msk.bf16.gmra.mrb[20].mxu1 %vm534_vm2, %v2355_v29 }
  0x33   :  { %2205 = vmatprep.mubr.msk.bf16.mxu0 %vm534_vm2, %v2356_v30  ;;  %2277 = vmatprep.mubr.msk.bf16.mxu1 %vm534_vm2, %v2358_v31 }
  0x3a   :  { %2206 = vmatmul.mubr.msk.bf16.gmra.mrb[24].mxu0 %vm534_vm2, %v2357_v32  ;;  %2278 = vmatmul.mubr.msk.bf16.gmra.mrb[24].mxu1 %vm534_vm2, %v2359_v33 }
  0x3b   :  { %2209 = vmatprep.mubr.msk.bf16.mxu0 %vm534_vm2, %v2360_v34  ;;  %2281 = vmatprep.mubr.msk.bf16.mxu1 %vm534_vm2, %v2362_v35 }
  0x42   :  { %2210 = vmatmul.mubr.msk.bf16.gmra.mrb[28].mxu0 %vm534_vm2, %v2361_v36  ;;  %2282 = vmatmul.mubr.msk.bf16.gmra.mrb[28].mxu1 %vm534_vm2, %v2363_v37 }
  0x43   :  { %2213 = vmatprep.mubr.msk.bf16.mxu0 %vm534_vm2, %v2364_v38  ;;  %2285 = vmatprep.mubr.msk.bf16.mxu1 %vm534_vm2, %v2366_v39 }
  0x4a   :  { %2214 = vmatmul.mubr.msk.bf16.gmra.mrb[32].mxu0 %vm534_vm2, %v2365_v40  ;;  %2286 = vmatmul.mubr.msk.bf16.gmra.mrb[32].mxu1 %vm534_vm2, %v2367_v41 }
  0x4b   :  { %2217 = vmatprep.mubr.msk.bf16.mxu0 %vm534_vm2, %v2368_v42  ;;  %2289 = vmatprep.mubr.msk.bf16.mxu1 %vm534_vm2, %v2370_v43 }
  0x52   :  { %2218 = vmatmul.mubr.msk.bf16.gmra.mrb[36].mxu0 %vm534_vm2, %v2369_v44  ;;  %2290 = vmatmul.mubr.msk.bf16.gmra.mrb[36].mxu1 %vm534_vm2, %v2371_v45 }
  0x53   :  { %2221 = vmatprep.mubr.msk.bf16.mxu0 %vm534_vm2, %v2372_v46  ;;  %2293 = vmatprep.mubr.msk.bf16.mxu1 %vm534_vm2, %v2374_v47 }
  0x5a   :  { %2222 = vmatmul.mubr.msk.bf16.gmra.mrb[40].mxu0 %vm534_vm2, %v2373_v48  ;;  %2294 = vmatmul.mubr.msk.bf16.gmra.mrb[40].mxu1 %vm534_vm2, %v2375_v49 }
  0x5b   :  { %2225 = vmatprep.mubr.msk.bf16.mxu0 %vm534_vm2, %v2376_v50  ;;  %2297 = vmatprep.mubr.msk.bf16.mxu1 %vm534_vm2, %v2378_v51 }
  0x62   :  { %2226 = vmatmul.mubr.msk.bf16.gmra.mrb[44].mxu0 %vm534_vm2, %v2377_v52  ;;  %2298 = vmatmul.mubr.msk.bf16.gmra.mrb[44].mxu1 %vm534_vm2, %v2379_v53 }
  0x63   :  { %2229 = vmatprep.mubr.msk.bf16.mxu0 %vm534_vm2, %v2380_v54  ;;  %2301 = vmatprep.mubr.msk.bf16.mxu1 %vm534_vm2, %v2382_v55 }
  0x6a   :  { %2230 = vmatmul.mubr.msk.bf16.gmra.mrb[48].mxu0 %vm534_vm2, %v2381_v56  ;;  %2302 = vmatmul.mubr.msk.bf16.gmra.mrb[48].mxu1 %vm534_vm2, %v2383_v57 }
  0x6b   :  { %2233 = vmatprep.mubr.msk.bf16.mxu0 %vm534_vm2, %v2384_v58  ;;  %2305 = vmatprep.mubr.msk.bf16.mxu1 %vm534_vm2, %v2386_v59 }
  0x72   :  { %2234 = vmatmul.mubr.msk.bf16.gmra.mrb[52].mxu0 %vm534_vm2, %v2385_v60  ;;  %2306 = vmatmul.mubr.msk.bf16.gmra.mrb[52].mxu1 %vm534_vm2, %v2387_v61 }
  0x73   :  { %2237 = vmatprep.mubr.msk.bf16.mxu0 %vm534_vm2, %v2388_v62  ;;  %2309 = vmatprep.mubr.msk.bf16.mxu1 %vm534_vm2, %v2390_v63 }
  0x7a   :  { %2238 = vmatmul.mubr.msk.bf16.gmra.mrb[56].mxu0 %vm534_vm2, %v2389_v0  ;;  %2310 = vmatmul.mubr.msk.bf16.gmra.mrb[56].mxu1 %vm534_vm2, %v2391_v1 }
  0x7b   :  { %2241 = vmatprep.mubr.msk.bf16.mxu0 %vm534_vm2, %v2392_v2  ;;  %2313 = vmatprep.mubr.msk.bf16.mxu1 %vm534_vm2, %v2394_v3 }
  0x82   :  { %2242 = vmatmul.mubr.msk.bf16.gmra.mrb[60].mxu0 %vm534_vm2, %v2393_v4  ;;  %2314 = vmatmul.mubr.msk.bf16.gmra.mrb[60].mxu1 %vm534_vm2, %v2395_v5 }
  0x83   :  { %2245 = vmatprep.mubr.msk.bf16.mxu0 %vm534_vm2, %v2396_v6  ;;  %2317 = vmatprep.mubr.msk.bf16.mxu1 %vm534_vm2, %v2398_v7 }
  0x8a   :  { %2246 = vmatmul.mubr.msk.bf16.gmra.mrb[64].mxu0 %vm534_vm2, %v2397_v8  ;;  %2318 = vmatmul.mubr.msk.bf16.gmra.mrb[64].mxu1 %vm534_vm2, %v2399_v9 }
  0x8b   :  { %2249 = vmatprep.mubr.msk.bf16.mxu0 %vm534_vm2, %v2400_v10  ;;  %2321 = vmatprep.mubr.msk.bf16.mxu1 %vm534_vm2, %v2402_v11 }
  0x92   :  { %2250 = vmatmul.mubr.msk.bf16.gmra.mrb[68].mxu0 %vm534_vm2, %v2401_v12  ;;  %2322 = vmatmul.mubr.msk.bf16.gmra.mrb[68].mxu1 %vm534_vm2, %v2403_v13 }
  0xdd   :  { %v2719_v14 = vpop.f32.mrb[0].mxu0  ;;  %v2721_v15 = vpop.f32.mrb[0].mxu1 }
  0xde   :  { %v792_v16 = vpop.f32.mrb[1].mxu0  ;;  %v2723_v17 = vpop.f32.mrb[1].mxu1  ;;  %v2843_v12 = vsel %vm1367_vm3, %v2719_v14, -inf }
  0xdf   :  { %v2725_v18 = vpop.f32.mrb[2].mxu0  ;;  %v2727_v19 = vpop.f32.mrb[2].mxu1  ;;  %v2846_v13 = vsel %vm1367_vm3, %v792_v16, -inf }
  0xe0   :  { %v2729_v20 = vpop.f32.mrb[3].mxu0  ;;  %v2731_v21 = vpop.f32.mrb[3].mxu1 }
  0xe1   :  { %v2866_v14 = vsel %vm1367_vm3, %v2729_v20, -inf  ;;  %v2874_v16 = vsel %vm1367_vm3, %v2731_v21, -inf }
  0xe5   :  { %v2733_v22 = vpop.f32.mrb[4].mxu0  ;;  %v2735_v23 = vpop.f32.mrb[4].mxu1 }
  0xe6   :  { %v2737_v24 = vpop.f32.mrb[5].mxu0  ;;  %v2739_v25 = vpop.f32.mrb[5].mxu1  ;;  %v2886_v20 = vsel %vm1367_vm3, %v2735_v23, -inf }
  0xe7   :  { %v2741_v26 = vpop.f32.mrb[6].mxu0  ;;  %v2743_v27 = vpop.f32.mrb[6].mxu1  ;;  %v2894_v21 = vsel %vm1367_vm3, %v2739_v25, -inf }
  0xe8   :  { %v2745_v28 = vpop.f32.mrb[7].mxu0  ;;  %v2747_v29 = vpop.f32.mrb[7].mxu1 }
  0xe9   :  { %v2906_v23 = vsel %vm1367_vm3, %v2747_v29, -inf }
  0xed   :  { %v2749_v30 = vpop.f32.mrb[8].mxu0  ;;  %v2751_v31 = vpop.f32.mrb[8].mxu1 }
  0xee   :  { %v2753_v32 = vpop.f32.mrb[9].mxu0  ;;  %v2755_v33 = vpop.f32.mrb[9].mxu1 }
  0xef   :  { %v2757_v34 = vpop.f32.mrb[10].mxu0  ;;  %v2759_v35 = vpop.f32.mrb[10].mxu1  ;;  %v2914_v25 = vsel %vm1367_vm3, %v2753_v32, -inf  ;;  %v2926_v29 = vsel %vm1367_vm3, %v2755_v33, -inf }
  0xf0   :  { %v2761_v36 = vpop.f32.mrb[11].mxu0  ;;  %v2763_v37 = vpop.f32.mrb[11].mxu1  ;;  %3483 = vst [vmem:[#allocation7_spill] sm:$0xff] %v2914_v25  ;;  %v2934_v32 = vsel %vm1367_vm3, %v2759_v35, -inf }
  0xf1   :  { %3485 = vst [vmem:[#allocation9_spill] sm:$0xff] %v2934_v32 }
  0xf5   :  { %v2765_v38 = vpop.f32.mrb[12].mxu0  ;;  %v2767_v39 = vpop.f32.mrb[12].mxu1 }
  0xf6   :  { %v2769_v40 = vpop.f32.mrb[13].mxu0  ;;  %v2771_v41 = vpop.f32.mrb[13].mxu1  ;;  %v2946_v33 = vsel %vm1367_vm3, %v2765_v38, -inf  ;;  %v2954_v35 = vsel %vm1367_vm3, %v2767_v39, -inf }
  0xf7   :  { %v2773_v42 = vpop.f32.mrb[14].mxu0  ;;  %v2775_v43 = vpop.f32.mrb[14].mxu1  ;;  %3487 = vst [vmem:[#allocation11_spill] sm:$0xff] %v2954_v35  ;;  %v2966_v38 = vsel %vm1367_vm3, %v2771_v41, -inf }
  0xf8   :  { %v2777_v44 = vpop.f32.mrb[15].mxu0  ;;  %v2779_v45 = vpop.f32.mrb[15].mxu1  ;;  %v2974_v39 = vsel %vm1367_vm3, %v2775_v43, -inf }
  0xf9   :  { %3489 = vst [vmem:[#allocation13_spill] sm:$0xff] %v2974_v39 }
  0xfd   :  { %v2781_v46 = vpop.f32.mrb[16].mxu0  ;;  %v2783_v47 = vpop.f32.mrb[16].mxu1 }
  0xfe   :  { %v2785_v48 = vpop.f32.mrb[17].mxu0  ;;  %v2787_v49 = vpop.f32.mrb[17].mxu1  ;;  %v2986_v41 = vsel %vm1367_vm3, %v2781_v46, -inf  ;;  %v2994_v43 = vsel %vm1367_vm3, %v2783_v47, -inf }
  0xff   :  { %v2789_v50 = vpop.f32.mrb[18].mxu0  ;;  %v2791_v51 = vpop.f32.mrb[18].mxu1  ;;  %v3006_v46 = vsel %vm1367_vm3, %v2787_v49, -inf }
 0x100   :  { %v2793_v52 = vpop.f32.mrb[19].mxu0  ;;  %v2795_v53 = vpop.f32.mrb[19].mxu1  ;;  %v3014_v47 = vsel %vm1367_vm3, %v2791_v51, -inf }
 0x105   :  { %v2797_v54 = vpop.f32.mrb[20].mxu0  ;;  %v2799_v55 = vpop.f32.mrb[20].mxu1 }
 0x106   :  { %v2801_v56 = vpop.f32.mrb[21].mxu0  ;;  %v2803_v57 = vpop.f32.mrb[21].mxu1 }
 0x107   :  { %v2805_v58 = vpop.f32.mrb[22].mxu0  ;;  %v2807_v59 = vpop.f32.mrb[22].mxu1  ;;  %v3026_v49 = vsel %vm1367_vm3, %v2801_v56, -inf }
 0x108   :  { %v2809_v60 = vpop.f32.mrb[23].mxu0  ;;  %v2811_v61 = vpop.f32.mrb[23].mxu1  ;;  %v3034_v51 = vsel %vm1367_vm3, %v2805_v58, -inf  ;;  %v3046_v56 = vsel %vm1367_vm3, %v2807_v59, -inf }
 0x10d   :  { %v2813_v62 = vpop.f32.mrb[24].mxu0  ;;  %v2815_v63 = vpop.f32.mrb[24].mxu1 }
 0x10e   :  { %v2817_v0 = vpop.f32.mrb[25].mxu0  ;;  %v2819_v1 = vpop.f32.mrb[25].mxu1  ;;  %v3054_v58 = vsel %vm1367_vm3, %v2813_v62, -inf }
 0x10f   :  { %v2821_v2 = vpop.f32.mrb[26].mxu0  ;;  %v2823_v3 = vpop.f32.mrb[26].mxu1  ;;  %3493 = vst [vmem:[#allocation17_spill] sm:$0xff] %v3054_v58 }
 0x110   :  { %v2825_v4 = vpop.f32.mrb[27].mxu0  ;;  %v2827_v5 = vpop.f32.mrb[27].mxu1  ;;  %v3066_v59 = vsel %vm1367_vm3, %v2821_v2, -inf }
 0x111   :  { %3496 = vst [vmem:[#allocation20_spill] sm:$0xff] %v3066_v59  ;;  %v3074_v62 = vsel %vm1367_vm3, %v2825_v4, -inf }
 0x112   :  { %3498 = vst [vmem:[#allocation22_spill] sm:$0xff] %v3074_v62 }
 0x115   :  { %v2829_v6 = vpop.f32.mrb[28].mxu0  ;;  %v2831_v7 = vpop.f32.mrb[28].mxu1 }
 0x116   :  { %3478 = vst [vmem:[#allocation2_spill] sm:$0xff] %v2829_v6  ;;  %3479 = vst [vmem:[#allocation3_spill] sm:$0xff] %v2831_v7  ;;  %v2833_v8 = vpop.f32.mrb[29].mxu0  ;;  %v2835_v9 = vpop.f32.mrb[29].mxu1  ;;  %v2850_v6 = vsel %vm1367_vm3, %v2721_v15, -inf  ;;  %v2870_v15 = vsel %vm1367_vm3, %v2727_v19, -inf }
 0x117   :  { %3480 = vst [vmem:[#allocation4_spill] sm:$0xff] %v2833_v8  ;;  %v2837_v10 = vpop.f32.mrb[30].mxu0  ;;  %v2839_v11 = vpop.f32.mrb[30].mxu1  ;;  %v2890_v19 = vsel %vm1367_vm3, %v2741_v26, -inf  ;;  %v2910_v26 = vsel %vm1367_vm3, %v2749_v30, -inf  ;;  %v2930_v30 = vsel %vm1367_vm3, %v2761_v36, -inf }
 0x118   :  { %3481 = vst [vmem:[#allocation5_spill] sm:$0xff] %v2837_v10  ;;  %3482 = vst [vmem:[#allocation6_spill] sm:$0xff] %v2839_v11  ;;  %v2852_v7 = vpop.f32.mrb[31].mxu0  ;;  %v2854_v8 = vpop.f32.mrb[31].mxu1  ;;  %v2858_v10 = vsel %vm1367_vm3, %v2725_v18, -inf  ;;  %v2862_v11 = vsel %vm1367_vm3, %v2723_v17, -inf }
 0x119   :  { %v2878_v18 = vsel %vm1367_vm3, %v2733_v22, -inf  ;;  %v2882_v17 = vsel %vm1367_vm3, %v2737_v24, -inf  ;;  %v2898_v22 = vsel %vm1367_vm3, %v2745_v28, -inf  ;;  %v2902_v24 = vsel %vm1367_vm3, %v2743_v27, -inf  ;;  %3484 = vst [vmem:[#allocation8_spill] sm:$0xff] %v2930_v30 }
 0x11a   :  { %v2918_v28 = vsel %vm1367_vm3, %v2751_v31, -inf  ;;  %v2922_v27 = vsel %vm1367_vm3, %v2757_v34, -inf  ;;  %v2942_v34 = vsel %vm1367_vm3, %v2763_v37, -inf  ;;  %v2950_v36 = vsel %vm1367_vm3, %v2769_v40, -inf }
 0x11b   :  { %3486 = vst [vmem:[#allocation10_spill] sm:$0xff] %v2950_v36  ;;  %v2962_v37 = vsel %vm1367_vm3, %v2773_v42, -inf  ;;  %v2970_v40 = vsel %vm1367_vm3, %v2777_v44, -inf  ;;  %v2982_v42 = vsel %vm1367_vm3, %v2779_v45, -inf  ;;  %v2990_v44 = vsel %vm1367_vm3, %v2785_v48, -inf }
 0x11c   :  { %3488 = vst [vmem:[#allocation12_spill] sm:$0xff] %v2970_v40  ;;  %v3002_v45 = vsel %vm1367_vm3, %v2789_v50, -inf  ;;  %v3010_v48 = vsel %vm1367_vm3, %v2793_v52, -inf  ;;  %v3022_v50 = vsel %vm1367_vm3, %v2797_v54, -inf  ;;  %v3030_v52 = vsel %vm1367_vm3, %v2799_v55, -inf }
 0x11d   :  { %v2936_v25 = vpop.f32.mrb[32].mxu0  ;;  %v2938_v31 = vpop.f32.mrb[32].mxu1  ;;  %v3042_v54 = vsel %vm1367_vm3, %v2809_v60, -inf  ;;  %v3050_v55 = vsel %vm1367_vm3, %v2811_v61, -inf  ;;  %v3062_v60 = vsel %vm1367_vm3, %v2815_v63, -inf  ;;  %v3070_v61 = vsel %vm1367_vm3, %v2819_v1, -inf }
 0x11e   :  { %v2956_v30 = vpop.f32.mrb[33].mxu0  ;;  %v2958_v32 = vpop.f32.mrb[33].mxu1  ;;  %3492 = vst [vmem:[#allocation16_spill] sm:$0xff] %v3050_v55  ;;  %3495 = vst [vmem:[#allocation19_spill] sm:$0xff] %v3062_v60  ;;  %v3082_v63 = vsel %vm1367_vm3, %v2827_v5, -inf  ;;  %v3501_v2 = vld [vmem:[#allocation2_spill] sm:$0xff] }
 0x11f   :  { %v2976_v35 = vpop.f32.mrb[34].mxu0  ;;  %v2978_v36 = vpop.f32.mrb[34].mxu1  ;;  %3497 = vst [vmem:[#allocation21_spill] sm:$0xff] %v3070_v61  ;;  %3500 = vst [vmem:[#allocation24_spill] sm:$0xff] %v3082_v63  ;;  %v3086_v59 = vsel %vm1367_vm3, %v3501_v2, -inf  ;;  %v3503_v1 = vld [vmem:[#allocation3_spill] sm:$0xff] }
 0x120   :  { %v2996_v39 = vpop.f32.mrb[35].mxu0  ;;  %v2998_v40 = vpop.f32.mrb[35].mxu1  ;;  %3502 = vst [vmem:[#allocation2_spill] sm:$0xff] %v3086_v59  ;;  %v3090_v61 = vsel %vm1367_vm3, %v3503_v1, -inf  ;;  %v3099_v5 = vsel %vm1367_vm3, %v2835_v9, -inf  ;;  %v3508_v1 = vld [vmem:[#allocation5_spill] sm:$0xff] }
 0x121   :  { %3490 = vst [vmem:[#allocation14_spill] sm:$0xff] %v2996_v39  ;;  %3491 = vst [vmem:[#allocation15_spill] sm:$0xff] %v2998_v40  ;;  %v3018_v39 = vsel %vm1367_vm3, %v2795_v53, -inf  ;;  %v3038_v53 = vsel %vm1367_vm3, %v2803_v57, -inf  ;;  %v3058_v57 = vsel %vm1367_vm3, %v2817_v0, -inf  ;;  %v3078_v0 = vsel %vm1367_vm3, %v2823_v3, -inf }
 0x122   :  { %3494 = vst [vmem:[#allocation18_spill] sm:$0xff] %v3058_v57  ;;  %3499 = vst [vmem:[#allocation23_spill] sm:$0xff] %v3078_v0  ;;  %v3505_v3 = vld [vmem:[#allocation4_spill] sm:$0xff] }
 0x123   :  { %3504 = vst [vmem:[#allocation3_spill] sm:$0xff] %v3090_v61  ;;  %v3095_v0 = vsel %vm1367_vm3, %v3505_v3, -inf  ;;  %3507 = vst [vmem:[#allocation25_spill] sm:$0xff] %v3099_v5  ;;  %v3105_v61 = vsel %vm1367_vm3, %v3508_v1, -inf  ;;  %v3116_v1 = vsel %vm1367_vm3, %v2852_v7, -inf  ;;  %v3135_v7 = vsel %vm1367_vm3, %v2936_v25, -inf }
 0x124   :  { %3506 = vst [vmem:[#allocation4_spill] sm:$0xff] %v3095_v0 }
 0x125   :  { %v2219_v40 = vpop.f32.mrb[36].mxu0  ;;  %v2291_v57 = vpop.f32.mrb[36].mxu1 }
 0x126   :  { %v1383_v4 = vsel %vm1367_vm3, %v2219_v40, -inf  ;;  %v936_v62 = vpop.f32.mrb[37].mxu0  ;;  %v1224_v60 = vpop.f32.mrb[37].mxu1  ;;  %v1387_v55 = vsel %vm1367_vm3, %v2291_v57, -inf }
 0x127   :  { %v1384_v63 = vmax.f32 %v2843_v12, %v1383_v4  ;;  %v1369_v2 = vsel %vm1367_vm3, %v936_v62, -inf  ;;  %v2220_v59 = vpop.f32.mrb[38].mxu0  ;;  %v2292_v58 = vpop.f32.mrb[38].mxu1  ;;  %v1373_v62 = vsel %vm1367_vm3, %v1224_v60, -inf  ;;  %v3131_v60 = vsel %vm1367_vm3, %v2854_v8, -inf }
 0x128   :  { %v1370_v40 = vmax.f32 %v2846_v13, %v1369_v2  ;;  %v1390_v3 = vsel %vm1367_vm3, %v2220_v59, -inf  ;;  %v939_v0 = vpop.f32.mrb[39].mxu0  ;;  %v1227_v9 = vpop.f32.mrb[39].mxu1  ;;  %v3509_v13 = vld [vmem:[#allocation6_spill] sm:$0xff]  ;;  %v3125_v59 = vld [vmem:[%s3476_s2] ss:$0 sm:$0xff] }
 0x129   :  { %v1386_v5 = vmax.f32 %v1384_v63, %v2850_v6  ;;  %v1391_v12 = vmax.f32 %v2858_v10, %v1390_v3  ;;  %v1376_v4 = vsel %vm1367_vm3, %v939_v0, -inf  ;;  %v3120_v57 = vsel %vm1367_vm3, %v3509_v13, -inf }
 0x12a   :  { %v1372_v6 = vmax.f32 %v1370_v40, %v2862_v11  ;;  %v1377_v10 = vmax.f32 %v2866_v14, %v1376_v4  ;;  %v3140_v2 = vsel %vm1367_vm3, %v2938_v31, -inf  ;;  %v1394_v11 = vsel %vm1367_vm3, %v2292_v58, -inf }
 0x12b   :  { %v1388_v0 = vmax.f32 %v1386_v5, %v1387_v55  ;;  %v1393_v63 = vmax.f32 %v1391_v12, %v2870_v15  ;;  %3510 = vst [vmem:[#allocation5_spill] sm:$0xff] %v3140_v2  ;;  %v3146_v8 = vsel %vm1367_vm3, %v2956_v30, -inf  ;;  %v1380_v55 = vsel %vm1367_vm3, %v1227_v9, -inf }
 0x12c   :  { %v1374_v3 = vmax.f32 %v1372_v6, %v1373_v62  ;;  %v1379_v14 = vmax.f32 %v1377_v10, %v2874_v16 }
 0x12d   :  { %v1629_v40 = vadd.f32 %v3125_v59, %v1388_v0  ;;  %v1395_v25 = vmax.f32 %v1393_v63, %v1394_v11  ;;  %v2223_v5 = vpop.f32.mrb[40].mxu0  ;;  %v2295_v15 = vpop.f32.mrb[40].mxu1 }
 0x12e   :  { %v1627_v12 = vadd.f32 %v3125_v59, %v1374_v3  ;;  %v1381_v31 = vmax.f32 %v1379_v14, %v1380_v55  ;;  %v1411_v62 = vsel %vm1367_vm3, %v2223_v5, -inf  ;;  %v952_v4 = vpop.f32.mrb[41].mxu0  ;;  %v1415_v58 = vsel %vm1367_vm3, %v2295_v15, -inf  ;;  %v1240_v16 = vpop.f32.mrb[41].mxu1 }
 0x12f   :  { %v1665_v13 = vmax.f32 %v1629_v40, 0.0  ;;  %v1630_v30 = vadd.f32 %v3125_v59, %v1395_v25  ;;  %v1412_v6 = vmax.f32 %v2878_v18, %v1411_v62  ;;  %v1397_v10 = vsel %vm1367_vm3, %v952_v4, -inf  ;;  %v2224_v0 = vpop.f32.mrb[42].mxu0  ;;  %v2296_v9 = vpop.f32.mrb[42].mxu1 }
 0x130   :  { %v1663_v63 = vmax.f32 %v1627_v12, 0.0  ;;  %v1628_v11 = vadd.f32 %v3125_v59, %v1381_v31  ;;  %v1398_v3 = vmax.f32 %v2882_v17, %v1397_v10  ;;  %v1418_v14 = vsel %vm1367_vm3, %v2224_v0, -inf  ;;  %v955_v55 = vpop.f32.mrb[43].mxu0  ;;  %v1243_v5 = vpop.f32.mrb[43].mxu1 }
 0x131   :  { %v2069_v15 = vpack.c.bf16 %v1665_v13, %v1665_v13  ;;  %v1666_v2 = vmax.f32 %v1630_v30, 0.0  ;;  %v1414_v40 = vmax.f32 %v1412_v6, %v2886_v20  ;;  %v1419_v25 = vmax.f32 %v2890_v19, %v1418_v14 }
 0x132   :  { %v2067_v18 = vpack.c.bf16 %v1663_v63, %v1663_v63  ;;  %v1664_v62 = vmax.f32 %v1628_v11, 0.0  ;;  %v1400_v4 = vmax.f32 %v1398_v3, %v2894_v21  ;;  %v1401_v12 = vsel %vm1367_vm3, %v1240_v16, -inf }
 0x133   :  { %1846 = vst.msk [vmem:[%s3477_s3 + $0x8] sm:$0xf] %vm1843_vm4, %v2069_v15  ;;  %v2070_v17 = vpack.c.bf16 %v1666_v2, %v1666_v2  ;;  %v1416_v31 = vmax.f32 %v1414_v40, %v1415_v58  ;;  %v1404_v13 = vsel %vm1367_vm3, %v955_v55, -inf  ;;  %v1421_v30 = vmax.f32 %v1419_v25, %v2902_v24 }
 0x134   :  { %1844 = vst.msk [vmem:[%s3477_s3] sm:$0xf] %vm1843_vm4, %v2067_v18  ;;  %v2068_v20 = vpack.c.bf16 %v1664_v62, %v1664_v62  ;;  %v1402_v19 = vmax.f32 %v1400_v4, %v1401_v12  ;;  %v1405_v21 = vmax.f32 %v2898_v22, %v1404_v13  ;;  %v1422_v16 = vsel %vm1367_vm3, %v2296_v9, -inf  ;;  %v3511_v4 = vld [vmem:[#allocation7_spill] sm:$0xff] }
 0x135   :  { %v3177_v6 = vsel %vm1367_vm3, %v2958_v32, -inf  ;;  %1847 = vst.msk [vmem:[%s3477_s3 + $0xc] sm:$0xf] %vm1843_vm4, %v2070_v17  ;;  %v1633_v24 = vadd.f32 %v3125_v59, %v1416_v31  ;;  %v1423_v2 = vmax.f32 %v1421_v30, %v1422_v16  ;;  %v1408_v58 = vsel %vm1367_vm3, %v1243_v5, -inf  ;;  %v2227_v10 = vpop.f32.mrb[44].mxu0  ;;  %v2299_v0 = vpop.f32.mrb[44].mxu1 }
 0x136   :  { %1845 = vst.msk [vmem:[%s3477_s3 + $0x4] sm:$0xf] %vm1843_vm4, %v2068_v20  ;;  %v1631_v22 = vadd.f32 %v3125_v59, %v1402_v19  ;;  %v1407_v32 = vmax.f32 %v1405_v21, %v2906_v23  ;;  %v1439_v9 = vsel %vm1367_vm3, %v2227_v10, -inf  ;;  %v968_v63 = vpop.f32.mrb[45].mxu0  ;;  %v1443_v11 = vsel %vm1367_vm3, %v2299_v0, -inf  ;;  %v1256_v3 = vpop.f32.mrb[45].mxu1 }
 0x137   :  { %v1669_v14 = vmax.f32 %v1633_v24, 0.0  ;;  %v1634_v55 = vadd.f32 %v3125_v59, %v1423_v2  ;;  %v1440_v5 = vmax.f32 %v2910_v26, %v1439_v9  ;;  %v1425_v15 = vsel %vm1367_vm3, %v968_v63, -inf  ;;  %v2228_v40 = vpop.f32.mrb[46].mxu0  ;;  %v2300_v25 = vpop.f32.mrb[46].mxu1  ;;  %v3512_v0 = vld [vmem:[#allocation9_spill] sm:$0xff] }
 0x138   :  { %v1667_v18 = vmax.f32 %v1631_v22, 0.0  ;;  %v1409_v62 = vmax.f32 %v1407_v32, %v1408_v58  ;;  %v1426_v12 = vmax.f32 %v3511_v4, %v1425_v15  ;;  %v1446_v23 = vsel %vm1367_vm3, %v2228_v40, -inf  ;;  %v971_v17 = vpop.f32.mrb[47].mxu0  ;;  %v1259_v31 = vpop.f32.mrb[47].mxu1  ;;  %v3513_v22 = vld [vmem:[#allocation8_spill] sm:$0xff] }
 0x139   :  { %v2073_v13 = vpack.c.bf16 %v1669_v14, %v1669_v14  ;;  %v1670_v30 = vmax.f32 %v1634_v55, 0.0  ;;  %v1442_v20 = vmax.f32 %v1440_v5, %v2918_v28  ;;  %v1447_v19 = vmax.f32 %v2922_v27, %v1446_v23 }
 0x13a   :  { %v2071_v21 = vpack.c.bf16 %v1667_v18, %v1667_v18  ;;  %v1632_v26 = vadd.f32 %v3125_v59, %v1409_v62  ;;  %v1428_v16 = vmax.f32 %v1426_v12, %v2926_v29  ;;  %v1429_v24 = vsel %vm1367_vm3, %v1256_v3, -inf }
 0x13b   :  { %1850 = vst.msk [vmem:[%s3477_s3 + $0x18] sm:$0xf] %vm1843_vm4, %v2073_v13  ;;  %v2074_v2 = vpack.c.bf16 %v1670_v30, %v1670_v30  ;;  %v1444_v58 = vmax.f32 %v1442_v20, %v1443_v11  ;;  %v1432_v10 = vsel %vm1367_vm3, %v971_v17, -inf  ;;  %v1449_v28 = vmax.f32 %v1447_v19, %v3512_v0  ;;  %v3514_v20 = vld [vmem:[#allocation10_spill] sm:$0xff] }
 0x13c   :  { %1848 = vst.msk [vmem:[%s3477_s3 + $0x10] sm:$0xf] %vm1843_vm4, %v2071_v21  ;;  %v1668_v27 = vmax.f32 %v1632_v26, 0.0  ;;  %v1430_v29 = vmax.f32 %v1428_v16, %v1429_v24  ;;  %v1433_v32 = vmax.f32 %v3513_v22, %v1432_v10  ;;  %v1450_v9 = vsel %vm1367_vm3, %v2300_v25, -inf }
 0x13d   :  { %v3217_v63 = vsel %vm1367_vm3, %v2976_v35, -inf  ;;  %1851 = vst.msk [vmem:[%s3477_s3 + $0x1c] sm:$0xf] %vm1843_vm4, %v2074_v2  ;;  %v1637_v11 = vadd.f32 %v3125_v59, %v1444_v58  ;;  %v1451_v3 = vmax.f32 %v1449_v28, %v1450_v9  ;;  %v1436_v14 = vsel %vm1367_vm3, %v1259_v31, -inf  ;;  %v2231_v55 = vpop.f32.mrb[48].mxu0  ;;  %v2303_v5 = vpop.f32.mrb[48].mxu1 }
 0x13e   :  { %v2072_v15 = vpack.c.bf16 %v1668_v27, %v1668_v27  ;;  %v1635_v40 = vadd.f32 %v3125_v59, %v1430_v29  ;;  %v1435_v25 = vmax.f32 %v1433_v32, %v2942_v34  ;;  %v1467_v35 = vsel %vm1367_vm3, %v2231_v55, -inf  ;;  %v984_v18 = vpop.f32.mrb[49].mxu0  ;;  %v1272_v62 = vpop.f32.mrb[49].mxu1  ;;  %v3517_v55 = vld [vmem:[#allocation13_spill] sm:$0xff] }
 0x13f   :  { %v1673_v4 = vmax.f32 %v1637_v11, 0.0  ;;  %v1638_v12 = vadd.f32 %v3125_v59, %v1451_v3  ;;  %v1468_v23 = vmax.f32 %v2946_v33, %v1467_v35  ;;  %v1453_v17 = vsel %vm1367_vm3, %v984_v18, -inf  ;;  %v2232_v13 = vpop.f32.mrb[50].mxu0  ;;  %v2304_v31 = vpop.f32.mrb[50].mxu1  ;;  %v3515_v33 = vld [vmem:[#allocation11_spill] sm:$0xff] }
 0x140   :  { %1849 = vst.msk [vmem:[%s3477_s3 + $0x14] sm:$0xf] %vm1843_vm4, %v2072_v15  ;;  %v1671_v30 = vmax.f32 %v1635_v40, 0.0  ;;  %v1437_v34 = vmax.f32 %v1435_v25, %v1436_v14  ;;  %v1454_v19 = vmax.f32 %v3514_v20, %v1453_v17  ;;  %v1471_v21 = vsel %vm1367_vm3, %v2303_v5, -inf  ;;  %v987_v26 = vpop.f32.mrb[51].mxu0  ;;  %v1275_v16 = vpop.f32.mrb[51].mxu1 }
 0x141   :  { %v2077_v24 = vpack.c.bf16 %v1673_v4, %v1673_v4  ;;  %v1674_v2 = vmax.f32 %v1638_v12, 0.0  ;;  %v1470_v58 = vmax.f32 %v1468_v23, %v3515_v33  ;;  %v1474_v10 = vsel %vm1367_vm3, %v2232_v13, -inf  ;;  %v3516_v14 = vld [vmem:[#allocation12_spill] sm:$0xff] }
 0x142   :  { %v2075_v0 = vpack.c.bf16 %v1671_v30, %v1671_v30  ;;  %v1636_v28 = vadd.f32 %v3125_v59, %v1437_v34  ;;  %v1475_v27 = vmax.f32 %v2962_v37, %v1474_v10  ;;  %v1456_v29 = vmax.f32 %v1454_v19, %v2966_v38 }
 0x143   :  { %1854 = vst.msk [vmem:[%s3477_s3 + $0x28] sm:$0xf] %vm1843_vm4, %v2077_v24  ;;  %v2078_v22 = vpack.c.bf16 %v1674_v2, %v1674_v2  ;;  %v1472_v32 = vmax.f32 %v1470_v58, %v1471_v21  ;;  %v1457_v9 = vsel %vm1367_vm3, %v1272_v62, -inf  ;;  %v1460_v11 = vsel %vm1367_vm3, %v987_v26, -inf }
 0x144   :  { %1852 = vst.msk [vmem:[%s3477_s3 + $0x20] sm:$0xf] %vm1843_vm4, %v2075_v0  ;;  %v1672_v3 = vmax.f32 %v1636_v28, 0.0  ;;  %v1458_v37 = vmax.f32 %v1456_v29, %v1457_v9  ;;  %v1461_v38 = vmax.f32 %v3516_v14, %v1460_v11  ;;  %v1477_v5 = vmax.f32 %v1475_v27, %v3517_v55  ;;  %v3518_v9 = vld [vmem:[#allocation14_spill] sm:$0xff] }
 0x145   :  { %v3256_v15 = vsel %vm1367_vm3, %v2978_v36, -inf  ;;  %1855 = vst.msk [vmem:[%s3477_s3 + $0x2c] sm:$0xf] %vm1843_vm4, %v2078_v22  ;;  %v1641_v40 = vadd.f32 %v3125_v59, %v1472_v32  ;;  %v1478_v25 = vsel %vm1367_vm3, %v2304_v31, -inf  ;;  %v1464_v35 = vsel %vm1367_vm3, %v1275_v16, -inf  ;;  %v2235_v18 = vpop.f32.mrb[52].mxu0 }
 0x146   :  { %v2307_v62 = vpop.f32.mrb[52].mxu1  ;;  %v2076_v4 = vpack.c.bf16 %v1672_v3, %v1672_v3  ;;  %v1639_v12 = vadd.f32 %v3125_v59, %v1458_v37  ;;  %v1479_v23 = vmax.f32 %v1477_v5, %v1478_v25  ;;  %v1463_v36 = vmax.f32 %v1461_v38, %v2982_v42  ;;  %v1000_v17 = vpop.f32.mrb[53].mxu0 }
 0x147   :  { %v1288_v13 = vpop.f32.mrb[53].mxu1  ;;  %v1677_v30 = vmax.f32 %v1641_v40, 0.0  ;;  %v1495_v34 = vsel %vm1367_vm3, %v2235_v18, -inf  ;;  %v1481_v20 = vsel %vm1367_vm3, %v1000_v17, -inf  ;;  %v1499_v19 = vsel %vm1367_vm3, %v2307_v62, -inf  ;;  %v2236_v31 = vpop.f32.mrb[54].mxu0 }
 0x148   :  { %v2308_v21 = vpop.f32.mrb[54].mxu1  ;;  %1853 = vst.msk [vmem:[%s3477_s3 + $0x24] sm:$0xf] %vm1843_vm4, %v2076_v4  ;;  %v1675_v26 = vmax.f32 %v1639_v12, 0.0  ;;  %v1642_v16 = vadd.f32 %v3125_v59, %v1479_v23  ;;  %v1465_v42 = vmax.f32 %v1463_v36, %v1464_v35  ;;  %v1496_v24 = vmax.f32 %v2986_v41, %v1495_v34  ;;  %v1003_v2 = vpop.f32.mrb[55].mxu0 }
 0x149   :  { %v1291_v33 = vpop.f32.mrb[55].mxu1  ;;  %v2081_v58 = vpack.c.bf16 %v1677_v30, %v1677_v30  ;;  %v1482_v10 = vmax.f32 %v2990_v44, %v1481_v20  ;;  %v1502_v0 = vsel %vm1367_vm3, %v2236_v31, -inf  ;;  %v1485_v28 = vsel %vm1367_vm3, %v1288_v13, -inf }
 0x14a   :  { %v2079_v27 = vpack.c.bf16 %v1675_v26, %v1675_v26  ;;  %v1678_v29 = vmax.f32 %v1642_v16, 0.0  ;;  %v1640_v22 = vadd.f32 %v3125_v59, %v1465_v42  ;;  %v1498_v32 = vmax.f32 %v1496_v24, %v2994_v43 }
 0x14b   :  { %v3283_v11 = vsel %vm1367_vm3, %v3518_v9, -inf  ;;  %1858 = vst.msk [vmem:[%s3477_s3 + $0x38] sm:$0xf] %vm1843_vm4, %v2081_v58  ;;  %v1503_v41 = vmax.f32 %v3002_v45, %v1502_v0  ;;  %v1484_v44 = vmax.f32 %v1482_v10, %v3006_v46  ;;  %v1488_v3 = vsel %vm1367_vm3, %v1003_v2, -inf }
 0x14c   :  { %1856 = vst.msk [vmem:[%s3477_s3 + $0x30] sm:$0xf] %vm1843_vm4, %v2079_v27  ;;  %v2082_v43 = vpack.c.bf16 %v1678_v29, %v1678_v29  ;;  %v1676_v37 = vmax.f32 %v1640_v22, 0.0  ;;  %v1500_v14 = vmax.f32 %v1498_v32, %v1499_v19  ;;  %v1489_v38 = vmax.f32 %v3010_v48, %v1488_v3 }
 0x14d   :  { %v1486_v55 = vmax.f32 %v1484_v44, %v1485_v28  ;;  %v1505_v5 = vmax.f32 %v1503_v41, %v3014_v47  ;;  %v1506_v40 = vsel %vm1367_vm3, %v2308_v21, -inf  ;;  %v1492_v45 = vsel %vm1367_vm3, %v1291_v33, -inf  ;;  %v2239_v46 = vpop.f32.mrb[56].mxu0  ;;  %v2311_v25 = vpop.f32.mrb[56].mxu1 }
 0x14e   :  { %1859 = vst.msk [vmem:[%s3477_s3 + $0x3c] sm:$0xf] %vm1843_vm4, %v2082_v43  ;;  %v2080_v35 = vpack.c.bf16 %v1676_v37, %v1676_v37  ;;  %v1645_v18 = vadd.f32 %v3125_v59, %v1500_v14  ;;  %v1491_v62 = vmax.f32 %v1489_v38, %v3018_v39  ;;  %v1523_v48 = vsel %vm1367_vm3, %v2239_v46, -inf  ;;  %v1016_v4 = vpop.f32.mrb[57].mxu0  ;;  %v1304_v47 = vpop.f32.mrb[57].mxu1 }
 0x14f   :  { %v1643_v12 = vadd.f32 %v3125_v59, %v1486_v55  ;;  %v1507_v23 = vmax.f32 %v1505_v5, %v1506_v40  ;;  %v1524_v36 = vmax.f32 %v3022_v50, %v1523_v48  ;;  %v1509_v17 = vsel %vm1367_vm3, %v1016_v4, -inf  ;;  %v2240_v13 = vpop.f32.mrb[58].mxu0  ;;  %v2312_v30 = vpop.f32.mrb[58].mxu1  ;;  %v3519_v5 = vld [vmem:[#allocation16_spill] sm:$0xff]  ;;  %v3521_v4 = vld [vmem:[#allocation18_spill] sm:$0xff] }
 0x150   :  { %1857 = vst.msk [vmem:[%s3477_s3 + $0x34] sm:$0xf] %vm1843_vm4, %v2080_v35  ;;  %v1681_v34 = vmax.f32 %v1645_v18, 0.0  ;;  %v1493_v39 = vmax.f32 %v1491_v62, %v1492_v45  ;;  %v1510_v20 = vmax.f32 %v3026_v49, %v1509_v17  ;;  %v1527_v19 = vsel %vm1367_vm3, %v2311_v25, -inf  ;;  %v1019_v31 = vpop.f32.mrb[59].mxu0  ;;  %v1307_v21 = vpop.f32.mrb[59].mxu1 }
 0x151   :  { %v1679_v26 = vmax.f32 %v1643_v12, 0.0  ;;  %v1646_v50 = vadd.f32 %v3125_v59, %v1507_v23  ;;  %v1526_v16 = vmax.f32 %v1524_v36, %v3030_v52  ;;  %v1530_v42 = vsel %vm1367_vm3, %v2240_v13, -inf  ;;  %v3520_v62 = vld [vmem:[#allocation17_spill] sm:$0xff] }
 0x152   :  { %v2085_v24 = vpack.c.bf16 %v1681_v34, %v1681_v34  ;;  %v1644_v2 = vadd.f32 %v3125_v59, %v1493_v39  ;;  %v1531_v33 = vmax.f32 %v3034_v51, %v1530_v42  ;;  %v1512_v58 = vmax.f32 %v1510_v20, %v3038_v53  ;;  %v3522_v20 = vld [vmem:[#allocation19_spill] sm:$0xff] }
 0x153   :  { %v2083_v10 = vpack.c.bf16 %v1679_v26, %v1679_v26  ;;  %v1682_v49 = vmax.f32 %v1646_v50, 0.0  ;;  %v1528_v0 = vmax.f32 %v1526_v16, %v1527_v19  ;;  %v1513_v28 = vsel %vm1367_vm3, %v1304_v47, -inf  ;;  %v3524_v50 = vld [vmem:[#allocation21_spill] sm:$0xff] }
 0x154   :  { %1862 = vst.msk [vmem:[%s3477_s3 + $0x48] sm:$0xf] %vm1843_vm4, %v2085_v24  ;;  %v1680_v52 = vmax.f32 %v1644_v2, 0.0  ;;  %v1514_v27 = vmax.f32 %v1512_v58, %v1513_v28  ;;  %v1516_v29 = vsel %vm1367_vm3, %v1019_v31, -inf  ;;  %v1533_v22 = vmax.f32 %v1531_v33, %v3046_v56  ;;  %v3523_v31 = vld [vmem:[#allocation20_spill] sm:$0xff]  ;;  %v3525_v58 = vld [vmem:[#allocation22_spill] sm:$0xff] }
 0x155   :  { %1860 = vst.msk [vmem:[%s3477_s3 + $0x40] sm:$0xf] %vm1843_vm4, %v2083_v10  ;;  %v2086_v51 = vpack.c.bf16 %v1682_v49, %v1682_v49  ;;  %v1649_v53 = vadd.f32 %v3125_v59, %v1528_v0  ;;  %v1517_v32 = vmax.f32 %v3042_v54, %v1516_v29  ;;  %v1534_v9 = vsel %vm1367_vm3, %v2312_v30, -inf  ;;  %v2243_v41 = vpop.f32.mrb[60].mxu0  ;;  %v2315_v44 = vpop.f32.mrb[60].mxu1  ;;  %v3526_v49 = vld [vmem:[#allocation23_spill] sm:$0xff] }
 0x156   :  { %v2084_v3 = vpack.c.bf16 %v1680_v52, %v1680_v52  ;;  %v1647_v43 = vadd.f32 %v3125_v59, %v1514_v27  ;;  %v1535_v37 = vmax.f32 %v1533_v22, %v1534_v9  ;;  %v1520_v56 = vsel %vm1367_vm3, %v1307_v21, -inf  ;;  %v1032_v14 = vpop.f32.mrb[61].mxu0  ;;  %v1320_v38 = vpop.f32.mrb[61].mxu1  ;;  %v3527_v9 = vld [vmem:[#allocation24_spill] sm:$0xff] }
 0x157   :  { %1863 = vst.msk [vmem:[%s3477_s3 + $0x4c] sm:$0xf] %vm1843_vm4, %v2086_v51  ;;  %v1685_v55 = vmax.f32 %v1649_v53, 0.0  ;;  %v1519_v54 = vmax.f32 %v1517_v32, %v3519_v5  ;;  %v1551_v40 = vsel %vm1367_vm3, %v2243_v41, -inf  ;;  %v1537_v45 = vsel %vm1367_vm3, %v1032_v14, -inf  ;;  %v2244_v46 = vpop.f32.mrb[62].mxu0 }
 0x158   :  { %v2316_v25 = vpop.f32.mrb[62].mxu1  ;;  %1861 = vst.msk [vmem:[%s3477_s3 + $0x44] sm:$0xf] %vm1843_vm4, %v2084_v3  ;;  %v1683_v35 = vmax.f32 %v1647_v43, 0.0  ;;  %v1650_v18 = vadd.f32 %v3125_v59, %v1535_v37  ;;  %v1552_v48 = vmax.f32 %v3520_v62, %v1551_v40  ;;  %v1538_v47 = vmax.f32 %v3521_v4, %v1537_v45  ;;  %v1035_v12 = vpop.f32.mrb[63].mxu0  ;;  %v3528_v14 = vld [vmem:[#allocation2_spill] sm:$0xff] }
 0x159   :  { %v1323_v23 = vpop.f32.mrb[63].mxu1  ;;  %v2089_v36 = vpack.c.bf16 %v1685_v55, %v1685_v55  ;;  %v1521_v17 = vmax.f32 %v1519_v54, %v1520_v56  ;;  %v1555_v13 = vsel %vm1367_vm3, %v2315_v44, -inf  ;;  %v1558_v30 = vsel %vm1367_vm3, %v2244_v46, -inf  ;;  %v3530_v4 = vld [vmem:[#allocation3_spill] sm:$0xff] }
 0x15a   :  { %v2087_v34 = vpack.c.bf16 %v1683_v35, %v1683_v35  ;;  %v1686_v39 = vmax.f32 %v1650_v18, 0.0  ;;  %v1554_v19 = vmax.f32 %v1552_v48, %v3522_v20  ;;  %v1559_v21 = vmax.f32 %v3523_v31, %v1558_v30  ;;  %v3531_v20 = vld [vmem:[#allocation25_spill] sm:$0xff] }
 0x15b   :  { %1866 = vst.msk [vmem:[%s3477_s3 + $0x58] sm:$0xf] %vm1843_vm4, %v2089_v36  ;;  %v1648_v26 = vadd.f32 %v3125_v59, %v1521_v17  ;;  %v1540_v16 = vmax.f32 %v1538_v47, %v3524_v50  ;;  %v1541_v42 = vsel %vm1367_vm3, %v1320_v38, -inf  ;;  %v1544_v24 = vsel %vm1367_vm3, %v1035_v12, -inf }
 0x15c   :  { %1864 = vst.msk [vmem:[%s3477_s3 + $0x50] sm:$0xf] %vm1843_vm4, %v2087_v34  ;;  %v2090_v2 = vpack.c.bf16 %v1686_v39, %v1686_v39  ;;  %v1556_v33 = vmax.f32 %v1554_v19, %v1555_v13  ;;  %v1545_v10 = vmax.f32 %v3525_v58, %v1544_v24  ;;  %v1561_v0 = vmax.f32 %v1559_v21, %v3526_v49 }
 0x15d   :  { %v1684_v28 = vmax.f32 %v1648_v26, 0.0  ;;  %v1542_v52 = vmax.f32 %v1540_v16, %v1541_v42  ;;  %v1562_v27 = vsel %vm1367_vm3, %v2316_v25, -inf  ;;  %v1548_v29 = vsel %vm1367_vm3, %v1323_v23, -inf  ;;  %v2247_v22 = vpop.f32.mrb[64].mxu0  ;;  %v2319_v51 = vpop.f32.mrb[64].mxu1  ;;  %v3529_v25 = vld [vmem:[#allocation4_spill] sm:$0xff] }
 0x15e   :  { %1867 = vst.msk [vmem:[%s3477_s3 + $0x5c] sm:$0xf] %vm1843_vm4, %v2090_v2  ;;  %v1653_v53 = vadd.f32 %v3125_v59, %v1556_v33  ;;  %v1563_v32 = vmax.f32 %v1561_v0, %v1562_v27  ;;  %v1547_v41 = vmax.f32 %v1545_v10, %v3527_v9  ;;  %v1579_v44 = vsel %vm1367_vm3, %v2247_v22, -inf  ;;  %v1048_v3 = vpop.f32.mrb[65].mxu0  ;;  %v1336_v43 = vpop.f32.mrb[65].mxu1 }
 0x15f   :  { %v2088_v37 = vpack.c.bf16 %v1684_v28, %v1684_v28  ;;  %v1651_v56 = vadd.f32 %v3125_v59, %v1542_v52  ;;  %v1580_v38 = vmax.f32 %v3528_v14, %v1579_v44  ;;  %v1565_v55 = vsel %vm1367_vm3, %v1048_v3, -inf  ;;  %v2248_v5 = vpop.f32.mrb[66].mxu0  ;;  %v2320_v54 = vpop.f32.mrb[66].mxu1 }
 0x160   :  { %v1689_v40 = vmax.f32 %v1653_v53, 0.0  ;;  %v1654_v45 = vadd.f32 %v3125_v59, %v1563_v32  ;;  %v1549_v46 = vmax.f32 %v1547_v41, %v1548_v29  ;;  %v1566_v35 = vmax.f32 %v3529_v25, %v1565_v55  ;;  %v1051_v18 = vpop.f32.mrb[67].mxu0  ;;  %v1339_v62 = vpop.f32.mrb[67].mxu1 }
 0x161   :  { %1865 = vst.msk [vmem:[%s3477_s3 + $0x54] sm:$0xf] %vm1843_vm4, %v2088_v37  ;;  %v1687_v48 = vmax.f32 %v1651_v56, 0.0  ;;  %v1582_v47 = vmax.f32 %v1580_v38, %v3530_v4  ;;  %v1583_v12 = vsel %vm1367_vm3, %v2319_v51, -inf  ;;  %v1586_v23 = vsel %vm1367_vm3, %v2248_v5, -inf  ;;  %v3532_v38 = vld [vmem:[#allocation5_spill] sm:$0xff] }
 0x162   :  { %v2093_v36 = vpack.c.bf16 %v1689_v40, %v1689_v40  ;;  %v1690_v17 = vmax.f32 %v1654_v45, 0.0  ;;  %v1652_v13 = vadd.f32 %v3125_v59, %v1549_v46  ;;  %v1587_v30 = vmax.f32 %v3105_v61, %v1586_v23 }
 0x163   :  { %v2091_v34 = vpack.c.bf16 %v1687_v48, %v1687_v48  ;;  %v1584_v39 = vmax.f32 %v1582_v47, %v1583_v12  ;;  %v1568_v19 = vmax.f32 %v1566_v35, %v3531_v20  ;;  %v1569_v31 = vsel %vm1367_vm3, %v1336_v43, -inf }
 0x164   :  { %1870 = vst.msk [vmem:[%s3477_s3 + $0x68] sm:$0xf] %vm1843_vm4, %v2093_v36  ;;  %v2094_v21 = vpack.c.bf16 %v1690_v17, %v1690_v17  ;;  %v1688_v26 = vmax.f32 %v1652_v13, 0.0  ;;  %v1572_v50 = vsel %vm1367_vm3, %v1051_v18, -inf  ;;  %v1589_v16 = vmax.f32 %v1587_v30, %v3120_v57 }
 0x165   :  { %1868 = vst.msk [vmem:[%s3477_s3 + $0x60] sm:$0xf] %vm1843_vm4, %v2091_v34  ;;  %v1657_v61 = vadd.f32 %v3125_v59, %v1584_v39  ;;  %v1570_v42 = vmax.f32 %v1568_v19, %v1569_v31  ;;  %v1573_v24 = vmax.f32 %v3116_v1, %v1572_v50  ;;  %v1590_v2 = vsel %vm1367_vm3, %v2320_v54, -inf  ;;  %v2251_v33 = vpop.f32.mrb[68].mxu0  ;;  %v2323_v58 = vpop.f32.mrb[68].mxu1 }
 0x166   :  { %1871 = vst.msk [vmem:[%s3477_s3 + $0x6c] sm:$0xf] %vm1843_vm4, %v2094_v21  ;;  %v2092_v57 = vpack.c.bf16 %v1688_v26, %v1688_v26  ;;  %v1591_v10 = vmax.f32 %v1589_v16, %v1590_v2  ;;  %v1576_v49 = vsel %vm1367_vm3, %v1339_v62, -inf  ;;  %v1607_v0 = vsel %vm1367_vm3, %v2251_v33, -inf  ;;  %v1064_v28 = vpop.f32.mrb[69].mxu0  ;;  %v1352_v52 = vpop.f32.mrb[69].mxu1 }
 0x167   :  { %v1693_v27 = vmax.f32 %v1657_v61, 0.0  ;;  %v1655_v1 = vadd.f32 %v3125_v59, %v1570_v42  ;;  %v1575_v29 = vmax.f32 %v1573_v24, %v3131_v60  ;;  %v1608_v22 = vmax.f32 %v3135_v7, %v1607_v0  ;;  %v2252_v51 = vpop.f32.mrb[70].mxu0  ;;  %v2324_v53 = vpop.f32.mrb[70].mxu1  ;;  %v3533_v62 = vld [vmem:[#allocation15_spill] sm:$0xff] }
 0x168   :  { %1869 = vst.msk [vmem:[%s3477_s3 + $0x64] sm:$0xf] %vm1843_vm4, %v2092_v57  ;;  %v1658_v32 = vadd.f32 %v3125_v59, %v1591_v10  ;;  %v1593_v9 = vsel %vm1367_vm3, %v1064_v28, -inf  ;;  %v1611_v41 = vsel %vm1367_vm3, %v2323_v58, -inf  ;;  %v1614_v44 = vsel %vm1367_vm3, %v2252_v51, -inf  ;;  %v1067_v3 = vpop.f32.mrb[71].mxu0 }
 0x169   :  { %v1355_v43 = vpop.f32.mrb[71].mxu1  ;;  %v2097_v60 = vpack.c.bf16 %v1693_v27, %v1693_v27  ;;  %v1691_v37 = vmax.f32 %v1655_v1, 0.0  ;;  %v1577_v7 = vmax.f32 %v1575_v29, %v1576_v49  ;;  %v1594_v56 = vmax.f32 %v3146_v8, %v1593_v9 }
 0x16a   :  { %v1694_v14 = vmax.f32 %v1658_v32, 0.0  ;;  %v1610_v55 = vmax.f32 %v1608_v22, %v3532_v38  ;;  %v1615_v5 = vmax.f32 %v3217_v63, %v1614_v44  ;;  %v1597_v54 = vsel %vm1367_vm3, %v1352_v52, -inf }
 0x16b   :  { %1874 = vst.msk [vmem:[%s3477_s3 + $0x78] sm:$0xf] %vm1843_vm4, %v2097_v60  ;;  %v2095_v40 = vpack.c.bf16 %v1691_v37, %v1691_v37  ;;  %v1656_v45 = vadd.f32 %v3125_v59, %v1577_v7  ;;  %v1596_v46 = vmax.f32 %v1594_v56, %v3177_v6  ;;  %v1600_v25 = vsel %vm1367_vm3, %v1067_v3, -inf }
 0x16c   :  { %v2098_v8 = vpack.c.bf16 %v1694_v14, %v1694_v14  ;;  %v1612_v35 = vmax.f32 %v1610_v55, %v1611_v41  ;;  %v1601_v18 = vmax.f32 %v3283_v11, %v1600_v25  ;;  %v1617_v63 = vmax.f32 %v1615_v5, %v3256_v15 }
 0x16d   :  { %v1602_v48 = vsel %vm1367_vm3, %v3533_v62, -inf  ;;  %1872 = vst.msk [vmem:[%s3477_s3 + $0x70] sm:$0xf] %vm1843_vm4, %v2095_v40  ;;  %v1692_v4 = vmax.f32 %v1656_v45, 0.0  ;;  %v1598_v47 = vmax.f32 %v1596_v46, %v1597_v54  ;;  %v1618_v6 = vsel %vm1367_vm3, %v2324_v53, -inf }
 0x16e   :  { %1875 = vst.msk [vmem:[%s3477_s3 + $0x7c] sm:$0xf] %vm1843_vm4, %v2098_v8  ;;  %v1661_v11 = vadd.f32 %v3125_v59, %v1612_v35  ;;  %v1619_v15 = vmax.f32 %v1617_v63, %v1618_v6  ;;  %v1603_v12 = vmax.f32 %v1601_v18, %v1602_v48  ;;  %v1604_v17 = vsel %vm1367_vm3, %v1355_v43, -inf }
 0x16f   :  { %v2096_v23 = vpack.c.bf16 %v1692_v4, %v1692_v4  ;;  %v1659_v36 = vadd.f32 %v3125_v59, %v1598_v47 }
 0x170   :  { %v1697_v13 = vmax.f32 %v1661_v11, 0.0  ;;  %v1662_v30 = vadd.f32 %v3125_v59, %v1619_v15  ;;  %v1605_v34 = vmax.f32 %v1603_v12, %v1604_v17 }
 0x171   :  { %1873 = vst.msk [vmem:[%s3477_s3 + $0x74] sm:$0xf] %vm1843_vm4, %v2096_v23  ;;  %v1695_v39 = vmax.f32 %v1659_v36, 0.0 }
 0x172   :  { %v2101_v20 = vpack.c.bf16 %v1697_v13, %v1697_v13  ;;  %v1698_v19 = vmax.f32 %v1662_v30, 0.0  ;;  %v1660_v31 = vadd.f32 %v3125_v59, %v1605_v34 }
 0x173   :  { %v2099_v21 = vpack.c.bf16 %v1695_v39, %v1695_v39 }
 0x174   :  { %1878 = vst.msk [vmem:[%s3477_s3 + $0x88] sm:$0xf] %vm1843_vm4, %v2101_v20  ;;  %v2102_v26 = vpack.c.bf16 %v1698_v19, %v1698_v19  ;;  %v1696_v50 = vmax.f32 %v1660_v31, 0.0 }
 0x175   :  { %1876 = vst.msk [vmem:[%s3477_s3 + $0x80] sm:$0xf] %vm1843_vm4, %v2099_v21 }
 0x176   :  { %1879 = vst.msk [vmem:[%s3477_s3 + $0x8c] sm:$0xf] %vm1843_vm4, %v2102_v26  ;;  %v2100_v16 = vpack.c.bf16 %v1696_v50, %v1696_v50 }
 0x178   :  { %1877 = vst.msk [vmem:[%s3477_s3 + $0x84] sm:$0xf] %vm1843_vm4, %v2100_v16 }

// kernel: cnn_mnist_forward.4
= control target key start
LH: loop header
LB: loop body
LE: loop exit
PB: predicated region body
PF: predicated region fallthrough
CT: control target
= control target key end

     0   :  { %vm646_vm0 = vcmask 1042432   ;;  %vm647_vm1 = vcmask 1046532   ;;  %vm335_vm2 = vcmask 261120   ;;  %vm67_vm4 = vsmask.f32 3328  ;;  %s8801_s1 = inlined_call_operand.vmem [shape: bf16[25,32,64], index: 1, kind: input, shape index: {}]   ;;  %s8802_s0 = inlined_call_operand.vmem [shape: bf16[2,12,12,32], index: 0, kind: input, shape index: {}]   ;;  %s8803_s2 = inlined_call_operand.vmem [shape: f32[1,1024], index: 2, kind: input, shape index: {}]   ;;  %s8804_s3 = inlined_call_operand.vmem [shape: bf16[2,1024], index: 3, kind: output, shape index: {}]  }
   0x1   :  { %v6580_v0 = vld [vmem:[%s8801_s1 + $0xc0] sm:$0xff]   ;;  %v6581_v1 = vld [vmem:[%s8801_s1 + $0x10] sm:$0xff]   ;;  %v6582_v2 = vld [vmem:[%s8801_s1 + $0xc8] sm:$0xff]   ;;  %vm68_vm5 = vsmask.f32 7440  ;;  %vm1232_vm10 = vcmask 1041408  }
   0x2   :  { %5930 = vmatprep.subr.bf16.mxu0 %v6580_v0  ;;  %5690 = vmatprep.subr.bf16.mxu1 %v6581_v1  ;;  %v6583_v3 = vld [vmem:[%s8801_s1 + $0x18] sm:$0xff]   ;;  %v6713_v4 = vld [vmem:[%s8802_s0 + $0x8] sm:$0xf]  ;;  %v6718_v5 = vld [vmem:[%s8802_s0 + $0xc] sm:$0x3]  ;;  %vm1233_vm11 = vcmask 1045508  }
   0x3   :  { %5931 = vmatpush3.bf16.msra.mxu0 %v6580_v0  ;;  %5691 = vmatpush3.bf16.msra.mxu1 %v6581_v1  ;;  %v6723_v6 = vld [vmem:[%s8802_s0 + $0x10] sm:$0xf]  ;;  %v6728_v7 = vld [vmem:[%s8802_s0 + $0x14] sm:$0x3]  ;;  %v6733_v8 = vld [vmem:[%s8802_s0 + $0x1c] sm:$0x3] }
   0x4   :  { %5932 = vmatprep.subr.bf16.mxu0 %v6582_v2  ;;  %5692 = vmatprep.subr.bf16.mxu1 %v6583_v3  ;;  %v6738_v9 = vld [vmem:[%s8802_s0 + $0x18] sm:$0xf]  ;;  %v6743_v10 = vld [vmem:[%s8802_s0 + $0x20] sm:$0xf]  ;;  %v6748_v11 = vld [vmem:[%s8802_s0 + $0x24] sm:$0x3] }
   0x5   :  { %v6753_v12 = vld [vmem:[%s8802_s0 + $0x28] sm:$0xf]  ;;  %v6758_v13 = vld [vmem:[%s8802_s0 + $0x2c] sm:$0x3]  ;;  %v6763_v14 = vld [vmem:[%s8802_s0 + $0x34] sm:$0x3]  ;;  %v6820_v39 = vcombine.low %v6723_v6, %v6738_v9 }
   0x6   :  { %vm6767_vm3 = vmor %vm646_vm0, %vm647_vm1  ;;  %v6774_v16 = vld [vmem:[%s8802_s0 + $0x30] sm:$0xf]  ;;  %v4973_v17 = vrot.slane %v6713_v4, 9  ;;  %v655_v18 = vrot.slane %v6718_v5, 5  ;;  %v4974_v19 = vrot.slane %v6723_v6, 9  ;;  %v659_v20 = vrot.slane %v6728_v7, 5 }
   0x7   :  { %5933 = vmatpush3.bf16.msra.mxu0 %v6582_v2  ;;  %5693 = vmatpush3.bf16.msra.mxu1 %v6583_v3  ;;  %v4975_v21 = vrot.slane %v6738_v9, 9  ;;  %v663_v22 = vrot.slane %v6733_v8, 5  ;;  %v4976_v23 = vrot.slane %v6743_v10, 9  ;;  %v6786_v24 = vld [vmem:[%s8801_s1] sm:$0xff]   ;;  %v667_v26 = vrot.slane %v6748_v11, 5  ;;  %v6585_v32 = vld [vmem:[%s8801_s1 + $0xd0] sm:$0xff]   ;;  %vm6889_vm6 = vmor %vm67_vm4, %vm68_vm5 }
   0x8   :  { %v6790_v25 = vsel %vm6767_vm3, %v4974_v19, %v659_v20  ;;  %v4977_v27 = vrot.slane %v6753_v12, 9  ;;  %v671_v29 = vrot.slane %v6758_v13, 5  ;;  %v4978_v30 = vrot.slane %v6774_v16, 9  ;;  %5710 = vmatprep.subr.bf16.mxu1 %v6786_v24  ;;  %v6806_v33 = vld [vmem:[%s8802_s0] sm:$0xf]  ;;  %5950 = vmatprep.subr.bf16.mxu0 %v6585_v32  ;;  %8967 = vst [vmem:[#allocation4_spill] sm:$0xff] %v6820_v39  ;;  %vm7501_vm12 = vmor %vm1232_vm10, %vm1233_vm11 }
   0x9   :  { %8965 = vst [vmem:[#allocation2_spill] sm:$0xff] %v6790_v25  ;;  %v664_v28 = vsel %vm6767_vm3, %v4975_v21, %v663_v22  ;;  %v675_v31 = vrot.slane %v6763_v14, 5  ;;  %v668_v34 = vsel %vm6767_vm3, %v4976_v23, %v667_v26  ;;  %v6825_v40 = vld [vmem:[%s8802_s0 + $0x4] sm:$0x3]  ;;  %v6829_v41 = vsel %vm6767_vm3, %v4973_v17, %v655_v18  ;;  %v6586_v44 = vld [vmem:[%s8801_s1 + $0xd8] sm:$0xff]  }
   0xa   :  { %v6811_v35 = vcombine.low %v6790_v25, %v664_v28  ;;  %v672_v37 = vsel %vm6767_vm3, %v4977_v27, %v671_v29  ;;  %8968 = vst [vmem:[#allocation5_spill] sm:$0xff] %v6829_v41  ;;  %v6844_v45 = vcombine.low %v6743_v10, %v6753_v12  ;;  %v6849_v48 = vcombine.low %v664_v28, %v668_v34  ;;  %v6872_v61 = vld [vmem:[%s8801_s1 + $0xe0] sm:$0xff]  }
   0xb   :  { %v6833_v42 = vsel %vm6767_vm3, %v4978_v30, %v675_v31  ;;  %v6835_v43 = vcombine.low %v668_v34, %v672_v37  ;;  %v938_v50 = vshrl.u32 %v6748_v11, 16  ;;  %v8810_v51 = vshrl.u32 %v6806_v33, 16  ;;  %v6900_v30 = vld [vmem:[%s8802_s0 + $0x3c] sm:$0x3] }
   0xc   :  { %8966 = vst [vmem:[#allocation3_spill] sm:$0xff] %v6811_v35  ;;  %5934 = vmatprep.mubr.msk.bf16.mxu0 %vm335_vm2, %v6811_v35  ;;  %8970 = vst [vmem:[#allocation7_spill] sm:$0xff] %v6844_v45  ;;  %v6852_v49 = vcombine.low %v672_v37, %v6833_v42  ;;  %v8809_v52 = vshll.u32 %v6806_v33, 16  ;;  %v8808_v53 = vshll.u32 %v6825_v40, 16  ;;  %v8807_v54 = vshrl.u32 %v6713_v4, 16 }
   0xd   :  { %8969 = vst [vmem:[#allocation6_spill] sm:$0xff] %v6835_v43  ;;  %8971 = vst [vmem:[#allocation8_spill] sm:$0xff] %v6849_v48  ;;  %5935 = vmatmul.mubr.msk.bf16.vlgmr.msra.gmra.mrb[0].mxu0 %vm335_vm2, %v6835_v43  ;;  %v8806_v55 = vshll.u32 %v6713_v4, 16  ;;  %v8805_v56 = vshll.u32 %v6718_v5, 16  ;;  %v73_v57 = vrot.slane %v8810_v51, 4  ;;  %v8815_v59 = vshrl.u32 %v6723_v6, 16 }
   0xe   :  { %8972 = vst [vmem:[#allocation9_spill] sm:$0xff] %v6852_v49  ;;  %5951 = vmatpush3.bf16.msra.mxu0 %v6585_v32  ;;  %v76_v58 = vrot.slane %v8809_v52, 5  ;;  %v8814_v60 = vshll.u32 %v6723_v6, 16  ;;  %v82_v62 = vrot.slane %v8808_v53, 5  ;;  %v87_v63 = vrot.slane %v8807_v54, 4 }
   0xf   :  { %5952 = vmatprep.subr.bf16.mxu0 %v6586_v44  ;;  %v90_v0 = vrot.slane %v8806_v55, 5  ;;  %v96_v1 = vrot.slane %v8805_v56, 5  ;;  %v101_v3 = vrot.slane %v8815_v59, 4  ;;  %v108_v18 = vshll.u32 %v6728_v7, 16  ;;  %v6933_v56 = vld [vmem:[%s8802_s0 + $0x48] sm:$0xf] }
  0x10   :  { %v77_v2 = vor.u32 %v76_v58, %v73_v57  ;;  %v104_v17 = vrot.slane %v8814_v60, 5  ;;  %v8813_v21 = vshrl.u32 %v6738_v9, 16  ;;  %v8812_v22 = vshll.u32 %v6738_v9, 16  ;;  %v6916_v57 = vld [vmem:[%s8802_s0 + $0x44] sm:$0x3]  ;;  %8978 = vst [vmem:[#allocation13_spill] sm:$0xff] %v6933_v56 }
  0x11   :  { %v91_v20 = vor.u32 %v90_v0, %v87_v63  ;;  %v8811_v23 = vshll.u32 %v6733_v8, 16  ;;  %v948_v26 = vshrl.u32 %v6758_v13, 16  ;;  %v110_v29 = vrot.slane %v108_v18, 5  ;;  %8976 = vst [vmem:[#allocation11_spill] sm:$0xff] %v6916_v57 }
  0x12   :  { %5953 = vmatpush3.bf16.msra.mxu0 %v6586_v44  ;;  %v78_v27 = vrot.slane %v77_v2, 4  ;;  %v105_v28 = vor.u32 %v104_v17, %v101_v3  ;;  %v115_v34 = vrot.slane %v8813_v21, 4  ;;  %v118_v37 = vrot.slane %v8812_v22, 5  ;;  %v6911_v44 = vld [vmem:[%s8802_s0 + $0x40] sm:$0xf] }
  0x13   :  { %5970 = vmatprep.subr.bf16.mxu0 %v6872_v61  ;;  %v92_v32 = vrot.slane %v91_v20, 4  ;;  %8975 = vst [vmem:[#allocation10_spill] sm:$0xff] %v6911_v44  ;;  %v6922_v3 = vrot.slane %v938_v50, 5  ;;  %v124_v47 = vrot.slane %v8811_v23, 5  ;;  %v6940_v50 = vrot.slane %v948_v26, 5  ;;  %v7012_v23 = vld [vmem:[%s8801_s1 + $0x20] sm:$0xff]  }
  0x14   :  { %v83_v0 = vsel %vm6889_vm6, %v78_v27, %v82_v62  ;;  %v106_v2 = vrot.slane %v105_v28, 4  ;;  %v119_v20 = vor.u32 %v118_v37, %v115_v34  ;;  %v6938_v62 = vld [vmem:[%s8802_s0 + $0x4c] sm:$0x3]  ;;  %v6947_v28 = vrot.slane %v108_v18, 6 }
  0x15   :  { %v6926_v17 = vsel %vm6889_vm6, %v92_v32, %v96_v1  ;;  %8979 = vst [vmem:[#allocation14_spill] sm:$0xff] %v6938_v62  ;;  %v6952_v32 = vld [vmem:[%s8802_s0 + $0x38] sm:$0xf]  ;;  %v679_v55 = vrot.slane %v6900_v30, 5  ;;  %v1839_v18 = vrot.slane %v6916_v57, 5  ;;  %v127_v54 = vshrl.u32 %v6743_v10, 16 }
  0x16   :  { %8977 = vst [vmem:[#allocation12_spill] sm:$0xff] %v6926_v17  ;;  %v6944_v1 = vsel %vm6889_vm6, %v106_v2, %v110_v29  ;;  %v4936_v27 = vcombine.low %v83_v0, %v6926_v17  ;;  %v120_v34 = vrot.slane %v119_v20, 4  ;;  %v4979_v26 = vrot.slane %v6952_v32, 9 }
  0x17   :  { %8980 = vst [vmem:[#allocation15_spill] sm:$0xff] %v6944_v1  ;;  %v5114_v29 = vrot.slane %v6911_v44, 9  ;;  %v5216_v0 = vrot.slane %v6933_v56, 9  ;;  %v2679_v2 = vrot.slane %v6938_v62, 5  ;;  %v8822_v60 = vshll.u32 %v6774_v16, 16 }
  0x18   :  { %5694 = vmatprep.mubr.msk.bf16.mxu1 %vm335_vm2, %v4936_v27  ;;  %v6965_v20 = vsel %vm6889_vm6, %v120_v34, %v124_v47  ;;  %v6969_v37 = vsel %vm6767_vm3, %v4979_v26, %v679_v55  ;;  %v130_v27 = vshll.u32 %v6743_v10, 16  ;;  %v6587_v10 = vld [vmem:[%s8801_s1 + $0x8] sm:$0xff]   ;;  %v129_v26 = vrot.slane %v127_v54, 4 }
  0x19   :  { %8981 = vst [vmem:[#allocation16_spill] sm:$0xff] %v6965_v20  ;;  %8982 = vst [vmem:[#allocation17_spill] sm:$0xff] %v6969_v37  ;;  %v6975_v53 = vcombine.low %v6944_v1, %v6965_v20  ;;  %v6979_v52 = vcombine.low %v6833_v42, %v6969_v37  ;;  %v6983_v47 = vsel %vm6767_vm3, %v5114_v29, %v1839_v18  ;;  %v136_v42 = vshll.u32 %v6748_v11, 16 }
  0x1a   :  { %8985 = vst [vmem:[#allocation20_spill] sm:$0xff] %v6983_v47  ;;  %v6987_v55 = vsel %vm6767_vm3, %v5216_v0, %v2679_v2  ;;  %v132_v51 = vrot.slane %v130_v27, 5  ;;  %v141_v29 = vshrl.u32 %v6753_v12, 16  ;;  %v144_v18 = vshll.u32 %v6753_v12, 16 }
  0x1b   :  { %8983 = vst [vmem:[#allocation18_spill] sm:$0xff] %v6975_v53  ;;  %8984 = vst [vmem:[#allocation19_spill] sm:$0xff] %v6979_v52  ;;  %v6994_v34 = vcombine.low %v6983_v47, %v6987_v55  ;;  %5695 = vmatmul.mubr.msk.bf16.vlgmr.msra.gmra.mrb[0].mxu1 %vm335_vm2, %v6975_v53  ;;  %5938 = vmatprep.mubr.msk.bf16.mxu0 %vm335_vm2, %v6979_v52  ;;  %v150_v0 = vshll.u32 %v6758_v13, 16  ;;  %v934_v2 = vrot.slane %v127_v54, 5  ;;  %v138_v63 = vrot.slane %v136_v42, 5 }
  0x1c   :  { %8986 = vst [vmem:[#allocation21_spill] sm:$0xff] %v6987_v55  ;;  %5711 = vmatpush3.bf16.msra.mxu1 %v6786_v24  ;;  %v133_v36 = vor.u32 %v132_v51, %v129_v26  ;;  %v935_v58 = vrot.slane %v130_v27, 6  ;;  %v7007_v38 = vrot.slane %v136_v42, 6  ;;  %v143_v31 = vrot.slane %v141_v29, 4 }
  0x1d   :  { %8987 = vst [vmem:[#allocation22_spill] sm:$0xff] %v6994_v34  ;;  %5939 = vmatmul.mubr.msk.bf16.gmra.mrb[4].mxu0 %vm335_vm2, %v6994_v34  ;;  %v146_v12 = vrot.slane %v144_v18, 5  ;;  %v152_v22 = vrot.slane %v150_v0, 5  ;;  %v944_v21 = vrot.slane %v141_v29, 5  ;;  %5712 = vmatprep.subr.bf16.mxu1 %v6587_v10  ;;  %v945_v51 = vrot.slane %v144_v18, 6 }
  0x1e   :  { %v134_v54 = vrot.slane %v133_v36, 4  ;;  %v936_v24 = vor.u32 %v935_v58, %v934_v2  ;;  %v942_v46 = vor.u32 %v7007_v38, %v6922_v3  ;;  %v951_v27 = vrot.slane %v150_v0, 6 }
  0x1f   :  { %v147_v26 = vor.u32 %v146_v12, %v143_v31  ;;  %v8823_v42 = vshrl.u32 %v6774_v16, 16  ;;  %v946_v34 = vor.u32 %v945_v51, %v944_v21  ;;  %v8821_v29 = vshll.u32 %v6763_v14, 16 }
  0x20   :  { %v7020_v59 = vsel %vm6889_vm6, %v134_v54, %v138_v63  ;;  %v937_v53 = vrot.slane %v936_v24, 4  ;;  %5713 = vmatpush3.bf16.msra.mxu1 %v6587_v10  ;;  %v952_v58 = vor.u32 %v951_v27, %v6940_v50  ;;  %v160_v31 = vrot.slane %v8822_v60, 5 }
  0x21   :  { %8988 = vst [vmem:[#allocation23_spill] sm:$0xff] %v7020_v59  ;;  %v148_v36 = vrot.slane %v147_v26, 4  ;;  %v157_v38 = vrot.slane %v8823_v42, 4  ;;  %5730 = vmatprep.subr.bf16.mxu1 %v7012_v23  ;;  %v947_v3 = vrot.slane %v946_v34, 4  ;;  %v166_v63 = vrot.slane %v8821_v29, 5 }
  0x22   :  { %v8820_v21 = vshrl.u32 %v6952_v32, 16  ;;  %v8819_v18 = vshll.u32 %v6952_v32, 16  ;;  %v8818_v0 = vshll.u32 %v6900_v30, 16  ;;  %vm891_vm7 = vsmask.f32 2304 }
  0x23   :  { %v153_v10 = vsel %vm6889_vm6, %v148_v36, %v152_v22  ;;  %v161_v50 = vor.u32 %v160_v31, %v157_v38  ;;  %vm892_vm8 = vsmask.f32 6416  ;;  %v8990_v22 = vshrl.u32 %v6723_v6, 16  ;;  %v7052_v36 = vld [vmem:[%s8802_s0 + $0x60] sm:$0xf] }
  0x24   :  { %v7037_v2 = vcombine.low %v7020_v59, %v153_v10  ;;  %v171_v34 = vrot.slane %v8820_v21, 4  ;;  %v174_v12 = vrot.slane %v8819_v18, 5  ;;  %v180_v24 = vrot.slane %v8818_v0, 5  ;;  %vm7056_vm9 = vmor %vm891_vm7, %vm892_vm8  ;;  %v7069_v21 = vld [vmem:[%s8802_s0 + $0x64] sm:$0x3] }
  0x25   :  { %v162_v54 = vrot.slane %v161_v50, 4  ;;  %v914_v51 = vrot.slane %v8990_v22, 5  ;;  %v8991_v26 = vshll.u32 %v6723_v6, 16  ;;  %v8994_v50 = vshrl.u32 %v6728_v7, 16  ;;  %8997 = vst [vmem:[#allocation25_spill] sm:$0xff] %v7069_v21 }
  0x26   :  { %8989 = vst [vmem:[#allocation24_spill] sm:$0xff] %v7037_v2  ;;  %5698 = vmatprep.mubr.msk.bf16.mxu1 %vm335_vm2, %v7037_v2  ;;  %v175_v38 = vor.u32 %v174_v12, %v171_v34  ;;  %v8995_v22 = vshrl.u32 %v6738_v9, 16  ;;  %v8998_v29 = vshrl.u32 %v6733_v8, 16  ;;  %v8999_v7 = vshll.u32 %v6733_v8, 16 }
  0x27   :  { %v915_v27 = vrot.slane %v8991_v26, 6  ;;  %v920_v0 = vrot.slane %v8994_v50, 5  ;;  %v8996_v26 = vshll.u32 %v6738_v9, 16  ;;  %v167_v34 = vsel %vm6889_vm6, %v162_v54, %v166_v63  ;;  %v7080_v9 = vld [vmem:[%s8802_s0 + $0x68] sm:$0xf] }
  0x28   :  { %v924_v6 = vrot.slane %v8995_v22, 5  ;;  %v930_v60 = vrot.slane %v8998_v29, 5  ;;  %v931_v50 = vrot.slane %v8999_v7, 6  ;;  %v176_v22 = vrot.slane %v175_v38, 4  ;;  %v7088_v63 = vld [vmem:[%s8802_s0 + $0x6c] sm:$0x3] }
  0x29   :  { %v925_v18 = vrot.slane %v8996_v26, 6  ;;  %v916_v12 = vor.u32 %v915_v27, %v914_v51  ;;  %v7082_v26 = vcombine.low %v153_v10, %v167_v34  ;;  %v922_v42 = vor.u32 %v6947_v28, %v920_v0  ;;  %9001 = vst [vmem:[#allocation27_spill] sm:$0xff] %v7088_v63  ;;  %v7101_v28 = vld [vmem:[%s8802_s0 + $0x70] sm:$0xf] }
  0x2a   :  { %v932_v54 = vor.u32 %v931_v50, %v930_v60  ;;  %v7092_v8 = vsel %vm7056_vm9, %v937_v53, %v942_v46  ;;  %v7096_v51 = vsel %vm7056_vm9, %v947_v3, %v952_v58  ;;  %v8828_v46 = vshrl.u32 %v7052_v36, 16  ;;  %v7115_v53 = vld [vmem:[%s8802_s0 + $0x74] sm:$0x3]  ;;  %v7120_v58 = vld [vmem:[%s8802_s0 + $0x78] sm:$0xf] }
  0x2b   :  { %9000 = vst [vmem:[#allocation26_spill] sm:$0xff] %v7082_v26  ;;  %v926_v2 = vor.u32 %v925_v18, %v924_v6  ;;  %v917_v29 = vrot.slane %v916_v12, 4  ;;  %9002 = vst [vmem:[#allocation28_spill] sm:$0xff] %v7092_v8  ;;  %v7105_v18 = vsel %vm6889_vm6, %v176_v22, %v180_v24  ;;  %v7109_v60 = vcombine.low %v7092_v8, %v7096_v51  ;;  %v7153_v22 = vld [vmem:[%s8802_s0 + $0x7c] sm:$0x3] }
  0x2c   :  { %9003 = vst [vmem:[#allocation29_spill] sm:$0xff] %v7105_v18  ;;  %v7123_v3 = vcombine.low %v167_v34, %v7105_v18  ;;  %v8827_v24 = vshll.u32 %v7069_v21, 16  ;;  %v185_v38 = vrot.slane %v8828_v46, 4  ;;  %v8833_v6 = vshrl.u32 %v7080_v9, 16 }
  0x2d   :  { %v927_v10 = vrot.slane %v926_v2, 4  ;;  %9004 = vst [vmem:[#allocation30_spill] sm:$0xff] %v7109_v60  ;;  %v7127_v0 = vsel %vm7056_vm9, %v917_v29, %v922_v42  ;;  %v8826_v2 = vshll.u32 %v7052_v36, 16  ;;  %v8834_v34 = vshll.u32 %v7080_v9, 16  ;;  %v6591_v29 = vld [vmem:[%s8801_s1 + $0xe8] sm:$0xff]  }
  0x2e   :  { %9005 = vst [vmem:[#allocation31_spill] sm:$0xff] %v7123_v3  ;;  %9006 = vst [vmem:[#allocation32_spill] sm:$0xff] %v7127_v0  ;;  %5699 = vmatmul.mubr.msk.bf16.gmra.mrb[4].mxu1 %vm335_vm2, %v7123_v3  ;;  %v194_v7 = vrot.slane %v8827_v24, 5  ;;  %v8837_v50 = vshll.u32 %v7088_v63, 16  ;;  %v8840_v24 = vshll.u32 %v7101_v28, 16  ;;  %v8842_v25 = vshrl.u32 %v7120_v58, 16 }
  0x2f   :  { %v7133_v27 = vsel %vm7056_vm9, %v927_v10, %v932_v54  ;;  %v188_v12 = vrot.slane %v8826_v2, 5  ;;  %v199_v54 = vrot.slane %v8833_v6, 4  ;;  %v202_v10 = vrot.slane %v8834_v34, 5 }
  0x30   :  { %9007 = vst [vmem:[#allocation33_spill] sm:$0xff] %v7133_v27  ;;  %v7143_v42 = vcombine.low %v7127_v0, %v7133_v27  ;;  %v8839_v2 = vshrl.u32 %v7101_v28, 16  ;;  %v208_v3 = vrot.slane %v8837_v50, 5  ;;  %v8844_v0 = vshll.u32 %v7115_v53, 16 }
  0x31   :  { %v189_v46 = vor.u32 %v188_v12, %v185_v38  ;;  %v203_v6 = vor.u32 %v202_v10, %v199_v54  ;;  %v216_v1 = vrot.slane %v8840_v24, 5  ;;  %v8843_v17 = vshll.u32 %v7120_v58, 16 }
  0x32   :  { %9008 = vst [vmem:[#allocation34_spill] sm:$0xff] %v7143_v42  ;;  %5954 = vmatprep.mubr.msk.bf16.mxu0 %vm335_vm2, %v7143_v42  ;;  %v213_v34 = vrot.slane %v8839_v2, 4  ;;  %v222_v12 = vrot.slane %v8844_v0, 5  ;;  %v227_v50 = vrot.slane %v8842_v25, 4  ;;  %v8848_v27 = vshll.u32 %v7153_v22, 16 }
  0x33   :  { %5955 = vmatmul.mubr.msk.bf16.vlgmr.msra.gmra.mrb[0].mxu0 %vm335_vm2, %v7109_v60  ;;  %v190_v38 = vrot.slane %v189_v46, 4  ;;  %v204_v54 = vrot.slane %v203_v6, 4  ;;  %v230_v2 = vrot.slane %v8843_v17, 5  ;;  %v9009_v24 = vshrl.u32 %v6774_v16, 16  ;;  %v7190_v46 = vld [vmem:[%s8801_s1 + $0xf0] sm:$0xff]  }
  0x34   :  { %5971 = vmatpush3.bf16.msra.mxu0 %v6872_v61  ;;  %v217_v10 = vor.u32 %v216_v1, %v213_v34  ;;  %v236_v61 = vrot.slane %v8848_v27, 5  ;;  %v9010_v1 = vshll.u32 %v6774_v16, 16  ;;  %v958_v34 = vshrl.u32 %v6763_v14, 16  ;;  %v9205_v15 = vld [vmem:[#allocation30_spill] sm:$0xff] }
  0x35   :  { %v954_v8 = vrot.slane %v9009_v24, 5  ;;  %5972 = vmatprep.subr.bf16.mxu0 %v6591_v29  ;;  %v195_v25 = vsel %vm6889_vm6, %v190_v38, %v194_v7  ;;  %v7201_v24 = vsel %vm6889_vm6, %v204_v54, %v208_v3  ;;  %v231_v0 = vor.u32 %v230_v2, %v227_v50 }
  0x36   :  { %v955_v6 = vrot.slane %v9010_v1, 6  ;;  %9011 = vst [vmem:[#allocation35_spill] sm:$0xff] %v7201_v24  ;;  %v218_v17 = vrot.slane %v217_v10, 4  ;;  %v9012_v55 = vshll.u32 %v6763_v14, 16  ;;  %v4940_v37 = vcombine.low %v195_v25, %v7201_v24 }
  0x37   :  { %v960_v38 = vrot.slane %v958_v34, 5  ;;  %v9013_v27 = vshrl.u32 %v6952_v32, 16  ;;  %v232_v1 = vrot.slane %v231_v0, 4  ;;  %v9015_v3 = vshll.u32 %v6952_v32, 16 }
  0x38   :  { %v961_v49 = vrot.slane %v9012_v55, 6  ;;  %v956_v7 = vor.u32 %v955_v6, %v954_v8  ;;  %5973 = vmatpush3.bf16.msra.mxu0 %v6591_v29  ;;  %v7210_v16 = vsel %vm6889_vm6, %v218_v17, %v222_v12  ;;  %v968_v2 = vshrl.u32 %v6900_v30, 16  ;;  %5702 = vmatprep.mubr.msk.bf16.mxu1 %vm335_vm2, %v4940_v37 }
  0x39   :  { %v964_v47 = vrot.slane %v9013_v27, 5  ;;  %9014 = vst [vmem:[#allocation36_spill] sm:$0xff] %v7210_v16  ;;  %v965_v54 = vrot.slane %v9015_v3, 6  ;;  %5990 = vmatprep.subr.bf16.mxu0 %v7190_v46  ;;  %v9016_v55 = vshll.u32 %v6900_v30, 16  ;;  %v8854_v27 = vshrl.u32 %v6911_v44, 16 }
  0x3a   :  { %v957_v14 = vrot.slane %v956_v7, 4  ;;  %v962_v25 = vor.u32 %v961_v49, %v960_v38  ;;  %v7222_v17 = vsel %vm6889_vm6, %v232_v1, %v236_v61  ;;  %v970_v50 = vrot.slane %v968_v2, 5  ;;  %v7237_v61 = vld [vmem:[%s8802_s0 + $0x80] sm:$0xf] }
  0x3b   :  { %v971_v8 = vrot.slane %v9016_v55, 6  ;;  %9017 = vst [vmem:[#allocation37_spill] sm:$0xff] %v7222_v17  ;;  %v966_v0 = vor.u32 %v965_v54, %v964_v47  ;;  %v8853_v29 = vshll.u32 %v6911_v44, 16  ;;  %v7227_v12 = vcombine.low %v7210_v16, %v7222_v17  ;;  %v7260_v55 = vld [vmem:[%s8802_s0 + $0x84] sm:$0x3] }
  0x3c   :  { %v963_v49 = vsel %vm7056_vm9, %v957_v14, %v962_v25  ;;  %v8850_v37 = vshll.u32 %v6916_v57, 16  ;;  %v2009_v10 = vrot.slane %v8854_v27, 5  ;;  %v2013_v38 = vshrl.u32 %v6916_v57, 16 }
  0x3d   :  { %9018 = vst [vmem:[#allocation38_spill] sm:$0xff] %v7227_v12  ;;  %v967_v47 = vrot.slane %v966_v0, 4  ;;  %v972_v6 = vor.u32 %v971_v8, %v970_v50  ;;  %v7240_v34 = vcombine.low %v7096_v51, %v963_v49  ;;  %v2010_v7 = vrot.slane %v8853_v29, 6  ;;  %5703 = vmatmul.mubr.msk.bf16.gmra.mrb[8].mxu1 %vm335_vm2, %v7227_v12  ;;  %v7265_v8 = vld [vmem:[%s8802_s0 + $0x88] sm:$0xf] }
  0x3e   :  { %v2016_v1 = vrot.slane %v8850_v37, 6  ;;  %v8851_v3 = vshrl.u32 %v6933_v56, 16  ;;  %v8852_v54 = vshll.u32 %v6933_v56, 16  ;;  %v8857_v14 = vshll.u32 %v6938_v62, 16 }
  0x3f   :  { %9019 = vst [vmem:[#allocation39_spill] sm:$0xff] %v7240_v34  ;;  %v7253_v2 = vsel %vm7056_vm9, %v967_v47, %v972_v6  ;;  %v2011_v51 = vor.u32 %v2010_v7, %v2009_v10  ;;  %v2829_v25 = vshrl.u32 %v6938_v62, 16  ;;  %v2015_v50 = vrot.slane %v2013_v38, 5  ;;  %v7277_v6 = vld [vmem:[%s8802_s0 + $0x8c] sm:$0x3] }
  0x40   :  { %9020 = vst [vmem:[#allocation40_spill] sm:$0xff] %v7253_v2  ;;  %v7268_v0 = vcombine.low %v963_v49, %v7253_v2  ;;  %v2825_v10 = vrot.slane %v8851_v3, 5  ;;  %v2826_v47 = vrot.slane %v8852_v54, 6  ;;  %v7282_v7 = vld [vmem:[%s8802_s0 + $0x90] sm:$0xf]  ;;  %v2832_v38 = vrot.slane %v8857_v14, 6 }
  0x41   :  { %v2012_v37 = vrot.slane %v2011_v51, 4  ;;  %v2831_v49 = vrot.slane %v2829_v25, 5  ;;  %v239_v3 = vshrl.u32 %v7237_v61, 16  ;;  %v7290_v54 = vld [vmem:[%s8802_s0 + $0x94] sm:$0x3]  ;;  %v2017_v29 = vor.u32 %v2016_v1, %v2015_v50 }
  0x42   :  { %9021 = vst [vmem:[#allocation41_spill] sm:$0xff] %v7268_v0  ;;  %5958 = vmatprep.mubr.msk.bf16.mxu0 %vm335_vm2, %v7268_v0  ;;  %v2827_v27 = vor.u32 %v2826_v47, %v2825_v10  ;;  %v242_v12 = vshll.u32 %v7237_v61, 16  ;;  %v248_v51 = vshll.u32 %v7260_v55, 16  ;;  %v253_v14 = vshrl.u32 %v7265_v8, 16  ;;  %v7301_v34 = vld [vmem:[%s8802_s0 + $0x98] sm:$0xf] }
  0x43   :  { %v2833_v25 = vor.u32 %v2832_v38, %v2831_v49  ;;  %v241_v24 = vrot.slane %v239_v3, 4  ;;  %v8868_v16 = vshll.u32 %v7265_v8, 16  ;;  %v7305_v2 = vsel %vm7056_vm9, %v2012_v37, %v2017_v29  ;;  %v7310_v47 = vld [vmem:[%s8802_s0 + $0x9c] sm:$0x3] }
  0x44   :  { %9022 = vst [vmem:[#allocation42_spill] sm:$0xff] %v7305_v2  ;;  %v2828_v1 = vrot.slane %v2827_v27, 4  ;;  %v244_v50 = vrot.slane %v242_v12, 5  ;;  %v250_v10 = vrot.slane %v248_v51, 5  ;;  %v255_v49 = vrot.slane %v253_v14, 4 }
  0x45   :  { %v258_v38 = vrot.slane %v8868_v16, 5  ;;  %v262_v48 = vshll.u32 %v7277_v6, 16  ;;  %v267_v17 = vshrl.u32 %v7282_v7, 16  ;;  %v270_v37 = vshll.u32 %v7282_v7, 16 }
  0x46   :  { %v7318_v29 = vsel %vm7056_vm9, %v2828_v1, %v2833_v25  ;;  %v245_v27 = vor.u32 %v244_v50, %v241_v24  ;;  %v8874_v26 = vshll.u32 %v7290_v54, 16  ;;  %v8879_v25 = vshrl.u32 %v7301_v34, 16 }
  0x47   :  { %9023 = vst [vmem:[#allocation43_spill] sm:$0xff] %v7318_v29  ;;  %v7324_v18 = vcombine.low %v7305_v2, %v7318_v29  ;;  %v259_v0 = vor.u32 %v258_v38, %v255_v49  ;;  %v264_v20 = vrot.slane %v262_v48, 5  ;;  %v269_v16 = vrot.slane %v267_v17, 4 }
  0x48   :  { %v246_v59 = vrot.slane %v245_v27, 4  ;;  %v272_v60 = vrot.slane %v270_v37, 5  ;;  %v278_v42 = vrot.slane %v8874_v26, 5  ;;  %v8883_v1 = vshll.u32 %v7301_v34, 16 }
  0x49   :  { %9024 = vst [vmem:[#allocation44_spill] sm:$0xff] %v7324_v18  ;;  %5959 = vmatmul.mubr.msk.bf16.gmra.mrb[4].mxu0 %vm335_vm2, %v7324_v18  ;;  %v260_v24 = vrot.slane %v259_v0, 4  ;;  %v9025_v29 = vshrl.u32 %v7101_v28, 16  ;;  %v283_v26 = vrot.slane %v8879_v25, 4  ;;  %v9027_v2 = vshll.u32 %v7101_v28, 16 }
  0x4a   :  { %v7337_v38 = vsel %vm6889_vm6, %v246_v59, %v250_v10  ;;  %v273_v27 = vor.u32 %v272_v60, %v269_v16  ;;  %v286_v50 = vrot.slane %v8883_v1, 5  ;;  %v998_v59 = vshrl.u32 %v7115_v53, 16 }
  0x4b   :  { %v994_v49 = vrot.slane %v9025_v29, 5  ;;  %9026 = vst [vmem:[#allocation45_spill] sm:$0xff] %v7337_v38  ;;  %v995_v52 = vrot.slane %v9027_v2, 6  ;;  %v7345_v0 = vsel %vm6889_vm6, %v260_v24, %v264_v20  ;;  %v9029_v29 = vshll.u32 %v7310_v47, 16 }
  0x4c   :  { %9028 = vst [vmem:[#allocation46_spill] sm:$0xff] %v7345_v0  ;;  %v7354_v60 = vcombine.low %v7337_v38, %v7345_v0  ;;  %v274_v16 = vrot.slane %v273_v27, 4  ;;  %v9031_v2 = vshll.u32 %v7115_v53, 16  ;;  %v287_v43 = vor.u32 %v286_v50, %v283_v26 }
  0x4d   :  { %v292_v18 = vrot.slane %v9029_v29, 5  ;;  %v996_v10 = vor.u32 %v995_v52, %v994_v49  ;;  %v1000_v20 = vrot.slane %v998_v59, 5  ;;  %v9032_v24 = vshrl.u32 %v7120_v58, 16 }
  0x4e   :  { %9030 = vst [vmem:[#allocation47_spill] sm:$0xff] %v7354_v60  ;;  %v1001_v25 = vrot.slane %v9031_v2, 6  ;;  %v9033_v1 = vshll.u32 %v7120_v58, 16  ;;  %5706 = vmatprep.mubr.msk.bf16.mxu1 %vm335_vm2, %v7354_v60  ;;  %v7366_v29 = vsel %vm6889_vm6, %v274_v16, %v278_v42  ;;  %v1008_v52 = vshrl.u32 %v7153_v22, 16 }
  0x4f   :  { %v1004_v35 = vrot.slane %v9032_v24, 5  ;;  %v997_v27 = vrot.slane %v996_v10, 4  ;;  %v9034_v49 = vshll.u32 %v7153_v22, 16  ;;  %v288_v50 = vrot.slane %v287_v43, 4 }
  0x50   :  { %v1005_v63 = vrot.slane %v9033_v1, 6  ;;  %v1002_v59 = vor.u32 %v1001_v25, %v1000_v20  ;;  %v1014_v24 = vrot.slane %v239_v3, 5  ;;  %v1010_v38 = vrot.slane %v1008_v52, 5 }
  0x51   :  { %v1011_v26 = vrot.slane %v9034_v49, 6  ;;  %v1015_v0 = vrot.slane %v242_v12, 6  ;;  %v1018_v1 = vshrl.u32 %v7260_v55, 16  ;;  %v1021_v21 = vrot.slane %v248_v51, 6 }
  0x52   :  { %v1006_v2 = vor.u32 %v1005_v63, %v1004_v35  ;;  %v7374_v60 = vsel %vm6889_vm6, %v288_v50, %v292_v18  ;;  %v7378_v42 = vsel %vm7056_vm9, %v997_v27, %v1002_v59  ;;  %v1024_v10 = vrot.slane %v253_v14, 5  ;;  %v7390_v27 = vld [vmem:[%s8802_s0 + $0xa0] sm:$0xf] }
  0x53   :  { %9035 = vst [vmem:[#allocation48_spill] sm:$0xff] %v7374_v60  ;;  %9036 = vst [vmem:[#allocation49_spill] sm:$0xff] %v7378_v42  ;;  %v7382_v43 = vcombine.low %v7366_v29, %v7374_v60  ;;  %v1012_v35 = vor.u32 %v1011_v26, %v1010_v38  ;;  %v1016_v63 = vor.u32 %v1015_v0, %v1014_v24  ;;  %v1020_v12 = vrot.slane %v1018_v1, 5  ;;  %v7551_v60 = vld [vmem:[%s8802_s0 + $0x4] sm:$0x3] }
  0x54   :  { %v1007_v16 = vrot.slane %v1006_v2, 4  ;;  %v9038_v3 = vshll.u32 %v7265_v8, 16  ;;  %v1028_v25 = vshrl.u32 %v7277_v6, 16  ;;  %v1031_v18 = vrot.slane %v262_v48, 6  ;;  %9055 = vst [vmem:[#allocation59_spill] sm:$0xff] %v7551_v60 }
  0x55   :  { %9037 = vst [vmem:[#allocation50_spill] sm:$0xff] %v7382_v43  ;;  %v1034_v20 = vrot.slane %v267_v17, 5  ;;  %5707 = vmatmul.mubr.msk.bf16.gmra.mrb[12].mxu1 %vm335_vm2, %v7382_v43  ;;  %v1017_v38 = vrot.slane %v1016_v63, 4  ;;  %v1022_v0 = vor.u32 %v1021_v21, %v1020_v12  ;;  %v1035_v52 = vrot.slane %v270_v37, 6  ;;  %v7410_v21 = vld [vmem:[%s8802_s0 + $0xa4] sm:$0x3] }
  0x56   :  { %v1025_v51 = vrot.slane %v9038_v3, 6  ;;  %v7396_v14 = vsel %vm7056_vm9, %v1007_v16, %v1012_v35  ;;  %v1030_v49 = vrot.slane %v1028_v25, 5  ;;  %v9041_v26 = vcombine.low %v6806_v33, %v6713_v4 }
  0x57   :  { %9039 = vst [vmem:[#allocation51_spill] sm:$0xff] %v7396_v14  ;;  %v7400_v48 = vcombine.low %v7378_v42, %v7396_v14  ;;  %v1038_v50 = vshrl.u32 %v7290_v54, 16  ;;  %v7414_v37 = vsel %vm7056_vm9, %v1017_v38, %v1022_v0  ;;  %v1036_v59 = vor.u32 %v1035_v52, %v1034_v20  ;;  %v7435_v52 = vld [vmem:[%s8802_s0 + $0xac] sm:$0x3]  ;;  %v7510_v42 = vld [vmem:[%s8802_s0 + $0x10] sm:$0xf] }
  0x58   :  { %v1026_v17 = vor.u32 %v1025_v51, %v1024_v10  ;;  %5714 = vmatprep.mubr.msk.bf16.mxu1 %vm335_vm2, %v9041_v26  ;;  %9042 = vst [vmem:[#allocation53_spill] sm:$0xff] %v7414_v37  ;;  %v9043_v2 = vshll.u32 %v7290_v54, 16  ;;  %v9044_v1 = vshrl.u32 %v7301_v34, 16  ;;  %v1032_v35 = vor.u32 %v1031_v18, %v1030_v49  ;;  %v7427_v51 = vld [vmem:[%s8802_s0 + $0xa8] sm:$0xf]  ;;  %9053 = vst [vmem:[#allocation57_spill] sm:$0xff] %v7510_v42 }
  0x59   :  { %9040 = vst [vmem:[#allocation52_spill] sm:$0xff] %v7400_v48  ;;  %5962 = vmatprep.mubr.msk.bf16.mxu0 %vm335_vm2, %v7400_v48  ;;  %v1040_v63 = vrot.slane %v1038_v50, 5  ;;  %v9045_v12 = vshll.u32 %v7301_v34, 16  ;;  %v1037_v25 = vrot.slane %v1036_v59, 4  ;;  %v1048_v20 = vshrl.u32 %v7310_v47, 16 }
  0x5a   :  { %v1041_v24 = vrot.slane %v9043_v2, 6  ;;  %v1044_v16 = vrot.slane %v9044_v1, 5  ;;  %v1027_v10 = vrot.slane %v1026_v17, 4  ;;  %v9046_v38 = vshll.u32 %v7310_v47, 16 }
  0x5b   :  { %v1045_v3 = vrot.slane %v9045_v12, 6  ;;  %v8893_v18 = vshrl.u32 %v7390_v27, 16  ;;  %v8892_v50 = vshll.u32 %v7390_v27, 16  ;;  %v1050_v2 = vrot.slane %v1048_v20, 5 }
  0x5c   :  { %v1051_v0 = vrot.slane %v9046_v38, 6  ;;  %v7440_v17 = vsel %vm7056_vm9, %v1027_v10, %v1032_v35  ;;  %v1042_v49 = vor.u32 %v1041_v24, %v1040_v63  ;;  %v8894_v1 = vshll.u32 %v7410_v21, 16  ;;  %v6596_v38 = vld [vmem:[%s8801_s1 + $0x28] sm:$0xff]  }
  0x5d   :  { %v1046_v26 = vor.u32 %v1045_v3, %v1044_v16  ;;  %v7445_v59 = vcombine.low %v7414_v37, %v7440_v17  ;;  %v2019_v12 = vrot.slane %v8893_v18, 5  ;;  %v2020_v10 = vrot.slane %v8892_v50, 6  ;;  %5715 = vmatmul.mubr.msk.bf16.vlgmr.msra.gmra.mrb[0].mxu1 %vm335_vm2, %v6820_v39 }
  0x5e   :  { %v7455_v24 = vsel %vm7056_vm9, %v1037_v25, %v1042_v49  ;;  %v2023_v35 = vshrl.u32 %v7410_v21, 16  ;;  %v1052_v63 = vor.u32 %v1051_v0, %v1050_v2  ;;  %v2026_v3 = vrot.slane %v8894_v1, 6  ;;  %5731 = vmatpush3.bf16.msra.mxu1 %v7012_v23  ;;  %5718 = vmatprep.mubr.msk.bf16.mxu1 %vm335_vm2, %v6844_v45  ;;  %v7476_v0 = vld [vmem:[%s8801_s1 + $0x30] sm:$0xff]  }
  0x5f   :  { %9047 = vst [vmem:[#allocation54_spill] sm:$0xff] %v7445_v59  ;;  %v1047_v16 = vrot.slane %v1046_v26, 4  ;;  %5963 = vmatmul.mubr.msk.bf16.gmra.mrb[8].mxu0 %vm335_vm2, %v7445_v59  ;;  %v8895_v20 = vshrl.u32 %v7427_v51, 16  ;;  %v8896_v25 = vshll.u32 %v7427_v51, 16  ;;  %v2021_v49 = vor.u32 %v2020_v10, %v2019_v12  ;;  %v7489_v10 = vld [vmem:[%s8802_s0 + $0x30] sm:$0xf]  ;;  %5732 = vmatprep.subr.bf16.mxu1 %v6596_v38 }
  0x60   :  { %v2025_v26 = vrot.slane %v2023_v35, 5  ;;  %v2839_v18 = vshrl.u32 %v7435_v52, 16  ;;  %v7493_v35 = vcombine.low %v7489_v10, %v6952_v32  ;;  %v9052_v39 = vshll.u32 %v7435_v52, 16 }
  0x61   :  { %v7480_v2 = vsel %vm7056_vm9, %v1047_v16, %v1052_v63  ;;  %v2835_v23 = vrot.slane %v8895_v20, 5  ;;  %v2836_v12 = vrot.slane %v8896_v25, 6  ;;  %v2022_v63 = vrot.slane %v2021_v49, 4 }
  0x62   :  { %9048 = vst [vmem:[#allocation55_spill] sm:$0xff] %v7493_v35  ;;  %v7497_v16 = vcombine.low %v7455_v24, %v7480_v2  ;;  %v2027_v1 = vor.u32 %v2026_v3, %v2025_v26  ;;  %v2841_v20 = vrot.slane %v2839_v18, 5  ;;  %v2842_v43 = vrot.slane %v9052_v39, 6  ;;  %v6654_v18 = vld [vmem:[%s8802_s0 + $0x14] sm:$0x3]  ;;  %5733 = vmatpush3.bf16.msra.mxu1 %v6596_v38 }
  0x63   :  { %v2837_v50 = vor.u32 %v2836_v12, %v2835_v23  ;;  %v5034_v45 = vrot.slane %v7510_v42, 10  ;;  %v1245_v3 = vrot.slane %v6654_v18, 6  ;;  %v7525_v39 = vld [vmem:[%s8802_s0 + $0x18] sm:$0xf]  ;;  %v6656_v23 = vld [vmem:[%s8802_s0 + $0x1c] sm:$0x3]  ;;  %5750 = vmatprep.subr.bf16.mxu1 %v7476_v0 }
  0x64   :  { %9049 = vst [vmem:[#allocation56_spill] sm:$0xff] %v7497_v16  ;;  %5966 = vmatprep.mubr.msk.bf16.mxu0 %vm335_vm2, %v7497_v16  ;;  %v7520_v49 = vsel %vm7056_vm9, %v2022_v63, %v2027_v1  ;;  %v5035_v26 = vrot.slane %v7525_v39, 10  ;;  %v1249_v12 = vrot.slane %v6656_v23, 6  ;;  %v7534_v18 = vld [vmem:[%s8802_s0 + $0x20] sm:$0xf]  ;;  %v2843_v14 = vor.u32 %v2842_v43, %v2841_v20 }
  0x65   :  { %v5036_v1 = vrot.slane %v7534_v18, 10  ;;  %v2838_v63 = vrot.slane %v2837_v50, 4  ;;  %v7539_v37 = vsel %vm7501_vm12, %v5034_v45, %v1245_v3  ;;  %v7544_v42 = vld [vmem:[%s8802_s0 + $0x28] sm:$0xf]  ;;  %v651_v43 = vrot.slane %v7551_v60, 5  ;;  %5719 = vmatmul.mubr.msk.bf16.gmra.mrb[4].mxu1 %vm335_vm2, %v7493_v35 }
  0x66   :  { %9054 = vst [vmem:[#allocation58_spill] sm:$0xff] %v7539_v37  ;;  %v5037_v23 = vrot.slane %v7544_v42, 10  ;;  %v7556_v45 = vsel %vm7501_vm12, %v5035_v26, %v1249_v12  ;;  %v9056_v50 = vrot.slane %v6748_v11, 6  ;;  %v4958_v20 = vcombine.low %v7052_v36, %v7080_v9 }
  0x67   :  { %v7568_v3 = vsel %vm7056_vm9, %v2838_v63, %v2843_v14  ;;  %v7574_v26 = vcombine.low %v7539_v37, %v7556_v45  ;;  %v9059_v11 = vrot.slane %v6758_v13, 6  ;;  %v6660_v63 = vld [vmem:[%s8802_s0 + $0x34] sm:$0x3]  ;;  %v5039_v13 = vrot.slane %v6952_v32, 10 }
  0x68   :  { %v7562_v38 = vsel %vm7501_vm12, %v5036_v1, %v9056_v50  ;;  %9057 = vst [vmem:[#allocation60_spill] sm:$0xff] %v7568_v3  ;;  %v5038_v1 = vrot.slane %v7489_v10, 10  ;;  %v7583_v50 = vcombine.low %v7520_v49, %v7568_v3  ;;  %5722 = vmatprep.mubr.msk.bf16.mxu1 %vm335_vm2, %v4958_v20  ;;  %v1261_v37 = vrot.slane %v6660_v63, 6 }
  0x69   :  { %9058 = vst [vmem:[#allocation61_spill] sm:$0xff] %v7574_v26  ;;  %v1258_v12 = vsel %vm7501_vm12, %v5037_v23, %v9059_v11  ;;  %v1265_v23 = vrot.slane %v6900_v30, 6  ;;  %v9062_v11 = vrot.slane %v6806_v33, 9  ;;  %v7608_v32 = vcombine.low %v7101_v28, %v7120_v58 }
  0x6a   :  { %9060 = vst [vmem:[#allocation62_spill] sm:$0xff] %v7583_v50  ;;  %v7586_v14 = vcombine.low %v7562_v38, %v1258_v12  ;;  %5967 = vmatmul.mubr.msk.bf16.gmra.mrb[12].mxu0 %vm335_vm2, %v7583_v50  ;;  %v1262_v20 = vsel %vm7501_vm12, %v5038_v1, %v1261_v37  ;;  %v5160_v63 = vrot.slane %v6911_v44, 10  ;;  %v5250_v50 = vrot.slane %v6933_v56, 10 }
  0x6b   :  { %v7598_v35 = vsel %vm6767_vm3, %v9062_v11, %v651_v43  ;;  %5974 = vmatprep.mubr.msk.bf16.mxu0 %vm335_vm2, %v7574_v26  ;;  %9063 = vst [vmem:[#allocation64_spill] sm:$0xff] %v7608_v32  ;;  %v7610_v30 = vcombine.low %v1258_v12, %v1262_v20  ;;  %v2195_v43 = vrot.slane %v6916_v57, 6  ;;  %v7616_v11 = vsel %vm7501_vm12, %v5039_v13, %v1265_v23 }
  0x6c   :  { %9061 = vst [vmem:[#allocation63_spill] sm:$0xff] %v7586_v14  ;;  %9065 = vst [vmem:[#allocation66_spill] sm:$0xff] %v7616_v11  ;;  %v2987_v37 = vrot.slane %v6938_v62, 6  ;;  %v7622_v1 = vcombine.low %v7237_v61, %v7265_v8  ;;  %v5042_v3 = vrot.slane %v7101_v28, 10  ;;  %v1277_v12 = vrot.slane %v7115_v53, 6 }
  0x6d   :  { %9064 = vst [vmem:[#allocation65_spill] sm:$0xff] %v7610_v30  ;;  %v5043_v30 = vrot.slane %v7120_v58, 10  ;;  %v1281_v26 = vrot.slane %v7153_v22, 6  ;;  %v4992_v13 = vcombine.low %v7598_v35, %v6829_v41  ;;  %v9067_v23 = vshrl.u32 %v6806_v33, 16  ;;  %5723 = vmatmul.mubr.msk.bf16.gmra.mrb[8].mxu1 %vm335_vm2, %v7608_v32 }
  0x6e   :  { %9066 = vst [vmem:[#allocation67_spill] sm:$0xff] %v7622_v1  ;;  %v9068_v59 = vshll.u32 %v6806_v33, 16  ;;  %v7641_v62 = vcombine.low %v1262_v20, %v7616_v11  ;;  %v7645_v57 = vsel %vm7501_vm12, %v5160_v63, %v2195_v43  ;;  %v7649_v35 = vsel %vm7501_vm12, %v5250_v50, %v2987_v37  ;;  %5726 = vmatprep.mubr.msk.bf16.mxu1 %vm335_vm2, %v7622_v1  ;;  %v6602_v20 = vld [vmem:[%s8801_s1 + $0xf8] sm:$0xff]  }
  0x6f   :  { %v7632_v16 = vrot.slane %v9067_v23, 5  ;;  %9070 = vst [vmem:[#allocation69_spill] sm:$0xff] %v7649_v35  ;;  %v5044_v33 = vrot.slane %v7237_v61, 10  ;;  %v7660_v23 = vsel %vm7501_vm12, %v5042_v3, %v1277_v12  ;;  %v5045_v63 = vrot.slane %v7265_v8, 10 }
  0x70   :  { %v7636_v48 = vrot.slane %v9068_v59, 6  ;;  %9069 = vst [vmem:[#allocation68_spill] sm:$0xff] %v7641_v62  ;;  %v1285_v59 = vrot.slane %v7260_v55, 6  ;;  %9071 = vst [vmem:[#allocation70_spill] sm:$0xff] %v7660_v23  ;;  %v1289_v50 = vrot.slane %v7277_v6, 6  ;;  %v5046_v43 = vrot.slane %v7282_v7, 10 }
  0x71   :  { %v7669_v37 = vsel %vm7501_vm12, %v5043_v30, %v1281_v26  ;;  %v1293_v32 = vrot.slane %v7290_v54, 6  ;;  %v5047_v1 = vrot.slane %v7301_v34, 10  ;;  %v1297_v3 = vrot.slane %v7310_v47, 6 }
  0x72   :  { %5975 = vmatmul.mubr.msk.bf16.vlgmr.msra.gmra.mrb[0].mxu0 %vm335_vm2, %v7586_v14  ;;  %v9072_v12 = vshll.u32 %v6825_v40, 16  ;;  %v9073_v56 = vshrl.u32 %v6713_v4, 16  ;;  %v9074_v11 = vshll.u32 %v6713_v4, 16  ;;  %v7687_v26 = vcombine.low %v7282_v7, %v7301_v34 }
  0x73   :  { %5991 = vmatpush3.bf16.msra.mxu0 %v7190_v46  ;;  %5978 = vmatprep.mubr.msk.bf16.mxu0 %vm335_vm2, %v7641_v62  ;;  %v9076_v30 = vshll.u32 %v6718_v5, 16  ;;  %v7699_v4 = vsel %vm7501_vm12, %v5044_v33, %v1285_v59  ;;  %v4982_v46 = vrot.slane %v7101_v28, 9  ;;  %v7709_v5 = vcombine.low %v7660_v23, %v7669_v37 }
  0x74   :  { %v7676_v41 = vrot.slane %v9072_v12, 6  ;;  %v904_v44 = vrot.slane %v9073_v56, 5  ;;  %v905_v14 = vrot.slane %v9074_v11, 6  ;;  %9075 = vst [vmem:[#allocation71_spill] sm:$0xff] %v7687_v26  ;;  %v7695_v12 = vcombine.low %v7645_v57, %v7649_v35  ;;  %5992 = vmatprep.subr.bf16.mxu0 %v6602_v20  ;;  %v7704_v56 = vld [vmem:[%s8801_s1 + $0x100] sm:$0xff]  }
  0x75   :  { %v7691_v40 = vrot.slane %v9076_v30, 6  ;;  %9078 = vst [vmem:[#allocation73_spill] sm:$0xff] %v7709_v5  ;;  %v7713_v11 = vsel %vm7501_vm12, %v5045_v63, %v1289_v50  ;;  %v691_v30 = vrot.slane %v7115_v53, 5  ;;  %v4983_v33 = vrot.slane %v7120_v58, 9  ;;  %5727 = vmatmul.mubr.msk.bf16.gmra.mrb[12].mxu1 %vm335_vm2, %v7687_v26 }
  0x76   :  { %9077 = vst [vmem:[#allocation72_spill] sm:$0xff] %v7695_v12  ;;  %v7719_v59 = vsel %vm7501_vm12, %v5046_v43, %v1293_v32  ;;  %v7723_v35 = vsel %vm7501_vm12, %v5047_v1, %v1297_v3  ;;  %v5161_v28 = vrot.slane %v7390_v27, 10  ;;  %v695_v23 = vrot.slane %v7153_v22, 5  ;;  %5734 = vmatprep.mubr.msk.bf16.mxu1 %vm335_vm2, %v4992_v13 }
  0x77   :  { %9079 = vst [vmem:[#allocation74_spill] sm:$0xff] %v7723_v35  ;;  %5993 = vmatpush3.bf16.msra.mxu0 %v6602_v20  ;;  %v4980_v53 = vrot.slane %v7052_v36, 9  ;;  %v7732_v63 = vsel %vm6767_vm3, %v4982_v46, %v691_v30  ;;  %v4984_v32 = vrot.slane %v7237_v61, 9  ;;  %v699_v50 = vrot.slane %v7260_v55, 5 }
  0x78   :  { %9080 = vst [vmem:[#allocation75_spill] sm:$0xff] %v7732_v63  ;;  %6010 = vmatprep.subr.bf16.mxu0 %v7704_v56  ;;  %v7740_v22 = vsel %vm6767_vm3, %v4983_v33, %v695_v23  ;;  %v4985_v1 = vrot.slane %v7265_v8, 9  ;;  %v703_v20 = vrot.slane %v7277_v6, 5  ;;  %v4986_v43 = vrot.slane %v7282_v7, 9  ;;  %v9082_v23 = vld [vmem:[#allocation25_spill] sm:$0xff] }
  0x79   :  { %v7747_v3 = vcombine.low %v7732_v63, %v7740_v22  ;;  %v7751_v55 = vsel %vm6767_vm3, %v4984_v32, %v699_v50  ;;  %v707_v13 = vrot.slane %v7290_v54, 5  ;;  %v4987_v46 = vrot.slane %v7301_v34, 9  ;;  %v9089_v63 = vld [vmem:[#allocation3_spill] sm:$0xff] }
  0x7a   :  { %5979 = vmatmul.mubr.msk.bf16.gmra.mrb[4].mxu0 %vm335_vm2, %v7695_v12  ;;  %v683_v30 = vrot.slane %v9082_v23, 5  ;;  %v7760_v6 = vsel %vm6767_vm3, %v4985_v1, %v703_v20  ;;  %v711_v33 = vrot.slane %v7310_v47, 5  ;;  %v7765_v26 = vcombine.low %v7265_v8, %v7282_v7  ;;  %v7788_v20 = vld [vmem:[%s8802_s0 + $0xc] sm:$0x3] }
  0x7b   :  { %9081 = vst [vmem:[#allocation76_spill] sm:$0xff] %v7747_v3  ;;  %5982 = vmatprep.mubr.msk.bf16.mxu0 %vm335_vm2, %v7709_v5  ;;  %v7771_v54 = vcombine.low %v7751_v55, %v7760_v6  ;;  %v7775_v32 = vsel %vm6767_vm3, %v4986_v43, %v707_v13  ;;  %v896_v50 = vor.u32 %v7636_v48, %v7632_v16  ;;  %v898_v47 = vshrl.u32 %v7551_v60, 16  ;;  %v9086_v13 = vld [vmem:[#allocation27_spill] sm:$0xff]  ;;  %v9090_v60 = vld [vmem:[#allocation6_spill] sm:$0xff] }
  0x7c   :  { %v4981_v1 = vrot.slane %v7080_v9, 9  ;;  %v7783_v8 = vsel %vm6767_vm3, %v4987_v46, %v711_v33  ;;  %v906_v7 = vor.u32 %v905_v14, %v904_v44  ;;  %9085 = vst [vmem:[#allocation78_spill] sm:$0xff] %v7788_v20  ;;  %v908_v43 = vshrl.u32 %v7788_v20, 16  ;;  %v6605_v48 = vld [vmem:[%s8801_s1 + $0x38] sm:$0xff]  }
  0x7d   :  { %9083 = vst [vmem:[#allocation25_spill] sm:$0xff] %v7771_v54  ;;  %9084 = vst [vmem:[#allocation77_spill] sm:$0xff] %v7783_v8  ;;  %v687_v12 = vrot.slane %v9086_v13, 5  ;;  %v7797_v16 = vcombine.low %v7775_v32, %v7783_v8  ;;  %v897_v46 = vrot.slane %v896_v50, 4  ;;  %v900_v33 = vrot.slane %v898_v47, 5  ;;  %5735 = vmatmul.mubr.msk.bf16.vlgmr.msra.gmra.mrb[0].mxu1 %vm335_vm2, %v9089_v63 }
  0x7e   :  { %v7801_v44 = vcombine.low %v7699_v4, %v7713_v11  ;;  %v2199_v14 = vrot.slane %v7410_v21, 6  ;;  %v907_v5 = vrot.slane %v906_v7, 4  ;;  %v910_v62 = vrot.slane %v908_v43, 5  ;;  %5751 = vmatpush3.bf16.msra.mxu1 %v7476_v0  ;;  %5738 = vmatprep.mubr.msk.bf16.mxu1 %vm335_vm2, %v9090_v60 }
  0x7f   :  { %9087 = vst [vmem:[#allocation27_spill] sm:$0xff] %v7797_v16  ;;  %v7808_v20 = vcombine.low %v7719_v59, %v7723_v35  ;;  %v5251_v8 = vrot.slane %v7427_v51, 10  ;;  %v2991_v50 = vrot.slane %v7435_v52, 6  ;;  %v902_v47 = vor.u32 %v7676_v41, %v900_v33  ;;  %5752 = vmatprep.subr.bf16.mxu1 %v6605_v48  ;;  %v7828_v41 = vld [vmem:[%s8801_s1 + $0x40] sm:$0xff]  }
  0x80   :  { %9088 = vst [vmem:[#allocation79_spill] sm:$0xff] %v7801_v44  ;;  %v912_v7 = vor.u32 %v7691_v40, %v910_v62  ;;  %v684_v63 = vsel %vm6767_vm3, %v4980_v53, %v683_v30  ;;  %v7821_v43 = vsel %vm6767_vm3, %v4981_v1, %v687_v12  ;;  %v7840_v0 = vsel %vm7501_vm12, %v5161_v28, %v2199_v14  ;;  %v9093_v30 = vld [vmem:[#allocation19_spill] sm:$0xff] }
  0x81   :  { %v903_v35 = vsel %vm7056_vm9, %v897_v46, %v902_v47  ;;  %v7844_v40 = vsel %vm7501_vm12, %v5251_v8, %v2991_v50  ;;  %v4996_v53 = vcombine.low %v684_v63, %v7821_v43  ;;  %v7857_v28 = vcombine.low %v7525_v39, %v7534_v18 }
  0x82   :  { %5983 = vmatmul.mubr.msk.bf16.gmra.mrb[8].mxu0 %vm335_vm2, %v7801_v44  ;;  %v7834_v62 = vsel %vm7056_vm9, %v907_v5, %v912_v7  ;;  %5753 = vmatpush3.bf16.msra.mxu1 %v6605_v48  ;;  %v7851_v5 = vcombine.low %v7840_v0, %v7844_v40  ;;  %v9095_v8 = vshrl.u32 %v7390_v27, 16  ;;  %v9096_v46 = vshll.u32 %v7390_v27, 16 }
  0x83   :  { %9091 = vst [vmem:[#allocation3_spill] sm:$0xff] %v7834_v62  ;;  %5986 = vmatprep.mubr.msk.bf16.mxu0 %vm335_vm2, %v7808_v20  ;;  %v5014_v12 = vcombine.low %v903_v35, %v7834_v62  ;;  %5770 = vmatprep.subr.bf16.mxu1 %v7828_v41  ;;  %v9094_v35 = vld [vmem:[#allocation46_spill] sm:$0xff]  ;;  %v9097_v39 = vshrl.u32 %v7427_v51, 16  ;;  %v9098_v50 = vshll.u32 %v7410_v21, 16  ;;  %v9099_v47 = vshll.u32 %v7427_v51, 16 }
  0x84   :  { %9092 = vst [vmem:[#allocation80_spill] sm:$0xff] %v7851_v5  ;;  %v7862_v1 = vcombine.low %v9094_v35, %v7366_v29  ;;  %v1660_v48 = vrot.slane %v9095_v8, 4  ;;  %v1663_v33 = vrot.slane %v9096_v46, 5  ;;  %v7880_v63 = vcombine.low %v7544_v42, %v7489_v10  ;;  %v6663_v35 = vld [vmem:[%s8802_s0 + $0x38] sm:$0xf]  ;;  %v9131_v62 = vld [vmem:[#allocation54_spill] sm:$0xff] }
  0x85   :  { %5739 = vmatmul.mubr.msk.bf16.gmra.mrb[4].mxu1 %vm335_vm2, %v9093_v30  ;;  %v2524_v18 = vrot.slane %v9097_v39, 4  ;;  %v1669_v29 = vrot.slane %v9098_v50, 5  ;;  %v2527_v7 = vrot.slane %v9099_v47, 5  ;;  %v9101_v42 = vshll.u32 %v7435_v52, 16 }
  0x86   :  { %5742 = vmatprep.mubr.msk.bf16.mxu1 %vm335_vm2, %v4996_v53  ;;  %v1664_v14 = vor.u32 %v1663_v33, %v1660_v48  ;;  %v7887_v53 = vld [vmem:[%s8802_s0 + $0x40] sm:$0xf]  ;;  %v6612_v33 = vld [vmem:[%s8801_s1 + $0x108] sm:$0xff]   ;;  %vm4712_vm13 = vcmask 1041409   ;;  %vm4794_vm14 = vcmask 523264  }
  0x87   :  { %9100 = vst [vmem:[#allocation46_spill] sm:$0xff] %v7887_v53  ;;  %v7893_v8 = vcombine.low %v6663_v35, %v7887_v53  ;;  %v2528_v46 = vor.u32 %v2527_v7, %v2524_v18  ;;  %v2533_v10 = vrot.slane %v9101_v42, 5  ;;  %v7914_v18 = vld [vmem:[%s8802_s0 + $0x50] sm:$0xf]  ;;  %v9103_v7 = vshll.u32 %v7052_v36, 16 }
  0x88   :  { %v1665_v48 = vrot.slane %v1664_v14, 4  ;;  %v9102_v14 = vshrl.u32 %v7052_v36, 16  ;;  %v7937_v42 = vcombine.low %v7740_v22, %v7751_v55  ;;  %v7941_v36 = vcombine.low %v7760_v6, %v7775_v32 }
  0x89   :  { %v2529_v50 = vrot.slane %v2528_v46, 4  ;;  %v975_v35 = vrot.slane %v9103_v7, 6  ;;  %v7933_v46 = vld [vmem:[%s8801_s1 + $0x110] sm:$0xff]   ;;  %v3276_v55 = vshrl.u32 %v7914_v18, 16  ;;  %v7960_v6 = vcombine.low %v7120_v58, %v7237_v61 }
  0x8a   :  { %5987 = vmatmul.mubr.msk.bf16.gmra.mrb[12].mxu0 %vm335_vm2, %v7851_v5  ;;  %v7904_v39 = vsel %vm6889_vm6, %v1665_v48, %v1669_v29  ;;  %v974_v47 = vrot.slane %v9102_v14, 5  ;;  %v9105_v14 = vshll.u32 %v7080_v9, 16  ;;  %v988_v5 = vshrl.u32 %v9086_v13, 16 }
  0x8b   :  { %5994 = vmatprep.mubr.msk.bf16.mxu0 %vm335_vm2, %v7857_v28  ;;  %v7920_v29 = vsel %vm6889_vm6, %v2529_v50, %v2533_v10  ;;  %v9104_v10 = vshrl.u32 %v7080_v9, 16  ;;  %v9106_v9 = vshll.u32 %v9082_v23, 16  ;;  %v7974_v58 = vrot.slane %v3276_v55, 5 }
  0x8c   :  { %v985_v7 = vrot.slane %v9105_v14, 6  ;;  %v7969_v14 = vld [vmem:[%s8802_s0 + $0xb0] sm:$0xf]  ;;  %v990_v23 = vrot.slane %v988_v5, 5  ;;  %v7991_v5 = vcombine.low %v7480_v2, %v7520_v49 }
  0x8d   :  { %5743 = vmatmul.mubr.msk.bf16.gmra.mrb[8].mxu1 %vm335_vm2, %v7747_v3  ;;  %v984_v50 = vrot.slane %v9104_v10, 5  ;;  %v7951_v3 = vld [vmem:[%s8802_s0 + $0x48] sm:$0xf]  ;;  %v981_v32 = vrot.slane %v9106_v9, 6  ;;  %v3279_v10 = vshll.u32 %v7914_v18, 16  ;;  %v9108_v2 = vld [vmem:[#allocation66_spill] sm:$0xff] }
  0x8e   :  { %5746 = vmatprep.mubr.msk.bf16.mxu1 %vm335_vm2, %v7771_v54  ;;  %v5272_v22 = vcombine.low %v7951_v3, %v7914_v18  ;;  %v976_v54 = vor.u32 %v975_v35, %v974_v47  ;;  %v8010_v49 = vcombine.low %v9108_v2, %v7645_v57  ;;  %v9111_v2 = vld [vmem:[#allocation10_spill] sm:$0xff] }
  0x8f   :  { %v986_v61 = vor.u32 %v985_v7, %v984_v50  ;;  %v7977_v9 = vrot.slane %v3279_v10, 6 }
  0x90   :  { %v977_v35 = vrot.slane %v976_v54, 4  ;;  %v8015_v54 = vld [vmem:[%s8802_s0 + $0x54] sm:$0x3] }
  0x91   :  { %v987_v7 = vrot.slane %v986_v61, 4  ;;  %v3755_v57 = vrot.slane %v8015_v54, 6  ;;  %v8033_v61 = vcombine.low %v7713_v11, %v7719_v59  ;;  %v9115_v59 = vld [vmem:[#allocation74_spill] sm:$0xff] }
  0x92   :  { %5995 = vmatmul.mubr.msk.bf16.vlgmr.msra.gmra.mrb[0].mxu0 %vm335_vm2, %v7880_v63 }
  0x93   :  { %6011 = vmatpush3.bf16.msra.mxu0 %v7704_v56  ;;  %5998 = vmatprep.mubr.msk.bf16.mxu0 %vm335_vm2, %v7893_v8  ;;  %v7927_v56 = vld [vmem:[%s8802_s0 + $0x64] sm:$0x3] }
  0x94   :  { %6012 = vmatprep.subr.bf16.mxu0 %v6612_v33  ;;  %v978_v48 = vshrl.u32 %v7927_v56, 16 }
  0x95   :  { %5747 = vmatmul.mubr.msk.bf16.gmra.mrb[12].mxu1 %vm335_vm2, %v7797_v16  ;;  %v9107_v16 = vshll.u32 %v9086_v13, 16 }
  0x96   :  { %5754 = vmatprep.mubr.msk.bf16.mxu1 %vm335_vm2, %v5014_v12  ;;  %v980_v30 = vrot.slane %v978_v48, 5  ;;  %v8952_v12 = vshll.u32 %v7969_v14, 16 }
  0x97   :  { %6013 = vmatpush3.bf16.msra.mxu0 %v6612_v33  ;;  %v991_v60 = vrot.slane %v9107_v16, 6  ;;  %v8953_v33 = vshrl.u32 %v7969_v14, 16  ;;  %v7987_v16 = vcombine.low %v7440_v17, %v7455_v24  ;;  %v6615_v17 = vld [vmem:[%s8801_s1 + $0x48] sm:$0xff]   ;;  %v8006_v24 = vcombine.low %v7556_v45, %v7562_v38 }
  0x98   :  { %6030 = vmatprep.subr.bf16.mxu0 %v7933_v46  ;;  %v982_v48 = vor.u32 %v981_v32, %v980_v30  ;;  %v7999_v50 = vrot.slane %v8952_v12, 6  ;;  %v5334_v30 = vrot.slane %v7914_v18, 10  ;;  %v9109_v32 = vld [vmem:[#allocation34_spill] sm:$0xff]  ;;  %v8024_v45 = vcombine.low %v7301_v34, %v7390_v27 }
  0x99   :  { %v7995_v47 = vrot.slane %v8953_v33, 5  ;;  %v8029_v38 = vcombine.low %v7669_v37, %v7699_v4  ;;  %v9113_v34 = vshll.u32 %v9111_v2, 16  ;;  %v8051_v4 = vld [vmem:[%s8801_s1 + $0x50] sm:$0xff]   ;;  %v9122_v33 = vld [vmem:[#allocation11_spill] sm:$0xff] }
  0x9a   :  { %5999 = vmatmul.mubr.msk.bf16.gmra.mrb[4].mxu0 %vm335_vm2, %v5272_v22  ;;  %v992_v22 = vor.u32 %v991_v60, %v990_v23  ;;  %v9110_v23 = vld [vmem:[#allocation30_spill] sm:$0xff]  ;;  %v983_v12 = vsel %vm7056_vm9, %v977_v35, %v982_v48  ;;  %v8055_v11 = vsel %vm7501_vm12, %v5334_v30, %v3755_v57  ;;  %v9117_v30 = vld [vmem:[#allocation16_spill] sm:$0xff] }
  0x9b   :  { %6002 = vmatprep.mubr.msk.bf16.mxu0 %vm335_vm2, %v7960_v6  ;;  %v1649_v13 = vrot.slane %v9113_v34, 5 }
  0x9c   :  { %v8046_v37 = vsel %vm7056_vm9, %v987_v7, %v992_v22  ;;  %v5273_v7 = vcombine.low %v7427_v51, %v7969_v14  ;;  %v9116_v22 = vld [vmem:[#allocation23_spill] sm:$0xff] }
  0x9d   :  { %5755 = vmatmul.mubr.msk.bf16.vlgmr.msra.gmra.mrb[0].mxu1 %vm335_vm2, %v9109_v32  ;;  %v9112_v32 = vshrl.u32 %v9111_v2, 16  ;;  %9114 = vst [vmem:[#allocation66_spill] sm:$0xff] %v8046_v37  ;;  %v5018_v35 = vcombine.low %v983_v12, %v8046_v37  ;;  %v8071_v57 = vcombine.low %v9117_v30, %v9116_v22  ;;  %v9118_v2 = vld [vmem:[#allocation41_spill] sm:$0xff] }
  0x9e   :  { %5771 = vmatpush3.bf16.msra.mxu1 %v7828_v41  ;;  %5758 = vmatprep.mubr.msk.bf16.mxu1 %vm335_vm2, %v9110_v23  ;;  %v8061_v41 = vcombine.low %v9115_v59, %v7840_v0  ;;  %v9119_v0 = vld [vmem:[#allocation13_spill] sm:$0xff]  ;;  %v9123_v23 = vshll.u32 %v9122_v33, 16  ;;  %v9125_v33 = vld [vmem:[#allocation59_spill] sm:$0xff] }
  0x9f   :  { %v1646_v60 = vrot.slane %v9112_v32, 4  ;;  %5772 = vmatprep.subr.bf16.mxu1 %v6615_v17  ;;  %v9120_v32 = vshrl.u32 %v9119_v0, 16  ;;  %v9121_v59 = vshll.u32 %v9119_v0, 16 }
  0xa0   :  { %v1655_v37 = vrot.slane %v9123_v23, 5  ;;  %v1237_v23 = vrot.slane %v9125_v33, 6 }
  0xa1   :  { %v1650_v48 = vor.u32 %v1649_v13, %v1646_v60  ;;  %v2510_v34 = vrot.slane %v9120_v32, 4  ;;  %v2513_v12 = vrot.slane %v9121_v59, 5  ;;  %v3281_v13 = vrot.slane %v3279_v10, 5  ;;  %v9127_v59 = vld [vmem:[#allocation14_spill] sm:$0xff] }
  0xa2   :  { %6003 = vmatmul.mubr.msk.bf16.gmra.mrb[8].mxu0 %vm335_vm2, %v7765_v26  ;;  %5773 = vmatpush3.bf16.msra.mxu1 %v6615_v17  ;;  %v3278_v17 = vrot.slane %v3276_v55, 4  ;;  %v8956_v32 = vshll.u32 %v8015_v54, 16  ;;  %v6666_v55 = vld [vmem:[%s8802_s0] sm:$0xf] }
  0xa3   :  { %6006 = vmatprep.mubr.msk.bf16.mxu0 %vm335_vm2, %v8024_v45  ;;  %5790 = vmatprep.subr.bf16.mxu1 %v8051_v4  ;;  %v1651_v60 = vrot.slane %v1650_v48, 4  ;;  %v2514_v22 = vor.u32 %v2513_v12, %v2510_v34  ;;  %v5032_v10 = vrot.slane %v6666_v55, 10  ;;  %v9128_v12 = vshll.u32 %v9127_v59, 16 }
  0xa4   :  { %v3282_v30 = vor.u32 %v3281_v13, %v3278_v17  ;;  %v9129_v17 = vld [vmem:[#allocation52_spill] sm:$0xff]  ;;  %v9130_v13 = vld [vmem:[#allocation29_spill] sm:$0xff] }
  0xa5   :  { %5759 = vmatmul.mubr.msk.bf16.gmra.mrb[4].mxu1 %vm335_vm2, %v9118_v2  ;;  %v8088_v0 = vsel %vm6889_vm6, %v1651_v60, %v1655_v37  ;;  %v2519_v37 = vrot.slane %v9128_v12, 5  ;;  %v2515_v55 = vrot.slane %v2514_v22, 4  ;;  %v3287_v2 = vrot.slane %v8956_v32, 5  ;;  %v9134_v22 = vld [vmem:[#allocation75_spill] sm:$0xff] }
  0xa6   :  { %5762 = vmatprep.mubr.msk.bf16.mxu1 %vm335_vm2, %v5018_v35  ;;  %9124 = vst [vmem:[#allocation34_spill] sm:$0xff] %v8088_v0  ;;  %v8097_v35 = vld [vmem:[%s8802_s0 + $0x8] sm:$0xf]  ;;  %v8107_v60 = vcombine.low %v9130_v13, %v8088_v0  ;;  %v3283_v33 = vrot.slane %v3282_v30, 4  ;;  %v1238_v59 = vsel %vm7501_vm12, %v5032_v10, %v1237_v23 }
  0xa7   :  { %v5033_v48 = vrot.slane %v8097_v35, 10  ;;  %v8131_v13 = vsel %vm6889_vm6, %v2515_v55, %v2519_v37  ;;  %v9138_v30 = vld [vmem:[#allocation45_spill] sm:$0xff] }
  0xa8   :  { %9135 = vst [vmem:[#allocation74_spill] sm:$0xff] %v8131_v13  ;;  %v8135_v10 = vsel %vm6889_vm6, %v3283_v33, %v3287_v2  ;;  %v9139_v37 = vld [vmem:[#allocation37_spill] sm:$0xff]  ;;  %v9140_v2 = vshrl.u32 %v7969_v14, 16 }
  0xa9   :  { %9136 = vst [vmem:[#allocation23_spill] sm:$0xff] %v8135_v10  ;;  %v8147_v55 = vcombine.low %v9139_v37, %v9138_v30  ;;  %v6668_v37 = vld [vmem:[%s8802_s0 + $0x60] sm:$0xf]  ;;  %v6619_v30 = vld [vmem:[%s8801_s1 + $0x58] sm:$0xff]  }
  0xaa   :  { %6007 = vmatmul.mubr.msk.bf16.gmra.mrb[12].mxu0 %vm335_vm2, %v5273_v7  ;;  %v9126_v7 = vld [vmem:[#allocation78_spill] sm:$0xff]  ;;  %v3292_v33 = vrot.slane %v9140_v2, 4  ;;  %v5040_v2 = vrot.slane %v6668_v37, 10 }
  0xab   :  { %6014 = vmatprep.mubr.msk.bf16.mxu0 %vm335_vm2, %v8071_v57  ;;  %v1241_v34 = vrot.slane %v9126_v7, 6  ;;  %v6618_v7 = vld [vmem:[%s8801_s1 + $0x118] sm:$0xff]  }
  0xad   :  { %5763 = vmatmul.mubr.msk.bf16.gmra.mrb[8].mxu1 %vm335_vm2, %v9129_v17  ;;  %v8120_v12 = vsel %vm7501_vm12, %v5033_v48, %v1241_v34  ;;  %v9133_v17 = vld [vmem:[#allocation26_spill] sm:$0xff]  ;;  %v6620_v48 = vld [vmem:[%s8801_s1 + $0x120] sm:$0xff]  }
  0xae   :  { %5766 = vmatprep.mubr.msk.bf16.mxu1 %vm335_vm2, %v9131_v62  ;;  %9132 = vst [vmem:[#allocation10_spill] sm:$0xff] %v8120_v12  ;;  %v5052_v23 = vcombine.low %v1238_v59, %v8120_v12  ;;  %v9137_v34 = vld [vmem:[#allocation56_spill] sm:$0xff]  ;;  %v9141_v59 = vshll.u32 %v7969_v14, 16  ;;  %v8157_v62 = vld [vmem:[%s8802_s0 + $0xb4] sm:$0x3] }
  0xaf   :  { %v9144_v12 = vshll.u32 %v8157_v62, 16 }
  0xb0   :  { %v3295_v32 = vrot.slane %v9141_v59, 5  ;;  %v8170_v59 = vld [vmem:[%s8802_s0 + $0x68] sm:$0xf] }
  0xb1   :  { %v3301_v0 = vrot.slane %v9144_v12, 5 }
  0xb2   :  { %6015 = vmatmul.mubr.msk.bf16.vlgmr.msra.gmra.mrb[0].mxu0 %vm335_vm2, %v9133_v17 }
  0xb3   :  { %6031 = vmatpush3.bf16.msra.mxu0 %v7933_v46  ;;  %6018 = vmatprep.mubr.msk.bf16.mxu0 %vm335_vm2, %v8107_v60  ;;  %v5288_v46 = vcombine.low %v8131_v13, %v8135_v10  ;;  %v9145_v13 = vld [vmem:[#allocation63_spill] sm:$0xff] }
  0xb4   :  { %6032 = vmatprep.subr.bf16.mxu0 %v6618_v7 }
  0xb5   :  { %5767 = vmatmul.mubr.msk.bf16.gmra.mrb[12].mxu1 %vm335_vm2, %v9137_v34  ;;  %v9142_v34 = vld [vmem:[#allocation61_spill] sm:$0xff] }
  0xb6   :  { %5774 = vmatprep.mubr.msk.bf16.mxu1 %vm335_vm2, %v5052_v23  ;;  %v1269_v23 = vrot.slane %v7927_v56, 6  ;;  %v9143_v56 = vld [vmem:[#allocation48_spill] sm:$0xff] }
  0xb7   :  { %6033 = vmatpush3.bf16.msra.mxu0 %v6618_v7  ;;  %v3296_v7 = vor.u32 %v3295_v32, %v3292_v33  ;;  %v6670_v32 = vld [vmem:[%s8802_s0 + $0x6c] sm:$0x3]  ;;  %v8183_v37 = vcombine.low %v9143_v56, %v7904_v39  ;;  %v3447_v56 = vrot.slane %v8015_v54, 5 }
  0xb8   :  { %6050 = vmatprep.subr.bf16.mxu0 %v6620_v48  ;;  %v1273_v33 = vrot.slane %v6670_v32, 6  ;;  %v1270_v32 = vsel %vm7501_vm12, %v5040_v2, %v1269_v23  ;;  %v9146_v2 = vld [vmem:[#allocation68_spill] sm:$0xff] }
  0xb9   :  { %v3297_v10 = vrot.slane %v3296_v7, 4  ;;  %v9147_v23 = vld [vmem:[#allocation8_spill] sm:$0xff] }
  0xba   :  { %6019 = vmatmul.mubr.msk.bf16.gmra.mrb[4].mxu0 %vm335_vm2, %v5288_v46  ;;  %v5041_v46 = vrot.slane %v8170_v59, 10 }
  0xbb   :  { %6022 = vmatprep.mubr.msk.bf16.mxu0 %vm335_vm2, %v8147_v55 }
  0xbc   :  { %v8194_v53 = vsel %vm7501_vm12, %v5041_v46, %v1273_v33  ;;  %v9148_v46 = vld [vmem:[#allocation73_spill] sm:$0xff]  ;;  %v5300_v33 = vrot.slane %v7914_v18, 9 }
  0xbd   :  { %5775 = vmatmul.mubr.msk.bf16.vlgmr.msra.gmra.mrb[0].mxu1 %vm335_vm2, %v9142_v34  ;;  %v6622_v34 = vld [vmem:[%s8801_s1 + $0x60] sm:$0xff]   ;;  %v5056_v12 = vcombine.low %v1270_v32, %v8194_v53  ;;  %v6623_v32 = vld [vmem:[%s8801_s1 + $0x128] sm:$0xff]  }
  0xbe   :  { %5791 = vmatpush3.bf16.msra.mxu1 %v8051_v4  ;;  %5778 = vmatprep.mubr.msk.bf16.mxu1 %vm335_vm2, %v9145_v13  ;;  %v8205_v4 = vsel %vm6889_vm6, %v3297_v10, %v3301_v0  ;;  %v9149_v0 = vld [vmem:[#allocation20_spill] sm:$0xff]  ;;  %v9150_v10 = vld [vmem:[#allocation17_spill] sm:$0xff] }
  0xbf   :  { %5792 = vmatprep.subr.bf16.mxu1 %v6619_v30  ;;  %v5289_v7 = vcombine.low %v7920_v29, %v8205_v4 }
  0xc2   :  { %6023 = vmatmul.mubr.msk.bf16.gmra.mrb[8].mxu0 %vm335_vm2, %v7862_v1  ;;  %5793 = vmatpush3.bf16.msra.mxu1 %v6619_v30  ;;  %v8220_v30 = vcombine.low %v9150_v10, %v9149_v0  ;;  %v6626_v10 = vld [vmem:[%s8801_s1 + $0x130] sm:$0xff]  }
  0xc3   :  { %6026 = vmatprep.mubr.msk.bf16.mxu0 %vm335_vm2, %v8183_v37  ;;  %5810 = vmatprep.subr.bf16.mxu1 %v6622_v34 }
  0xc5   :  { %5779 = vmatmul.mubr.msk.bf16.gmra.mrb[4].mxu1 %vm335_vm2, %v9146_v2 }
  0xc6   :  { %5782 = vmatprep.mubr.msk.bf16.mxu1 %vm335_vm2, %v5056_v12  ;;  %v9151_v12 = vld [vmem:[#allocation9_spill] sm:$0xff] }
  0xca   :  { %6027 = vmatmul.mubr.msk.bf16.gmra.mrb[12].mxu0 %vm335_vm2, %v5289_v7  ;;  %v8235_v7 = vsel %vm6767_vm3, %v5300_v33, %v3447_v56  ;;  %v1843_v33 = vrot.slane %v7410_v21, 5  ;;  %v5217_v56 = vrot.slane %v7427_v51, 9  ;;  %v6627_v51 = vld [vmem:[%s8801_s1 + $0x70] sm:$0xff]  }
  0xcb   :  { %6034 = vmatprep.mubr.msk.bf16.mxu0 %vm335_vm2, %v9147_v23 }
  0xcd   :  { %5783 = vmatmul.mubr.msk.bf16.gmra.mrb[8].mxu1 %vm335_vm2, %v9148_v46  ;;  %v9152_v46 = vld [vmem:[#allocation57_spill] sm:$0xff] }
  0xce   :  { %5786 = vmatprep.mubr.msk.bf16.mxu1 %vm335_vm2, %v7801_v44  ;;  %v5074_v0 = vcombine.low %v8097_v35, %v9152_v46  ;;  %v9153_v44 = vld [vmem:[#allocation21_spill] sm:$0xff]  ;;  %v3451_v46 = vrot.slane %v8157_v62, 5 }
  0xcf   :  { %v5306_v2 = vcombine.low %v9153_v44, %v8235_v7  ;;  %v6625_v44 = vld [vmem:[%s8801_s1 + $0x68] sm:$0xff]  }
  0xd2   :  { %6035 = vmatmul.mubr.msk.bf16.vlgmr.msra.gmra.mrb[0].mxu0 %vm335_vm2, %v9151_v12 }
  0xd3   :  { %6051 = vmatpush3.bf16.msra.mxu0 %v6620_v48  ;;  %6038 = vmatprep.mubr.msk.bf16.mxu0 %vm335_vm2, %v8220_v30  ;;  %v5115_v48 = vrot.slane %v7390_v27, 9  ;;  %v9154_v27 = vld [vmem:[#allocation77_spill] sm:$0xff] }
  0xd4   :  { %6052 = vmatprep.subr.bf16.mxu0 %v6623_v32 }
  0xd5   :  { %5787 = vmatmul.mubr.msk.bf16.gmra.mrb[12].mxu1 %vm335_vm2, %v7808_v20  ;;  %v8254_v35 = vsel %vm6767_vm3, %v5115_v48, %v1843_v33  ;;  %v9155_v48 = vld [vmem:[#allocation28_spill] sm:$0xff]  ;;  %v9156_v33 = vld [vmem:[#allocation33_spill] sm:$0xff] }
  0xd6   :  { %5794 = vmatprep.mubr.msk.bf16.mxu1 %vm335_vm2, %v5074_v0  ;;  %v8264_v21 = vcombine.low %v9154_v27, %v8254_v35  ;;  %v3597_v27 = vshrl.u32 %v8015_v54, 16 }
  0xd7   :  { %6053 = vmatpush3.bf16.msra.mxu0 %v6623_v32  ;;  %v5301_v32 = vrot.slane %v7969_v14, 9 }
  0xd8   :  { %6070 = vmatprep.subr.bf16.mxu0 %v6626_v10 }
  0xda   :  { %6039 = vmatmul.mubr.msk.bf16.gmra.mrb[4].mxu0 %vm335_vm2, %v5306_v2  ;;  %v2683_v2 = vrot.slane %v7435_v52, 5 }
  0xdb   :  { %6042 = vmatprep.mubr.msk.bf16.mxu0 %vm335_vm2, %v7937_v42 }
  0xdc   :  { %v8280_v52 = vsel %vm6767_vm3, %v5217_v56, %v2683_v2  ;;  %v8296_v56 = vcombine.low %v9156_v33, %v9155_v48  ;;  %v9163_v33 = vld [vmem:[#allocation53_spill] sm:$0xff] }
  0xdd   :  { %5795 = vmatmul.mubr.msk.bf16.vlgmr.msra.gmra.mrb[0].mxu1 %vm335_vm2, %v7857_v28  ;;  %v8284_v28 = vsel %vm6767_vm3, %v5301_v32, %v3451_v46  ;;  %v9159_v32 = vld [vmem:[#allocation40_spill] sm:$0xff] }
  0xde   :  { %5811 = vmatpush3.bf16.msra.mxu1 %v6622_v34  ;;  %5798 = vmatprep.mubr.msk.bf16.mxu1 %vm335_vm2, %v7880_v63  ;;  %v6671_v63 = vld [vmem:[%s8802_s0 + $0x70] sm:$0xf]  ;;  %v5307_v0 = vcombine.low %v8280_v52, %v8284_v28 }
  0xdf   :  { %5812 = vmatprep.subr.bf16.mxu1 %v6625_v44  ;;  %v5078_v34 = vcombine.low %v8170_v59, %v6671_v63  ;;  %v3599_v59 = vrot.slane %v3597_v27, 5  ;;  %v9160_v63 = vor.u32 %v7977_v9, %v7974_v58  ;;  %v9162_v58 = vld [vmem:[#allocation43_spill] sm:$0xff] }
  0xe2   :  { %6043 = vmatmul.mubr.msk.bf16.gmra.mrb[8].mxu0 %vm335_vm2, %v7941_v36  ;;  %5813 = vmatpush3.bf16.msra.mxu1 %v6625_v44  ;;  %v9157_v44 = vshll.u32 %v8015_v54, 16  ;;  %v6628_v54 = vld [vmem:[%s8801_s1 + $0x138] sm:$0xff]  }
  0xe3   :  { %6046 = vmatprep.mubr.msk.bf16.mxu0 %vm335_vm2, %v8264_v21  ;;  %5830 = vmatprep.subr.bf16.mxu1 %v6627_v51 }
  0xe4   :  { %v3600_v2 = vrot.slane %v9157_v44, 6  ;;  %v9165_v44 = vld [vmem:[#allocation12_spill] sm:$0xff] }
  0xe5   :  { %5799 = vmatmul.mubr.msk.bf16.gmra.mrb[4].mxu1 %vm335_vm2, %v7893_v8  ;;  %v9158_v8 = vld [vmem:[#allocation42_spill] sm:$0xff] }
  0xe6   :  { %5802 = vmatprep.mubr.msk.bf16.mxu1 %vm335_vm2, %v5078_v34  ;;  %v8309_v46 = vcombine.low %v9159_v32, %v9158_v8  ;;  %v3596_v34 = vrot.slane %v9160_v63, 4  ;;  %v3601_v48 = vor.u32 %v3600_v2, %v3599_v59  ;;  %v3607_v59 = vshrl.u32 %v8157_v62, 16  ;;  %v9166_v2 = vld [vmem:[#allocation15_spill] sm:$0xff] }
  0xe7   :  { %v9167_v8 = vcombine.low %v9165_v44, %v9166_v2 }
  0xe8   :  { %v3609_v32 = vrot.slane %v3607_v59, 5 }
  0xea   :  { %6047 = vmatmul.mubr.msk.bf16.gmra.mrb[12].mxu0 %vm335_vm2, %v5307_v0  ;;  %v9161_v0 = vld [vmem:[#allocation39_spill] sm:$0xff] }
  0xeb   :  { %6054 = vmatprep.mubr.msk.bf16.mxu0 %vm335_vm2, %v8296_v56 }
  0xed   :  { %5803 = vmatmul.mubr.msk.bf16.gmra.mrb[8].mxu1 %vm335_vm2, %v7960_v6  ;;  %v8325_v6 = vsel %vm7056_vm9, %v3596_v34, %v3601_v48  ;;  %v6629_v34 = vld [vmem:[%s8801_s1 + $0x78] sm:$0xff]   ;;  %v9169_v48 = vor.u32 %v7999_v50, %v7995_v47  ;;  %v9170_v50 = vld [vmem:[#allocation36_spill] sm:$0xff] }
  0xee   :  { %5806 = vmatprep.mubr.msk.bf16.mxu1 %vm335_vm2, %v7765_v26  ;;  %v6630_v26 = vld [vmem:[%s8801_s1 + $0x140] sm:$0xff]   ;;  %v5322_v9 = vcombine.low %v9162_v58, %v8325_v6 }
  0xf2   :  { %6055 = vmatmul.mubr.msk.bf16.vlgmr.msra.gmra.mrb[0].mxu0 %vm335_vm2, %v9161_v0 }
  0xf3   :  { %6071 = vmatpush3.bf16.msra.mxu0 %v6626_v10  ;;  %6058 = vmatprep.mubr.msk.bf16.mxu0 %vm335_vm2, %v8309_v46  ;;  %v9164_v10 = vld [vmem:[#allocation51_spill] sm:$0xff] }
  0xf4   :  { %6072 = vmatprep.subr.bf16.mxu0 %v6628_v54  ;;  %v8336_v27 = vcombine.low %v9164_v10, %v9163_v33  ;;  %v8382_v10 = vld [vmem:[%s8802_s0 + $0x58] sm:$0xf] }
  0xf5   :  { %5807 = vmatmul.mubr.msk.bf16.gmra.mrb[12].mxu1 %vm335_vm2, %v8024_v45  ;;  %v9168_v45 = vshll.u32 %v8157_v62, 16  ;;  %v4044_v59 = vshrl.u32 %v8382_v10, 16  ;;  %v4047_v44 = vshll.u32 %v8382_v10, 16  ;;  %v5384_v19 = vrot.slane %v8382_v10, 9 }
  0xf6   :  { %5814 = vmatprep.mubr.msk.bf16.mxu1 %vm335_vm2, %v9167_v8  ;;  %v5418_v31 = vrot.slane %v8382_v10, 10 }
  0xf7   :  { %6073 = vmatpush3.bf16.msra.mxu0 %v6628_v54  ;;  %v3610_v63 = vrot.slane %v9168_v45, 6  ;;  %v3606_v54 = vrot.slane %v9169_v48, 4  ;;  %v8395_v2 = vrot.slane %v4044_v59, 5  ;;  %v8399_v8 = vrot.slane %v4047_v44, 6  ;;  %v9174_v45 = vld [vmem:[#allocation69_spill] sm:$0xff] }
  0xf8   :  { %6090 = vmatprep.subr.bf16.mxu0 %v6630_v26 }
  0xf9   :  { %v3611_v58 = vor.u32 %v3610_v63, %v3609_v32  ;;  %v6634_v32 = vld [vmem:[%s8801_s1 + $0x150] sm:$0xff]   ;;  %v5340_v63 = vcombine.low %v9174_v45, %v8055_v11  ;;  %v9179_v45 = vld [vmem:[#allocation7_spill] sm:$0xff] }
  0xfa   :  { %6059 = vmatmul.mubr.msk.bf16.gmra.mrb[4].mxu0 %vm335_vm2, %v5322_v9  ;;  %v6631_v9 = vld [vmem:[%s8801_s1 + $0x80] sm:$0xff]  }
  0xfb   :  { %6062 = vmatprep.mubr.msk.bf16.mxu0 %vm335_vm2, %v8336_v27  ;;  %v8367_v47 = vsel %vm7056_vm9, %v3606_v54, %v3611_v58  ;;  %v6633_v54 = vld [vmem:[%s8801_s1 + $0x88] sm:$0xff]   ;;  %v5335_v58 = vrot.slane %v7969_v14, 10 }
  0xfd   :  { %5815 = vmatmul.mubr.msk.bf16.vlgmr.msra.gmra.mrb[0].mxu1 %vm335_vm2, %v8071_v57  ;;  %v9171_v57 = vld [vmem:[#allocation35_spill] sm:$0xff] }
  0xfe   :  { %5831 = vmatpush3.bf16.msra.mxu1 %v6627_v51  ;;  %5818 = vmatprep.mubr.msk.bf16.mxu1 %vm335_vm2, %v9133_v17  ;;  %v5100_v51 = vcombine.low %v9171_v57, %v9170_v50  ;;  %v9172_v17 = vld [vmem:[#allocation60_spill] sm:$0xff]  ;;  %v3759_v50 = vrot.slane %v8157_v62, 6 }
  0xff   :  { %5832 = vmatprep.subr.bf16.mxu1 %v6629_v34  ;;  %v5323_v33 = vcombine.low %v9172_v17, %v8367_v47  ;;  %v6637_v17 = vld [vmem:[%s8801_s1 + $0x90] sm:$0xff]  }
 0x102   :  { %6063 = vmatmul.mubr.msk.bf16.gmra.mrb[8].mxu0 %vm335_vm2, %v7987_v16  ;;  %5833 = vmatpush3.bf16.msra.mxu1 %v6629_v34  ;;  %v9175_v34 = vld [vmem:[#allocation5_spill] sm:$0xff] }
 0x103   :  { %6066 = vmatprep.mubr.msk.bf16.mxu0 %vm335_vm2, %v7991_v5  ;;  %5850 = vmatprep.subr.bf16.mxu1 %v6631_v9 }
 0x105   :  { %5819 = vmatmul.mubr.msk.bf16.gmra.mrb[4].mxu1 %vm335_vm2, %v8107_v60  ;;  %v6632_v60 = vld [vmem:[%s8801_s1 + $0x148] sm:$0xff]  }
 0x106   :  { %5822 = vmatprep.mubr.msk.bf16.mxu1 %vm335_vm2, %v5100_v51 }
 0x10a   :  { %6067 = vmatmul.mubr.msk.bf16.gmra.mrb[12].mxu0 %vm335_vm2, %v5323_v33 }
 0x10b   :  { %6074 = vmatprep.mubr.msk.bf16.mxu0 %vm335_vm2, %v8006_v24 }
 0x10d   :  { %5823 = vmatmul.mubr.msk.bf16.gmra.mrb[8].mxu1 %vm335_vm2, %v8147_v55  ;;  %v9173_v55 = vld [vmem:[#allocation65_spill] sm:$0xff] }
 0x10e   :  { %5826 = vmatprep.mubr.msk.bf16.mxu1 %vm335_vm2, %v7862_v1  ;;  %v4363_v1 = vor.u32 %v8399_v8, %v8395_v2 }
 0x112   :  { %6075 = vmatmul.mubr.msk.bf16.vlgmr.msra.gmra.mrb[0].mxu0 %vm335_vm2, %v9173_v55 }
 0x113   :  { %6091 = vmatpush3.bf16.msra.mxu0 %v6630_v26  ;;  %6078 = vmatprep.mubr.msk.bf16.mxu0 %vm335_vm2, %v8010_v49  ;;  %v9176_v26 = vld [vmem:[#allocation2_spill] sm:$0xff] }
 0x114   :  { %6092 = vmatprep.subr.bf16.mxu0 %v6632_v60  ;;  %v9177_v48 = vcombine.low %v9175_v34, %v9176_v26  ;;  %v6641_v26 = vld [vmem:[%s8801_s1 + $0x98] sm:$0xff]  }
 0x115   :  { %5827 = vmatmul.mubr.msk.bf16.gmra.mrb[12].mxu1 %vm335_vm2, %v8183_v37  ;;  %v8427_v37 = vld [vmem:[%s8802_s0 + $0xb8] sm:$0xf] }
 0x116   :  { %5834 = vmatprep.mubr.msk.bf16.mxu1 %vm335_vm2, %v9177_v48  ;;  %v4058_v57 = vshrl.u32 %v8427_v37, 16  ;;  %v4061_v51 = vshll.u32 %v8427_v37, 16 }
 0x117   :  { %6093 = vmatpush3.bf16.msra.mxu0 %v6632_v60  ;;  %v9178_v60 = vcombine.low %v7821_v43, %v9134_v22  ;;  %v6638_v43 = vld [vmem:[%s8801_s1 + $0x158] sm:$0xff]   ;;  %v9182_v22 = vld [vmem:[#allocation32_spill] sm:$0xff] }
 0x118   :  { %6110 = vmatprep.subr.bf16.mxu0 %v6634_v32  ;;  %v8446_v62 = vrot.slane %v4061_v51, 6 }
 0x11a   :  { %6079 = vmatmul.mubr.msk.bf16.gmra.mrb[4].mxu0 %vm335_vm2, %v5340_v63  ;;  %v9180_v63 = vld [vmem:[#allocation46_spill] sm:$0xff] }
 0x11b   :  { %6082 = vmatprep.mubr.msk.bf16.mxu0 %vm335_vm2, %v8029_v38  ;;  %v8473_v34 = vcombine.low %v9180_v63, %v7951_v3  ;;  %v6642_v3 = vld [vmem:[%s8801_s1 + $0x160] sm:$0xff]   ;;  %v8533_v63 = vld [vmem:[%s8802_s0 + $0x5c] sm:$0x3] }
 0x11d   :  { %5835 = vmatmul.mubr.msk.bf16.vlgmr.msra.gmra.mrb[0].mxu1 %vm335_vm2, %v9147_v23  ;;  %v8442_v23 = vrot.slane %v4058_v57, 5 }
 0x11e   :  { %5851 = vmatpush3.bf16.msra.mxu1 %v6631_v9  ;;  %5838 = vmatprep.mubr.msk.bf16.mxu1 %vm335_vm2, %v9151_v12  ;;  %v8454_v12 = vsel %vm7501_vm12, %v5335_v58, %v3759_v50  ;;  %v9186_v58 = vld [vmem:[#allocation49_spill] sm:$0xff]  ;;  %v9187_v50 = vld [vmem:[#allocation66_spill] sm:$0xff] }
 0x11f   :  { %5852 = vmatprep.subr.bf16.mxu1 %v6633_v54  ;;  %v4373_v9 = vor.u32 %v8446_v62, %v8442_v23  ;;  %v5341_v33 = vcombine.low %v7844_v40, %v8454_v12  ;;  %v9181_v40 = vld [vmem:[#allocation55_spill] sm:$0xff] }
 0x122   :  { %6083 = vmatmul.mubr.msk.bf16.gmra.mrb[8].mxu0 %vm335_vm2, %v8033_v61  ;;  %5853 = vmatpush3.bf16.msra.mxu1 %v6633_v54  ;;  %v6643_v54 = vld [vmem:[%s8801_s1 + $0xa0] sm:$0xff]  }
 0x123   :  { %6086 = vmatprep.mubr.msk.bf16.mxu0 %vm335_vm2, %v8061_v41  ;;  %5870 = vmatprep.subr.bf16.mxu1 %v6637_v17 }
 0x125   :  { %5839 = vmatmul.mubr.msk.bf16.gmra.mrb[4].mxu1 %vm335_vm2, %v8220_v30 }
 0x126   :  { %5842 = vmatprep.mubr.msk.bf16.mxu1 %vm335_vm2, %v9178_v60  ;;  %v4049_v60 = vrot.slane %v4047_v44, 5  ;;  %v9190_v44 = vld [vmem:[#allocation34_spill] sm:$0xff] }
 0x12a   :  { %6087 = vmatmul.mubr.msk.bf16.gmra.mrb[12].mxu0 %vm335_vm2, %v5341_v33  ;;  %v5146_v33 = vcombine.low %v9187_v50, %v9186_v58  ;;  %v9194_v50 = vld [vmem:[#allocation23_spill] sm:$0xff] }
 0x12b   :  { %6094 = vmatprep.mubr.msk.bf16.mxu0 %vm335_vm2, %v9179_v45 }
 0x12d   :  { %5843 = vmatmul.mubr.msk.bf16.gmra.mrb[8].mxu1 %vm335_vm2, %v7937_v42  ;;  %v9183_v42 = vld [vmem:[#allocation3_spill] sm:$0xff] }
 0x12e   :  { %5846 = vmatprep.mubr.msk.bf16.mxu1 %vm335_vm2, %v7941_v36  ;;  %v5142_v30 = vcombine.low %v9183_v42, %v9182_v22  ;;  %v5356_v36 = vcombine.low %v7914_v18, %v8382_v10  ;;  %v6672_v18 = vld [vmem:[%s8802_s0 + $0xa0] sm:$0xf] }
 0x12f   :  { %v9215_v10 = vld [vmem:[#allocation76_spill] sm:$0xff] }
 0x132   :  { %6095 = vmatmul.mubr.msk.bf16.vlgmr.msra.gmra.mrb[0].mxu0 %vm335_vm2, %v9181_v40 }
 0x133   :  { %6111 = vmatpush3.bf16.msra.mxu0 %v6634_v32  ;;  %6098 = vmatprep.mubr.msk.bf16.mxu0 %vm335_vm2, %v8473_v34  ;;  %v9184_v32 = vld [vmem:[#allocation67_spill] sm:$0xff] }
 0x134   :  { %6112 = vmatprep.subr.bf16.mxu0 %v6638_v43 }
 0x135   :  { %5847 = vmatmul.mubr.msk.bf16.gmra.mrb[12].mxu1 %vm335_vm2, %v8264_v21  ;;  %v6673_v21 = vld [vmem:[%s8802_s0 + $0xa8] sm:$0xf] }
 0x136   :  { %5854 = vmatprep.mubr.msk.bf16.mxu1 %vm335_vm2, %v5142_v30  ;;  %v8508_v48 = vcombine.low %v6672_v18, %v6673_v21  ;;  %v9192_v18 = vld [vmem:[#allocation58_spill] sm:$0xff] }
 0x137   :  { %6113 = vmatpush3.bf16.msra.mxu0 %v6638_v43  ;;  %v9188_v43 = vld [vmem:[#allocation24_spill] sm:$0xff]  ;;  %v9193_v21 = vld [vmem:[#allocation10_spill] sm:$0xff] }
 0x138   :  { %6130 = vmatprep.subr.bf16.mxu0 %v6642_v3  ;;  %v5166_v58 = vcombine.low %v9193_v21, %v9192_v18  ;;  %v9201_v18 = vld [vmem:[#allocation4_spill] sm:$0xff]  ;;  %v9202_v21 = vld [vmem:[#allocation25_spill] sm:$0xff] }
 0x13a   :  { %6099 = vmatmul.mubr.msk.bf16.gmra.mrb[4].mxu0 %vm335_vm2, %v5356_v36  ;;  %v6644_v36 = vld [vmem:[%s8801_s1 + $0x168] sm:$0xff]  }
 0x13b   :  { %6102 = vmatprep.mubr.msk.bf16.mxu0 %vm335_vm2, %v9184_v32 }
 0x13d   :  { %5855 = vmatmul.mubr.msk.bf16.vlgmr.msra.gmra.mrb[0].mxu1 %vm335_vm2, %v8296_v56  ;;  %v9185_v56 = vld [vmem:[#allocation71_spill] sm:$0xff] }
 0x13e   :  { %5871 = vmatpush3.bf16.msra.mxu1 %v6637_v17  ;;  %5858 = vmatprep.mubr.msk.bf16.mxu1 %vm335_vm2, %v9161_v0  ;;  %v5357_v17 = vcombine.low %v7969_v14, %v8427_v37  ;;  %v4046_v0 = vrot.slane %v4044_v59, 4  ;;  %v9189_v59 = vld [vmem:[#allocation74_spill] sm:$0xff] }
 0x13f   :  { %5872 = vmatprep.subr.bf16.mxu1 %v6641_v26  ;;  %v8543_v22 = vcombine.low %v9190_v44, %v9189_v59 }
 0x140   :  { %v4050_v14 = vor.u32 %v4049_v60, %v4046_v0  ;;  %v8574_v0 = vld [vmem:[%s8802_s0 + $0xbc] sm:$0x3] }
 0x141   :  { %v9195_v60 = vld [vmem:[#allocation47_spill] sm:$0xff]  ;;  %v4375_v8 = vshrl.u32 %v8574_v0, 16 }
 0x142   :  { %6103 = vmatmul.mubr.msk.bf16.gmra.mrb[8].mxu0 %vm335_vm2, %v9185_v56  ;;  %5873 = vmatpush3.bf16.msra.mxu1 %v6641_v26  ;;  %v4051_v42 = vrot.slane %v4050_v14, 4  ;;  %v9191_v26 = vld [vmem:[#allocation31_spill] sm:$0xff]  ;;  %v4067_v14 = vshll.u32 %v8574_v0, 16 }
 0x143   :  { %6106 = vmatprep.mubr.msk.bf16.mxu0 %vm335_vm2, %v8508_v48  ;;  %5890 = vmatprep.subr.bf16.mxu1 %v6643_v54 }
 0x144   :  { %v4069_v44 = vrot.slane %v4067_v14, 5 }
 0x145   :  { %5859 = vmatmul.mubr.msk.bf16.gmra.mrb[4].mxu1 %vm335_vm2, %v8309_v46  ;;  %v4053_v46 = vshll.u32 %v8533_v63, 16 }
 0x146   :  { %5862 = vmatprep.mubr.msk.bf16.mxu1 %vm335_vm2, %v5146_v33 }
 0x147   :  { %v4055_v30 = vrot.slane %v4053_v46, 5 }
 0x14a   :  { %6107 = vmatmul.mubr.msk.bf16.gmra.mrb[12].mxu0 %vm335_vm2, %v5357_v17  ;;  %v4063_v17 = vrot.slane %v4061_v51, 5  ;;  %v8587_v51 = vcombine.low %v7904_v39, %v7920_v29  ;;  %v9197_v29 = vld [vmem:[#allocation70_spill] sm:$0xff] }
 0x14b   :  { %6114 = vmatprep.mubr.msk.bf16.mxu0 %vm335_vm2, %v9188_v43 }
 0x14d   :  { %5863 = vmatmul.mubr.msk.bf16.gmra.mrb[8].mxu1 %vm335_vm2, %v8336_v27  ;;  %v4056_v27 = vsel %vm6889_vm6, %v4051_v42, %v4055_v30  ;;  %v6647_v42 = vld [vmem:[%s8801_s1 + $0xb0] sm:$0xff]  }
 0x14e   :  { %5866 = vmatprep.mubr.msk.bf16.mxu1 %vm335_vm2, %v7987_v16  ;;  %v6646_v16 = vld [vmem:[%s8801_s1 + $0x170] sm:$0xff]   ;;  %v5372_v33 = vcombine.low %v9194_v50, %v4056_v27  ;;  %v6650_v27 = vld [vmem:[%s8801_s1 + $0x180] sm:$0xff]   ;;  %v9203_v50 = vld [vmem:[#allocation27_spill] sm:$0xff] }
 0x14f   :  { %v9196_v30 = vld [vmem:[#allocation50_spill] sm:$0xff] }
 0x152   :  { %6115 = vmatmul.mubr.msk.bf16.vlgmr.msra.gmra.mrb[0].mxu0 %vm335_vm2, %v9191_v26 }
 0x153   :  { %6131 = vmatpush3.bf16.msra.mxu0 %v6642_v3  ;;  %6118 = vmatprep.mubr.msk.bf16.mxu0 %vm335_vm2, %v8543_v22  ;;  %v4060_v3 = vrot.slane %v4058_v57, 4  ;;  %v6645_v57 = vld [vmem:[%s8801_s1 + $0xa8] sm:$0xff]  }
 0x154   :  { %6132 = vmatprep.subr.bf16.mxu0 %v6644_v36 }
 0x155   :  { %5867 = vmatmul.mubr.msk.bf16.gmra.mrb[12].mxu1 %vm335_vm2, %v7991_v5  ;;  %v4064_v5 = vor.u32 %v4063_v17, %v4060_v3  ;;  %v4368_v17 = vrot.slane %v4053_v46, 6  ;;  %v9207_v46 = vld [vmem:[#allocation44_spill] sm:$0xff] }
 0x156   :  { %5874 = vmatprep.mubr.msk.bf16.mxu1 %vm335_vm2, %v5166_v58  ;;  %v6649_v58 = vld [vmem:[%s8801_s1 + $0xb8] sm:$0xff]  }
 0x157   :  { %6133 = vmatpush3.bf16.msra.mxu0 %v6644_v36  ;;  %v4065_v59 = vrot.slane %v4064_v5, 4  ;;  %v9200_v36 = vld [vmem:[#allocation22_spill] sm:$0xff]  ;;  %v6651_v5 = vld [vmem:[%s8801_s1 + $0x188] sm:$0xff]  }
 0x158   :  { %6150 = vmatprep.subr.bf16.mxu0 %v6646_v16 }
 0x159   :  { %v4070_v39 = vsel %vm6889_vm6, %v4065_v59, %v4069_v44  ;;  %v4377_v59 = vrot.slane %v4375_v8, 5  ;;  %v4378_v44 = vrot.slane %v4067_v14, 6  ;;  %v9211_v14 = vld [vmem:[#allocation62_spill] sm:$0xff] }
 0x15a   :  { %6119 = vmatmul.mubr.msk.bf16.gmra.mrb[4].mxu0 %vm335_vm2, %v5372_v33  ;;  %v9204_v33 = vld [vmem:[#allocation64_spill] sm:$0xff] }
 0x15b   :  { %6122 = vmatprep.mubr.msk.bf16.mxu0 %vm335_vm2, %v9195_v60 }
 0x15d   :  { %5875 = vmatmul.mubr.msk.bf16.vlgmr.msra.gmra.mrb[0].mxu1 %vm335_vm2, %v8006_v24  ;;  %v5170_v24 = vcombine.low %v8194_v53, %v9197_v29  ;;  %v4215_v53 = vrot.slane %v8533_v63, 5 }
 0x15e   :  { %5891 = vmatpush3.bf16.msra.mxu1 %v6643_v54  ;;  %5878 = vmatprep.mubr.msk.bf16.mxu1 %vm335_vm2, %v9173_v55  ;;  %v5373_v55 = vcombine.low %v8205_v4, %v4070_v39  ;;  %v9198_v54 = vld [vmem:[#allocation6_spill] sm:$0xff]  ;;  %v9199_v4 = vld [vmem:[#allocation19_spill] sm:$0xff]  ;;  %v9210_v39 = vld [vmem:[#allocation56_spill] sm:$0xff] }
 0x15f   :  { %5892 = vmatprep.subr.bf16.mxu1 %v6645_v57 }
 0x162   :  { %6123 = vmatmul.mubr.msk.bf16.gmra.mrb[8].mxu0 %vm335_vm2, %v9196_v30  ;;  %5893 = vmatpush3.bf16.msra.mxu1 %v6645_v57  ;;  %v9206_v57 = vld [vmem:[#allocation41_spill] sm:$0xff] }
 0x163   :  { %6126 = vmatprep.mubr.msk.bf16.mxu0 %vm335_vm2, %v8587_v51  ;;  %5910 = vmatprep.subr.bf16.mxu1 %v6647_v42 }
 0x165   :  { %5879 = vmatmul.mubr.msk.bf16.gmra.mrb[4].mxu1 %vm335_vm2, %v8010_v49  ;;  %v6648_v49 = vld [vmem:[%s8801_s1 + $0x178] sm:$0xff]  }
 0x166   :  { %5882 = vmatprep.mubr.msk.bf16.mxu1 %vm335_vm2, %v5170_v24 }
 0x16a   :  { %6127 = vmatmul.mubr.msk.bf16.gmra.mrb[12].mxu0 %vm335_vm2, %v5373_v55 }
 0x16b   :  { %6134 = vmatprep.mubr.msk.bf16.mxu0 %vm335_vm2, %v9198_v54 }
 0x16d   :  { %5883 = vmatmul.mubr.msk.bf16.gmra.mrb[8].mxu1 %vm335_vm2, %v8029_v38  ;;  %v4216_v38 = vsel %vm6767_vm3, %v5384_v19, %v4215_v53 }
 0x16e   :  { %5886 = vmatprep.mubr.msk.bf16.mxu1 %vm335_vm2, %v8033_v61  ;;  %v5390_v61 = vcombine.low %v8235_v7, %v4216_v38  ;;  %v5385_v7 = vrot.slane %v8427_v37, 9 }
 0x172   :  { %6135 = vmatmul.mubr.msk.bf16.vlgmr.msra.gmra.mrb[0].mxu0 %vm335_vm2, %v9199_v4 }
 0x173   :  { %6151 = vmatpush3.bf16.msra.mxu0 %v6646_v16  ;;  %6138 = vmatprep.mubr.msk.bf16.mxu0 %vm335_vm2, %v9200_v36  ;;  %v4219_v16 = vrot.slane %v8574_v0, 5 }
 0x174   :  { %6152 = vmatprep.subr.bf16.mxu0 %v6648_v49 }
 0x175   :  { %5887 = vmatmul.mubr.msk.bf16.gmra.mrb[12].mxu1 %vm335_vm2, %v8061_v41  ;;  %v8644_v41 = vcombine.low %v8254_v35, %v8280_v52  ;;  %v6674_v35 = vld [vmem:[%s8801_s1 + $0xc0] sm:$0xff]  }
 0x176   :  { %5894 = vmatprep.mubr.msk.bf16.mxu1 %vm335_vm2, %v9201_v18 }
 0x177   :  { %6153 = vmatpush3.bf16.msra.mxu0 %v6648_v49 }
 0x178   :  { %6170 = vmatprep.subr.bf16.mxu0 %v6650_v27 }
 0x17a   :  { %6139 = vmatmul.mubr.msk.bf16.gmra.mrb[4].mxu0 %vm335_vm2, %v5390_v61 }
 0x17b   :  { %6142 = vmatprep.mubr.msk.bf16.mxu0 %vm335_vm2, %v9202_v21 }
 0x17d   :  { %5895 = vmatmul.mubr.msk.bf16.vlgmr.msra.gmra.mrb[0].mxu1 %vm335_vm2, %v9179_v45  ;;  %v4220_v45 = vsel %vm6767_vm3, %v5385_v7, %v4219_v16 }
 0x17e   :  { %5911 = vmatpush3.bf16.msra.mxu1 %v6647_v42  ;;  %5898 = vmatprep.mubr.msk.bf16.mxu1 %vm335_vm2, %v9181_v40  ;;  %v5391_v52 = vcombine.low %v8284_v28, %v4220_v45  ;;  %v4365_v40 = vshrl.u32 %v8533_v63, 16  ;;  %v4364_v28 = vrot.slane %v4363_v1, 4  ;;  %v9208_v1 = vld [vmem:[#allocation18_spill] sm:$0xff]  ;;  %v6675_v42 = vld [vmem:[%s8801_s1 + $0xc8] sm:$0xff]   ;;  %s6676_s1 = smov 64  }
 0x17f   :  { %5912 = vmatprep.subr.bf16.mxu1 %v6649_v58 }
 0x180   :  { %v4367_v3 = vrot.slane %v4365_v40, 5 }
 0x182   :  { %6143 = vmatmul.mubr.msk.bf16.gmra.mrb[8].mxu0 %vm335_vm2, %v9203_v50  ;;  %5913 = vmatpush3.bf16.msra.mxu1 %v6649_v58 }
 0x183   :  { %6146 = vmatprep.mubr.msk.bf16.mxu0 %vm335_vm2, %v8644_v41  ;;  %6190 = vmatprep.subr.bf16.mxu1 %v6674_v35 }
 0x185   :  { %5899 = vmatmul.mubr.msk.bf16.gmra.mrb[4].mxu1 %vm335_vm2, %v8473_v34  ;;  %v4369_v34 = vor.u32 %v4368_v17, %v4367_v3 }
 0x186   :  { %5902 = vmatprep.mubr.msk.bf16.mxu1 %vm335_vm2, %v9204_v33 }
 0x18a   :  { %6147 = vmatmul.mubr.msk.bf16.gmra.mrb[12].mxu0 %vm335_vm2, %v5391_v52 }
 0x18b   :  { %6154 = vmatprep.mubr.msk.bf16.mxu0 %vm335_vm2, %v9205_v15 }
 0x18d   :  { %5903 = vmatmul.mubr.msk.bf16.gmra.mrb[8].mxu1 %vm335_vm2, %v9184_v32  ;;  %v4370_v32 = vsel %vm7056_vm9, %v4364_v28, %v4369_v34 }
 0x18e   :  { %5906 = vmatprep.mubr.msk.bf16.mxu1 %vm335_vm2, %v9185_v56  ;;  %v5406_v2 = vcombine.low %v8325_v6, %v4370_v32  ;;  %v9209_v56 = vld [vmem:[#allocation54_spill] sm:$0xff]  ;;  %v4374_v6 = vrot.slane %v4373_v9, 4 }
 0x18f   :  { %v9212_v9 = vld [vmem:[#allocation38_spill] sm:$0xff] }
 0x192   :  { %6155 = vmatmul.mubr.msk.bf16.vlgmr.msra.gmra.mrb[0].mxu0 %vm335_vm2, %v9206_v57 }
 0x193   :  { %6171 = vmatpush3.bf16.msra.mxu0 %v6650_v27  ;;  %6158 = vmatprep.mubr.msk.bf16.mxu0 %vm335_vm2, %v9207_v46 }
 0x194   :  { %6172 = vmatprep.subr.bf16.mxu0 %v6651_v5 }
 0x195   :  { %5907 = vmatmul.mubr.msk.bf16.gmra.mrb[12].mxu1 %vm335_vm2, %v8508_v48  ;;  %v4379_v48 = vor.u32 %v4378_v44, %v4377_v59 }
 0x196   :  { %5914 = vmatprep.mubr.msk.bf16.mxu1 %vm335_vm2, %v9208_v1 }
 0x197   :  { %6173 = vmatpush3.bf16.msra.mxu0 %v6651_v5  ;;  %v4380_v23 = vsel %vm7056_vm9, %v4374_v6, %v4379_v48 }
 0x198   :  { %v5407_v62 = vcombine.low %v8367_v47, %v4380_v23  ;;  %v9213_v47 = vld [vmem:[#allocation68_spill] sm:$0xff] }
 0x19a   :  { %6159 = vmatmul.mubr.msk.bf16.gmra.mrb[4].mxu0 %vm335_vm2, %v5406_v2 }
 0x19b   :  { %6162 = vmatprep.mubr.msk.bf16.mxu0 %vm335_vm2, %v9209_v56 }
 0x19d   :  { %5915 = vmatmul.mubr.msk.bf16.vlgmr.msra.gmra.mrb[0].mxu1 %vm335_vm2, %v9188_v43  ;;  %v4523_v43 = vrot.slane %v8533_v63, 6  ;;  %v9216_v63 = vld [vmem:[#allocation79_spill] sm:$0xff] }
 0x19e   :  { %6192 = vmatpush3.bf16.msra.mxu1 %v6674_v35  ;;  %5918 = vmatprep.mubr.msk.bf16.mxu1 %vm335_vm2, %v9191_v26 }
 0x19f   :  { %6191 = vmatprep.subr.bf16.mxu1 %v6675_v42  ;;  %v4524_v26 = vsel %vm7501_vm12, %v5418_v31, %v4523_v43 }
 0x1a2   :  { %6163 = vmatmul.mubr.msk.bf16.gmra.mrb[8].mxu0 %vm335_vm2, %v9210_v39  ;;  %6193 = vmatpush3.bf16.msra.mxu1 %v6675_v42 }
 0x1a3   :  { %6166 = vmatprep.mubr.msk.bf16.mxu0 %vm335_vm2, %v9211_v14 }
 0x1a5   :  { %5919 = vmatmul.mubr.msk.bf16.gmra.mrb[4].mxu1 %vm335_vm2, %v8543_v22  ;;  %v9214_v22 = vld [vmem:[#allocation72_spill] sm:$0xff] }
 0x1a6   :  { %5922 = vmatprep.mubr.msk.bf16.mxu1 %vm335_vm2, %v9212_v9 }
 0x1aa   :  { %6167 = vmatmul.mubr.msk.bf16.gmra.mrb[12].mxu0 %vm335_vm2, %v5407_v62 }
 0x1ab   :  { %6174 = vmatprep.mubr.msk.bf16.mxu0 %vm335_vm2, %v9145_v13  ;;  %v5424_v13 = vcombine.low %v8055_v11, %v4524_v26  ;;  %v9217_v11 = vld [vmem:[#allocation80_spill] sm:$0xff] }
 0x1ad   :  { %5923 = vmatmul.mubr.msk.bf16.gmra.mrb[8].mxu1 %vm335_vm2, %v9195_v60  ;;  %v5419_v60 = vrot.slane %v8427_v37, 10 }
 0x1ae   :  { %5926 = vmatprep.mubr.msk.bf16.mxu1 %vm335_vm2, %v9196_v30  ;;  %v4527_v30 = vrot.slane %v8574_v0, 6 }
 0x1b2   :  { %6175 = vmatmul.mubr.msk.bf16.vlgmr.msra.gmra.mrb[0].mxu0 %vm335_vm2, %v9213_v47 }
 0x1b3   :  { %6178 = vmatprep.mubr.msk.bf16.mxu0 %vm335_vm2, %v9214_v22 }
 0x1b5   :  { %5927 = vmatmul.mubr.msk.bf16.gmra.mrb[12].mxu1 %vm335_vm2, %v8587_v51  ;;  %v4528_v51 = vsel %vm7501_vm12, %v5419_v60, %v4527_v30 }
 0x1b6   :  { %5942 = vmatprep.mubr.msk.bf16.mxu1 %vm335_vm2, %v9215_v10  ;;  %v5425_v29 = vcombine.low %v8454_v12, %v4528_v51 }
 0x1ba   :  { %6179 = vmatmul.mubr.msk.bf16.gmra.mrb[4].mxu0 %vm335_vm2, %v5424_v13 }
 0x1bb   :  { %6182 = vmatprep.mubr.msk.bf16.mxu0 %vm335_vm2, %v9216_v63 }
 0x1bd   :  { %5943 = vmatmul.mubr.msk.bf16.vlgmr.msra.gmra.mrb[8].mxu1 %vm335_vm2, %v9202_v21 }
 0x1be   :  { %5946 = vmatprep.mubr.msk.bf16.mxu1 %vm335_vm2, %v9203_v50 }
 0x1c2   :  { %6183 = vmatmul.mubr.msk.bf16.gmra.mrb[8].mxu0 %vm335_vm2, %v7808_v20 }
 0x1c3   :  { %6186 = vmatprep.mubr.msk.bf16.mxu0 %vm335_vm2, %v9217_v11 }
 0x1c5   :  { %5947 = vmatmul.mubr.msk.bf16.gmra.mrb[12].mxu1 %vm335_vm2, %v8644_v41 }
 0x1ca   :  { %6187 = vmatmul.mubr.msk.bf16.gmra.mrb[12].mxu0 %vm335_vm2, %v5425_v29 }
 0x270   :  { %v5916_v37 = vpop.f32.mrb[0].mxu1 }
 0x271   :  { %v2596_v0 = vpop.f32.mrb[1].mxu1 }
 0x272   :  { %v5917_v24 = vpop.f32.mrb[2].mxu1 }
 0x273   :  { %v2599_v55 = vpop.f32.mrb[3].mxu1 }
 0x278   :  { %v5920_v54 = vpop.f32.mrb[4].mxu1 }
 0x279   :  { %v2612_v19 = vpop.f32.mrb[5].mxu1 }
 0x27a   :  { %v5921_v20 = vpop.f32.mrb[6].mxu1 }
 0x27b   :  { %v2615_v53 = vpop.f32.mrb[7].mxu1 }
 0x285   :  { %v6176_v49 = vpop.f32.mrb[0].mxu0 }
 0x286   :  { %v6194_v4 = vadd.f32 %v6176_v49, %v5916_v37  ;;  %v4590_v36 = vpop.f32.mrb[1].mxu0 }
 0x287   :  { %v6195_v25 = vadd.f32 %v4590_v36, %v2596_v0  ;;  %v6177_v38 = vpop.f32.mrb[2].mxu0 }
 0x288   :  { %v6196_v27 = vadd.f32 %v6177_v38, %v5917_v24  ;;  %v4593_v12 = vpop.f32.mrb[3].mxu0 }
 0x289   :  { %v6197_v61 = vadd.f32 %v4593_v12, %v2599_v55 }
 0x28a   :  { %v4679_v18 = vmax.f32 %v6194_v4, %v6196_v27 }
 0x28b   :  { %v4669_v21 = vmax.f32 %v6195_v25, %v6197_v61 }
 0x28c   :  { %v4683_v28 = vrot.slane %v4679_v18, 1 }
 0x28d   :  { %v6180_v58 = vpop.f32.mrb[4].mxu0  ;;  %v4673_v57 = vrot.slane %v4669_v21, 1 }
 0x28e   :  { %v6198_v41 = vadd.f32 %v6180_v58, %v5920_v54  ;;  %v4606_v7 = vpop.f32.mrb[5].mxu0  ;;  %v4687_v59 = vmax.f32 %v4679_v18, %v4683_v28 }
 0x28f   :  { %v6199_v16 = vadd.f32 %v4606_v7, %v2612_v19  ;;  %v6181_v50 = vpop.f32.mrb[6].mxu0  ;;  %v4677_v6 = vmax.f32 %v4669_v21, %v4673_v57 }
 0x290   :  { %v6200_v45 = vadd.f32 %v6181_v50, %v5921_v20  ;;  %v4609_v35 = vpop.f32.mrb[7].mxu0  ;;  %v5944_v33 = vpop.f32.mrb[8].mxu1  ;;  %v4736_v26 = vrot.slane %v4687_v59, 2  ;;  %v4746_v13 = vrot.slane %v4687_v59, 6  ;;  %v4742_v10 = vrot.slane %v4687_v59, 4 }
 0x291   :  { %v6201_v52 = vadd.f32 %v4609_v35, %v2615_v53  ;;  %v2778_v3 = vpop.f32.mrb[9].mxu1  ;;  %v4715_v11 = vrot.slane %v4677_v6, 2  ;;  %v4725_v51 = vrot.slane %v4677_v6, 6 }
 0x292   :  { %v4699_v40 = vmax.f32 %v6198_v41, %v6200_v45  ;;  %v5945_v17 = vpop.f32.mrb[10].mxu1  ;;  %v4721_v45 = vrot.slane %v4677_v6, 4 }
 0x293   :  { %v4689_v15 = vmax.f32 %v6199_v16, %v6201_v52  ;;  %v2781_v5 = vpop.f32.mrb[11].mxu1 }
 0x294   :  { %v4703_v39 = vrot.slane %v4699_v40, 1 }
 0x295   :  { %v6184_v34 = vpop.f32.mrb[8].mxu0  ;;  %v4693_v14 = vrot.slane %v4689_v15, 1 }
 0x296   :  { %v4622_v46 = vpop.f32.mrb[9].mxu0  ;;  %v6202_v32 = vadd.f32 %v6184_v34, %v5944_v33  ;;  %v4707_v29 = vmax.f32 %v4699_v40, %v4703_v39 }
 0x297   :  { %v6185_v2 = vpop.f32.mrb[10].mxu0  ;;  %v6203_v8 = vadd.f32 %v4622_v46, %v2778_v3  ;;  %v4697_v37 = vmax.f32 %v4689_v15, %v4693_v14 }
 0x298   :  { %v4625_v1 = vpop.f32.mrb[11].mxu0  ;;  %v6204_v56 = vadd.f32 %v6185_v2, %v5945_v17  ;;  %v5948_v42 = vpop.f32.mrb[12].mxu1  ;;  %v4788_v40 = vrot.slane %v4707_v29, 6  ;;  %v4778_v33 = vrot.slane %v4707_v29, 2  ;;  %v4784_v28 = vrot.slane %v4707_v29, 4 }
 0x299   :  { %v6205_v44 = vadd.f32 %v4625_v1, %v2781_v5  ;;  %v2794_v62 = vpop.f32.mrb[13].mxu1  ;;  %v4767_v5 = vrot.slane %v4697_v37, 6  ;;  %v4757_v57 = vrot.slane %v4697_v37, 2  ;;  %v4763_v46 = vrot.slane %v4697_v37, 4 }
 0x29a   :  { %v4680_v48 = vmax.f32 %v6202_v32, %v6204_v56  ;;  %v5949_v31 = vpop.f32.mrb[14].mxu1 }
 0x29b   :  { %v4670_v23 = vmax.f32 %v6203_v8, %v6205_v44  ;;  %v2797_v22 = vpop.f32.mrb[15].mxu1 }
 0x29c   :  { %v4684_v9 = vrot.slane %v4680_v48, 1 }
 0x29d   :  { %v4674_v43 = vrot.slane %v4670_v23, 1  ;;  %v6188_v47 = vpop.f32.mrb[12].mxu0 }
 0x29e   :  { %v4688_v63 = vmax.f32 %v4680_v48, %v4684_v9  ;;  %v4638_v60 = vpop.f32.mrb[13].mxu0  ;;  %v6206_v30 = vadd.f32 %v6188_v47, %v5948_v42 }
 0x29f   :  { %v4678_v0 = vmax.f32 %v4670_v23, %v4674_v43  ;;  %v6189_v24 = vpop.f32.mrb[14].mxu0  ;;  %v6207_v55 = vadd.f32 %v4638_v60, %v2794_v62  ;;  %v4805_v43 = vlaneseq }
 0x2a0   :  { %v4641_v54 = vpop.f32.mrb[15].mxu0  ;;  %v6208_v19 = vadd.f32 %v6189_v24, %v5949_v31  ;;  %v4737_v20 = vrot.slane %v4688_v63, 1  ;;  %v4747_v53 = vrot.slane %v4688_v63, 5  ;;  %v4733_v49 = vrot.slane %v4688_v63, 7 }
 0x2a1   :  { %v6209_v4 = vadd.f32 %v4641_v54, %v2797_v22  ;;  %v4716_v36 = vrot.slane %v4678_v0, 1  ;;  %v4726_v25 = vrot.slane %v4678_v0, 5  ;;  %v4711_v38 = vrot.slane %v4678_v0, 7 }
 0x2a2   :  { %v4700_v27 = vmax.f32 %v6206_v30, %v6208_v19  ;;  %v4738_v12 = vsel %vm4712_vm13, %v4737_v20, %v4736_v26  ;;  %v4748_v61 = vsel %vm4712_vm13, %v4747_v53, %v4746_v13  ;;  %v4734_v18 = vsel %vm4712_vm13, %v4733_v49, %v4687_v59  ;;  %v4803_v26 = vld [vmem:[%s8803_s2] sm:$0xff] }
 0x2a3   :  { %v4690_v21 = vmax.f32 %v6207_v55, %v6209_v4  ;;  %4739 = vrot.lane.b32.xlu1 %v4738_v12, %s6676_s1  ;;  %v4717_v58 = vsel %vm4712_vm13, %v4716_v36, %v4715_v11  ;;  %v4727_v41 = vsel %vm4712_vm13, %v4726_v25, %v4725_v51  ;;  %v4713_v7 = vsel %vm4712_vm13, %v4711_v38, %v4677_v6 }
 0x2a4   :  { %v4704_v16 = vrot.slane %v4700_v27, 1  ;;  %4718 = vrot.lane.b32.xlu0 %v4717_v58, %s6676_s1  ;;  %v4743_v50 = vrot.slane %v4688_v63, 3  ;;  %v4722_v35 = vrot.slane %v4678_v0, 3  ;;  %v4806_v47 = vshrl.u32 %v4805_v43, 7 }
 0x2a5   :  { %v4694_v52 = vrot.slane %v4690_v21, 1  ;;  %v6677_v11 = vmov 1966171168  }
 0x2a6   :  { %v4708_v15 = vmax.f32 %v4700_v27, %v4704_v16  ;;  %v4744_v3 = vsel %vm4712_vm13, %v4743_v50, %v4742_v10  ;;  %v4723_v17 = vsel %vm4712_vm13, %v4722_v35, %v4721_v45  ;;  %v4815_v22 = vsub.s32 2, %v4806_v47 }
 0x2a7   :  { %v4698_v34 = vmax.f32 %v4690_v21, %v4694_v52  ;;  %4749 = vrot.lane.b32.xlu1 %v4748_v61, %s6676_s1  ;;  %v4807_v13 = vsub.s32 0, %v4806_v47  ;;  %v4819_v10 = vsub.s32 3, %v4806_v47  ;;  %v4811_v63 = vsub.s32 1, %v4806_v47 }
 0x2a8   :  { %4728 = vrot.lane.b32.xlu0 %v4727_v41, %s6676_s1  ;;  %v4789_v32 = vrot.slane %v4708_v15, 5  ;;  %v4779_v2 = vrot.slane %v4708_v15, 1  ;;  %v4785_v8 = vrot.slane %v4708_v15, 3  ;;  %v4775_v1 = vrot.slane %v4708_v15, 7 }
 0x2a9   :  { %v4768_v56 = vrot.slane %v4698_v34, 5  ;;  %v4758_v59 = vrot.slane %v4698_v34, 1  ;;  %v4764_v44 = vrot.slane %v4698_v34, 3  ;;  %v4754_v6 = vrot.slane %v4698_v34, 7 }
 0x2aa   :  { %v4790_v48 = vsel %vm4712_vm13, %v4789_v32, %v4788_v40  ;;  %v4780_v42 = vsel %vm4712_vm13, %v4779_v2, %v4778_v33  ;;  %v8772_v39 = vsel %vm4712_vm13, %v4785_v8, %v4784_v28  ;;  %v8775_v14 = vsel %vm4712_vm13, %v4775_v1, %v4707_v29 }
 0x2ab   :  { %v4769_v23 = vsel %vm4712_vm13, %v4768_v56, %v4767_v5  ;;  %v4759_v62 = vsel %vm4712_vm13, %v4758_v59, %v4757_v57  ;;  %v4765_v9 = vsel %vm4712_vm13, %v4764_v44, %v4763_v46  ;;  %v4755_v31 = vsel %vm4712_vm13, %v4754_v6, %v4697_v37 }
 0x2ac   :  { %4770 = vrot.lane.b32.xlu1 %v4769_v23, %s6676_s1  ;;  %4760 = vrot.lane.b32.xlu0 %v4759_v62, %s6676_s1  ;;  %v4816_v60 = vrot.slane %v4803_v26, %v4815_v22  ;;  %v4882_v51 = vunpack.c.l.s4 %v6677_v11  ;;  %v4808_v37 = vrot.slane %v4803_v26, %v4807_v13  ;;  %v4820_v55 = vrot.slane %v4803_v26, %v4819_v10 }
 0x2ad   :  { %v4812_v54 = vrot.slane %v4803_v26, %v4811_v63  ;;  %v4827_v19 = vsub.s32 5, %v4806_v47  ;;  %v4823_v20 = vsub.s32 4, %v4806_v47  ;;  %v4835_v61 = vsub.s32 7, %v4806_v47 }
 0x2ae   :  { %v4883_v49 = vunpack.c.0.s8 %v4882_v51  ;;  %v4831_v41 = vsub.s32 6, %v4806_v47 }
 0x2af   :  { %v4828_v21 = vrot.slane %v4803_v26, %v4827_v19  ;;  %v4824_v58 = vrot.slane %v4803_v26, %v4823_v20  ;;  %v4836_v28 = vrot.slane %v4803_v26, %v4835_v61 }
 0x2b0   :  { %4791 = vrot.lane.b32.xlu1 %v4790_v48, %s6676_s1  ;;  %4781 = vrot.lane.b32.xlu0 %v4780_v42, %s6676_s1  ;;  %v4886_v16 = vsub.s32 %v4883_v49, %v4806_v47  ;;  %v4832_v57 = vrot.slane %v4803_v26, %v4831_v41 }
 0x315   :  { %v4740_v30 = vpop.permute.xlu1 %4739 }
 0x316   :  { %v4797_v29 = vsel %vm4794_vm14, %v4734_v18, %v4740_v30  ;;  %v4719_v0 = vpop.permute.xlu0 %4718 }
 0x317   :  { %v4795_v24 = vsel %vm4794_vm14, %v4713_v7, %v4719_v0  ;;  %v4847_v53 = vadd.f32 %v4816_v60, %v4797_v29 }
 0x318   :  { %v4845_v36 = vadd.f32 %v4808_v37, %v4795_v24 }
 0x319   :  { %v4750_v4 = vpop.permute.xlu1 %4749  ;;  %v4855_v7 = vmax.f32 %v4847_v53, 0.0 }
 0x31a   :  { %v4798_v25 = vsel %vm4794_vm14, %v4744_v3, %v4750_v4  ;;  %v4729_v38 = vpop.permute.xlu0 %4728  ;;  %v4853_v45 = vmax.f32 %v4845_v36, 0.0 }
 0x31b   :  { %v4848_v27 = vadd.f32 %v4820_v55, %v4798_v25  ;;  %v4796_v12 = vsel %vm4794_vm14, %v4723_v17, %v4729_v38 }
 0x31c   :  { %v4846_v18 = vadd.f32 %v4812_v54, %v4796_v12 }
 0x31d   :  { %v4856_v50 = vmax.f32 %v4848_v27, 0.0 }
 0x31e   :  { %v4854_v35 = vmax.f32 %v4846_v18, 0.0  ;;  %v4771_v52 = vpop.permute.xlu1 %4770  ;;  %v4761_v40 = vpop.permute.xlu0 %4760 }
 0x31f   :  { %v5437_v33 = vpack.c.bf16 %v4856_v50, %v4855_v7  ;;  %v4800_v15 = vsel %vm4794_vm14, %v4765_v9, %v4771_v52  ;;  %v4799_v3 = vsel %vm4794_vm14, %v4755_v31, %v4761_v40 }
 0x320   :  { %v5436_v34 = vpack.c.bf16 %v4854_v35, %v4853_v45  ;;  %v4850_v17 = vadd.f32 %v4828_v21, %v4800_v15  ;;  %v4849_v5 = vadd.f32 %v4824_v58, %v4799_v3 }
 0x321   :  { %v4894_v46 = vrot.slane %v5437_v33, %v4886_v16 }
 0x322   :  { %v4887_v32 = vrot.slane %v5436_v34, %v4886_v16  ;;  %v4858_v2 = vmax.f32 %v4850_v17, 0.0  ;;  %v4857_v8 = vmax.f32 %v4849_v5, 0.0  ;;  %v4792_v1 = vpop.permute.xlu1 %4791  ;;  %v4782_v56 = vpop.permute.xlu0 %4781 }
 0x323   :  { %v4802_v59 = vsel %vm4794_vm14, %v8772_v39, %v4792_v1  ;;  %v4801_v44 = vsel %vm4794_vm14, %v8775_v14, %v4782_v56 }
 0x324   :  { %v4909_v6 = vcombine.low %v4887_v32, %v4894_v46  ;;  %v5438_v48 = vpack.c.bf16 %v4858_v2, %v4857_v8  ;;  %v4852_v42 = vadd.f32 %v4836_v28, %v4802_v59  ;;  %v4851_v23 = vadd.f32 %v4832_v57, %v4801_v44 }
 0x326   :  { %v4860_v62 = vmax.f32 %v4852_v42, 0.0  ;;  %v4859_v9 = vmax.f32 %v4851_v23, 0.0  ;;  %v4901_v43 = vrot.slane %v5438_v48, %v4886_v16  ;;  %v4917_v26 = vrot.slane %v4909_v6, %v4886_v16 }
 0x328   :  { %v5439_v31 = vpack.c.bf16 %v4860_v62, %v4859_v9 }
 0x32a   :  { %v4908_v47 = vrot.slane %v5439_v31, %v4886_v16 }
 0x32c   :  { %v4910_v22 = vcombine.low %v4901_v43, %v4908_v47 }
 0x32e   :  { %v4924_v13 = vrot.slane %v4910_v22, %v4886_v16 }
 0x330   :  { %v4925_v10 = vcombine.low %v4917_v26, %v4924_v13 }
 0x332   :  { %4927 = vst [vmem:[%s8804_s3] sm:$0xff] %v4925_v10 }

</bundles_post_ra>
